<compile_context>
chip_gen: v6e
topology: v6e:2x2x1
jax: 0.10.0
libtpu: 0.0.40
codegen_flags: <defaults>
</compile_context>

<pallas_src>
import math

import jax
import jax.numpy as jnp
from jax.experimental import pallas as pl
from jax.experimental.pallas import tpu as pltpu

HIDDEN = 32
HEADS = 4
HEAD_DIM = HIDDEN // HEADS
INTERMEDIATE = 64
LAYERS = 2
VOCAB = 100
MAX_POS = 64
LN_EPS = 1e-12                    # BERT layer-norm eps

HP = 128                          # hidden padded to one full 128-lane vreg width
IP = 128                          # intermediate padded to 128 lanes
QKV_COLS = 3 * HEADS * HP         # q/k/v: one 128-lane slab per (matrix, head)
NEG_INF = -1e30


# ---------------------------- fused encoder kernel ----------------------------

def _bert_encoder_kernel(lens_ref,                       # scalar-prefetch [n] int32
                         x_ref, emb_ln_ref,
                         wqkv_ref, bqkv_ref, wo_ref, bo_ref, ln1_ref,
                         wi_ref, bi_ref, wo2_ref, bo2_ref, ln2_ref,
                         o_ref):
    t = pl.program_id(0)
    length = lens_ref[t]
    SP = x_ref.shape[0]
    scale = 1.0 / math.sqrt(HEAD_DIM)
    inv_hidden = 1.0 / HIDDEN

    # Masks hoisted once (not re-built per layer).
    feat_mask = (jax.lax.broadcasted_iota(jnp.int32, (SP, HP), 1)
                 < HIDDEN).astype(jnp.float32)            # true hidden lanes
    row_mask = (jax.lax.broadcasted_iota(jnp.int32, (SP, HP), 0)
                < length).astype(jnp.float32)             # real token rows
    key_mask = jax.lax.broadcasted_iota(jnp.int32, (SP, SP), 1) < length

    def layer_norm(h, gb):
        # LN over the TRUE 32 features; padded lanes (g=b=0) stay exactly zero.
        g = gb[0:1, :]
        b = gb[1:2, :]
        mean = jnp.sum(h * feat_mask, axis=-1, keepdims=True) * inv_hidden
        d = (h - mean) * feat_mask
        var = jnp.sum(d * d, axis=-1, keepdims=True) * inv_hidden
        return (d * jax.lax.rsqrt(var + LN_EPS) * g + b) * feat_mask

    def dense(h, w, b):
        # bf16 MXU inputs, f32 accumulate; bias add in f32.
        return jnp.dot(h.astype(jnp.bfloat16), w,
                       preferred_element_type=jnp.float32) + b

    x = layer_norm(x_ref[...], emb_ln_ref[...])           # embedding layer norm

    for l in range(LAYERS):
        # ---- self-attention (fused QKV, per-head 128-lane slabs) ----
        qkv = dense(x, wqkv_ref[l], bqkv_ref[l])           # [SP, 3*HEADS*HP]
        attn = jnp.zeros((SP, HP), jnp.float32)
        for h in range(HEADS):
            qh = qkv[:, (0 * HEADS + h) * HP:(0 * HEADS + h + 1) * HP]
            kh = qkv[:, (1 * HEADS + h) * HP:(1 * HEADS + h + 1) * HP]
            vh = qkv[:, (2 * HEADS + h) * HP:(2 * HEADS + h + 1) * HP]
            s = jax.lax.dot_general(
                qh.astype(jnp.bfloat16), kh.astype(jnp.bfloat16),
                (((1,), (1,)), ((), ())),
                preferred_element_type=jnp.float32) * scale        # [SP, SP]
            s = jnp.where(key_mask, s, NEG_INF)            # mask padded key positions
            s = s - jnp.max(s, axis=-1, keepdims=True)
            p = jnp.exp(s)
            p = p * pl.reciprocal(jnp.sum(p, axis=-1, keepdims=True), approx=True)
            ctx = jnp.dot(p.astype(jnp.bfloat16), vh.astype(jnp.bfloat16),
                          preferred_element_type=jnp.float32)       # [SP, HP]
            # head merge == accumulate this head's slice of the output projection
            attn = attn + jnp.dot(ctx.astype(jnp.bfloat16), wo_ref[l, h],
                                  preferred_element_type=jnp.float32)
        x = layer_norm(x + attn + bo_ref[l], ln1_ref[l])

        # ---- feed-forward ----
        h1 = dense(x, wi_ref[l], bi_ref[l])                # [SP, IP]
        # TODO(synk): HF BERT uses exact (erf) GELU; tanh approximation used here.
        h1 = jax.nn.gelu(h1, approximate=True)
        h2 = dense(h1, wo2_ref[l], bo2_ref[l])             # [SP, HP]
        x = layer_norm(x + h2, ln2_ref[l])

    # pad_sequence semantics: rows >= length are exactly 0.0
    o_ref[...] = x * row_mask


def _const_spec(shape):
    nd = len(shape)
    return pl.BlockSpec(shape, lambda t, lens_ref: (0,) * nd)


def _encoder_call(pk, x0, lens):
    n, SP, _ = x0.shape
    grid_spec = pltpu.PrefetchScalarGridSpec(
        num_scalar_prefetch=1,
        grid=(n,),
        in_specs=[
            pl.BlockSpec((None, SP, HP), lambda t, lens_ref: (t, 0, 0)),  # x0 per text
            _const_spec((2, HP)),                       # emb LN gamma/beta
            _const_spec((LAYERS, HP, QKV_COLS)),        # fused QKV weights (bf16)
            _const_spec((LAYERS, 1, QKV_COLS)),         # fused QKV bias
            _const_spec((LAYERS, HEADS, HP, HP)),       # per-head output proj (bf16)
            _const_spec((LAYERS, 1, HP)),               # output proj bias
            _const_spec((LAYERS, 2, HP)),               # attn LN gamma/beta
            _const_spec((LAYERS, HP, IP)),              # FFN in (bf16)
            _const_spec((LAYERS, 1, IP)),               # FFN in bias
            _const_spec((LAYERS, IP, HP)),              # FFN out (bf16)
            _const_spec((LAYERS, 1, HP)),               # FFN out bias
            _const_spec((LAYERS, 2, HP)),               # FFN LN gamma/beta
        ],
        out_specs=pl.BlockSpec((None, SP, HP), lambda t, lens_ref: (t, 0, 0)),
    )
    return pl.pallas_call(
        _bert_encoder_kernel,
        grid_spec=grid_spec,
        out_shape=jax.ShapeDtypeStruct((n, SP, HP), jnp.float32),
        compiler_params=pltpu.CompilerParams(
            dimension_semantics=("parallel",)),          # texts -> 2 TCs on v7x
    )(lens, x0, pk["emb_ln"], pk["wqkv"], pk["bqkv"], pk["wo"], pk["bo"],
      pk["ln1"], pk["wi"], pk["bi"], pk["wo2"], pk["bo2"], pk["ln2"])


# ---------------------------- optional small kernels ----------------------------

def _global_layernorm_kernel(x_ref, o_ref):
    # F.layer_norm(out, out.shape): normalize over ALL elements, no affine params.
    x = x_ref[...]
    mean = jnp.mean(x)
    var = jnp.mean(jnp.square(x - mean))
    o_ref[...] = (x - mean) * jax.lax.rsqrt(var + 1e-5)


def pallas_global_layernorm(x):
    nd = x.ndim
    return pl.pallas_call(
        _global_layernorm_kernel,
        in_specs=[pl.BlockSpec(x.shape, lambda: (0,) * nd)],
        out_specs=pl.BlockSpec(x.shape, lambda: (0,) * nd),
        out_shape=jax.ShapeDtypeStruct(x.shape, jnp.float32),
    )(x)


def _pooler_kernel(cls_ref, w_ref, b_ref, o_ref):
    o_ref[...] = jnp.tanh(
        jnp.dot(cls_ref[...].astype(jnp.bfloat16), w_ref[...],
                preferred_element_type=jnp.float32) + b_ref[...])


def pallas_pooler(cls, w, b):
    n = cls.shape[0]
    return pl.pallas_call(
        _pooler_kernel,
        in_specs=[pl.BlockSpec((n, HP), lambda: (0, 0)),
                  pl.BlockSpec((HP, HP), lambda: (0, 0)),
                  pl.BlockSpec((1, HP), lambda: (0, 0))],
        out_specs=pl.BlockSpec((n, HP), lambda: (0, 0)),
        out_shape=jax.ShapeDtypeStruct((n, HP), jnp.float32),
    )(cls, w, b)


# ---------------------------- parameters ----------------------------

def init_params(key):
    def dense_p(k, din, dout):
        return {
            "w": 0.02 * jax.random.normal(k, (din, dout), jnp.float32),
            "b": jnp.zeros((dout,), jnp.float32),
        }

    keys = jax.random.split(key, 8 + LAYERS)
    params = {
        "word_emb": 0.02 * jax.random.normal(keys[0], (VOCAB, HIDDEN), jnp.float32),
        "pos_emb": 0.02 * jax.random.normal(keys[1], (MAX_POS, HIDDEN), jnp.float32),
        "type_emb": 0.02 * jax.random.normal(keys[2], (2, HIDDEN), jnp.float32),
        "emb_ln_g": jnp.ones((HIDDEN,), jnp.float32),
        "emb_ln_b": jnp.zeros((HIDDEN,), jnp.float32),
        "pooler": dense_p(keys[3], HIDDEN, HIDDEN),
        "layers": [],
    }
    for l in range(LAYERS):
        lk = jax.random.split(keys[8 + l], 6)
        params["layers"].append({
            "q": dense_p(lk[0], HIDDEN, HIDDEN),
            "k": dense_p(lk[1], HIDDEN, HIDDEN),
            "v": dense_p(lk[2], HIDDEN, HIDDEN),
            "o": dense_p(lk[3], HIDDEN, HIDDEN),
            "attn_ln_g": jnp.ones((HIDDEN,), jnp.float32),
            "attn_ln_b": jnp.zeros((HIDDEN,), jnp.float32),
            "ffn_i": dense_p(lk[4], HIDDEN, INTERMEDIATE),
            "ffn_o": dense_p(lk[5], INTERMEDIATE, HIDDEN),
            "ffn_ln_g": jnp.ones((HIDDEN,), jnp.float32),
            "ffn_ln_b": jnp.zeros((HIDDEN,), jnp.float32),
        })
    return params


def pack_params(params):
    """One-time repack: lane-pad everything to 128, fuse QKV, head-expand the
    attention output projection, cast matmul weights to bf16 (biases/LN f32)."""
    wqkv = jnp.zeros((LAYERS, HP, QKV_COLS), jnp.float32)
    bqkv = jnp.zeros((LAYERS, 1, QKV_COLS), jnp.float32)
    wo = jnp.zeros((LAYERS, HEADS, HP, HP), jnp.float32)
    bo = jnp.zeros((LAYERS, 1, HP), jnp.float32)
    ln1 = jnp.zeros((LAYERS, 2, HP), jnp.float32)
    wi = jnp.zeros((LAYERS, HP, IP), jnp.float32)
    bi = jnp.zeros((LAYERS, 1, IP), jnp.float32)
    wo2 = jnp.zeros((LAYERS, IP, HP), jnp.float32)
    bo2 = jnp.zeros((LAYERS, 1, HP), jnp.float32)
    ln2 = jnp.zeros((LAYERS, 2, HP), jnp.float32)

    for l, lp in enumerate(params["layers"]):
        for m, name in enumerate(("q", "k", "v")):
            w, b = lp[name]["w"], lp[name]["b"]
            for h in range(HEADS):
                col = (m * HEADS + h) * HP
                wqkv = wqkv.at[l, :HIDDEN, col:col + HEAD_DIM].set(
                    w[:, h * HEAD_DIM:(h + 1) * HEAD_DIM])
                bqkv = bqkv.at[l, 0, col:col + HEAD_DIM].set(
                    b[h * HEAD_DIM:(h + 1) * HEAD_DIM])
        for h in range(HEADS):
            wo = wo.at[l, h, :HEAD_DIM, :HIDDEN].set(
                lp["o"]["w"][h * HEAD_DIM:(h + 1) * HEAD_DIM, :])
        bo = bo.at[l, 0, :HIDDEN].set(lp["o"]["b"])
        ln1 = ln1.at[l, 0, :HIDDEN].set(lp["attn_ln_g"])
        ln1 = ln1.at[l, 1, :HIDDEN].set(lp["attn_ln_b"])
        wi = wi.at[l, :HIDDEN, :INTERMEDIATE].set(lp["ffn_i"]["w"])
        bi = bi.at[l, 0, :INTERMEDIATE].set(lp["ffn_i"]["b"])
        wo2 = wo2.at[l, :INTERMEDIATE, :HIDDEN].set(lp["ffn_o"]["w"])
        bo2 = bo2.at[l, 0, :HIDDEN].set(lp["ffn_o"]["b"])
        ln2 = ln2.at[l, 0, :HIDDEN].set(lp["ffn_ln_g"])
        ln2 = ln2.at[l, 1, :HIDDEN].set(lp["ffn_ln_b"])

    emb_ln = (jnp.zeros((2, HP), jnp.float32)
              .at[0, :HIDDEN].set(params["emb_ln_g"])
              .at[1, :HIDDEN].set(params["emb_ln_b"]))
    wp = jnp.zeros((HP, HP), jnp.float32).at[:HIDDEN, :HIDDEN].set(params["pooler"]["w"])
    bp = jnp.zeros((1, HP), jnp.float32).at[0, :HIDDEN].set(params["pooler"]["b"])

    return {
        "word_emb": params["word_emb"],
        "pos_emb": params["pos_emb"],
        "type_emb": params["type_emb"],
        "emb_ln": emb_ln,
        "wqkv": wqkv.astype(jnp.bfloat16), "bqkv": bqkv,
        "wo": wo.astype(jnp.bfloat16), "bo": bo, "ln1": ln1,
        "wi": wi.astype(jnp.bfloat16), "bi": bi,
        "wo2": wo2.astype(jnp.bfloat16), "bo2": bo2, "ln2": ln2,
        "pooler_w": wp.astype(jnp.bfloat16), "pooler_b": bp,
    }


# ---------------------------- forward (HuggingFaceBERT.extract_features) ----------------------------

def huggingface_bert_forward(packed, token_id_seqs, pooled=False, output_norm=False):
    """Mirrors HuggingFaceBERT.extract_features: per-text BERT encode (each text
    attends only over its own tokens), pad_sequence to max length with 0.0,
    optional F.layer_norm(out, out.shape).  freeze=True -> inference only."""
    # TODO(synk): BertTokenizer text->ids tokenization has no Pallas equivalent;
    # synthetic integer token-id sequences are used instead.
    n = len(token_id_seqs)
    lengths = [int(ids.shape[0]) for ids in token_id_seqs]
    max_len = max(lengths)
    SP = ((max_len + 7) // 8) * 8                    # pad seq to sublane multiple

    ids_padded = jnp.zeros((n, SP), jnp.int32)
    for i, ids in enumerate(token_id_seqs):
        ids_padded = ids_padded.at[i, :lengths[i]].set(ids.astype(jnp.int32))
    lens = jnp.array(lengths, jnp.int32)

    # Embedding gathers stay in plain JAX (glue); activations padded to 128 lanes.
    emb = (packed["word_emb"][ids_padded]
           + packed["pos_emb"][:SP][None, :, :]
           + packed["type_emb"][0][None, None, :])                   # [n, SP, HIDDEN]
    x0 = jnp.zeros((n, SP, HP), jnp.float32).at[:, :, :HIDDEN].set(emb)

    out_padded = _encoder_call(packed, x0, lens)                      # [n, SP, HP]

    if pooled:
        cls = out_padded[:, 0, :]                                     # [n, HP]
        pooled_out = pallas_pooler(cls, packed["pooler_w"], packed["pooler_b"])
        out = pooled_out[:, None, :HIDDEN]          # pad_sequence of [1,H] -> [n,1,H]
    else:
        out = out_padded[:, :max_len, :HIDDEN]                        # [n, max_len, H]

    if output_norm:
        out = pallas_global_layernorm(out)
    return out


# ---------------------------- main ----------------------------

if __name__ == "__main__":
    key = jax.random.PRNGKey(0)
    pkey, t0key, t1key = jax.random.split(key, 3)
    params = init_params(pkey)
    packed = pack_params(params)

    # Two "tokenized texts" of different lengths (BERT attends per text only;
    # pad_sequence pads the stacked output to the max length with 0.0).
    token_id_seqs = [
        jax.random.randint(t0key, (6,), 0, VOCAB),
        jax.random.randint(t1key, (8,), 0, VOCAB),
    ]

    out = huggingface_bert_forward(packed, token_id_seqs,
                                   pooled=False, output_norm=False)
    out = jax.block_until_ready(out)
    assert out.shape == (2, 8, HIDDEN), out.shape
    # padded tail of the shorter sequence must be exactly 0.0
    assert bool(jnp.all(out[0, 6:] == 0.0))
    print("KERNEL_OK")
</pallas_src>

<mosaic_0001>
module attributes {stable_mosaic.version = 11 : i64} {
  func.func @_bert_encoder_kernel(%arg0: i32, %arg1: memref<2xi32, #tpu.memory_space<smem>>, %arg2: memref<1x8x128xf32, #tpu.memory_space<vmem>>, %arg3: memref<2x128xf32, #tpu.memory_space<vmem>>, %arg4: memref<2x128x1536xbf16, #tpu.memory_space<vmem>>, %arg5: memref<2x1x1536xf32, #tpu.memory_space<vmem>>, %arg6: memref<2x4x128x128xbf16, #tpu.memory_space<vmem>>, %arg7: memref<2x1x128xf32, #tpu.memory_space<vmem>>, %arg8: memref<2x2x128xf32, #tpu.memory_space<vmem>>, %arg9: memref<2x128x128xbf16, #tpu.memory_space<vmem>>, %arg10: memref<2x1x128xf32, #tpu.memory_space<vmem>>, %arg11: memref<2x128x128xbf16, #tpu.memory_space<vmem>>, %arg12: memref<2x1x128xf32, #tpu.memory_space<vmem>>, %arg13: memref<2x2x128xf32, #tpu.memory_space<vmem>>, %arg14: memref<1x8x128xf32, #tpu.memory_space<vmem>>) attributes {dimension_semantics = [#tpu.dimension_semantics<parallel>], iteration_bounds = array<i64: 2>, scalar_prefetch = 1 : i64, scratch_operands = 0 : i64, tpu.core_type = #tpu.core_type<tc>, window_params = [{transform_indices = @transform_0, window_bounds = array<i64: 1, 8, 128>}, {pipeline_mode = #tpu.pipeline_mode<synchronous>, transform_indices = @transform_1, window_bounds = array<i64: 2, 128>}, {pipeline_mode = #tpu.pipeline_mode<synchronous>, transform_indices = @transform_2, window_bounds = array<i64: 2, 128, 1536>}, {pipeline_mode = #tpu.pipeline_mode<synchronous>, transform_indices = @transform_3, window_bounds = array<i64: 2, 1, 1536>}, {pipeline_mode = #tpu.pipeline_mode<synchronous>, transform_indices = @transform_4, window_bounds = array<i64: 2, 4, 128, 128>}, {pipeline_mode = #tpu.pipeline_mode<synchronous>, transform_indices = @transform_5, window_bounds = array<i64: 2, 1, 128>}, {pipeline_mode = #tpu.pipeline_mode<synchronous>, transform_indices = @transform_6, window_bounds = array<i64: 2, 2, 128>}, {pipeline_mode = #tpu.pipeline_mode<synchronous>, transform_indices = @transform_7, window_bounds = array<i64: 2, 128, 128>}, {pipeline_mode = #tpu.pipeline_mode<synchronous>, transform_indices = @transform_8, window_bounds = array<i64: 2, 1, 128>}, {pipeline_mode = #tpu.pipeline_mode<synchronous>, transform_indices = @transform_9, window_bounds = array<i64: 2, 128, 128>}, {pipeline_mode = #tpu.pipeline_mode<synchronous>, transform_indices = @transform_10, window_bounds = array<i64: 2, 1, 128>}, {pipeline_mode = #tpu.pipeline_mode<synchronous>, transform_indices = @transform_11, window_bounds = array<i64: 2, 2, 128>}, {transform_indices = @transform_12, window_bounds = array<i64: 1, 8, 128>}]} {
    %0 = arith.index_cast %arg0 : i32 to index
    %1 = memref.load %arg1[%0] : memref<2xi32, #tpu.memory_space<smem>>
    %2 = tpu.iota {dimensions = array<i32: 1>} : vector<8x128xi32>
    %c32_i32 = arith.constant 32 : i32
    %3 = vector.broadcast %c32_i32 : i32 to vector<8x128xi32>
    %4 = arith.cmpi slt, %2, %3 : vector<8x128xi32>
    %5 = arith.extui %4 : vector<8x128xi1> to vector<8x128xi32>
    %6 = arith.sitofp %5 : vector<8x128xi32> to vector<8x128xf32>
    %7 = tpu.iota {dimensions = array<i32: 0>} : vector<8x128xi32>
    %8 = vector.broadcast %1 : i32 to vector<8x128xi32>
    %9 = arith.cmpi slt, %7, %8 : vector<8x128xi32>
    %10 = arith.extui %9 : vector<8x128xi1> to vector<8x128xi32>
    %11 = arith.sitofp %10 : vector<8x128xi32> to vector<8x128xf32>
    %12 = tpu.iota {dimensions = array<i32: 1>} : vector<8x8xi32>
    %13 = vector.broadcast %1 : i32 to vector<8x8xi32>
    %14 = arith.cmpi slt, %12, %13 : vector<8x8xi32>
    %c0 = arith.constant 0 : index
    %c0_0 = arith.constant 0 : index
    %c0_1 = arith.constant 0 : index
    %15 = vector.load %arg2[%c0, %c0_0, %c0_1] : memref<1x8x128xf32, #tpu.memory_space<vmem>>, vector<1x8x128xf32>
    %16 = vector.shape_cast %15 : vector<1x8x128xf32> to vector<8x128xf32>
    %c0_2 = arith.constant 0 : index
    %c0_3 = arith.constant 0 : index
    %17 = vector.load %arg3[%c0_2, %c0_3] : memref<2x128xf32, #tpu.memory_space<vmem>>, vector<2x128xf32>
    %18 = vector.extract_strided_slice %17 {offsets = [0, 0], sizes = [1, 128], strides = [1, 1]} : vector<2x128xf32> to vector<1x128xf32>
    %19 = vector.extract_strided_slice %17 {offsets = [1, 0], sizes = [1, 128], strides = [1, 1]} : vector<2x128xf32> to vector<1x128xf32>
    %20 = arith.mulf %16, %6 : vector<8x128xf32>
    %cst = arith.constant dense<0.000000e+00> : vector<8xf32>
    %21 = vector.multi_reduction <add>, %20, %cst [1] : vector<8x128xf32> to vector<8xf32>
    %22 = vector.shape_cast %21 : vector<8xf32> to vector<8x1xf32>
    %cst_4 = arith.constant 3.125000e-02 : f32
    %23 = vector.broadcast %cst_4 : f32 to vector<8x1xf32>
    %24 = arith.mulf %22, %23 : vector<8x1xf32>
    %25 = vector.broadcast %24 : vector<8x1xf32> to vector<8x128xf32>
    %26 = arith.subf %16, %25 : vector<8x128xf32>
    %27 = arith.mulf %26, %6 : vector<8x128xf32>
    %28 = arith.mulf %27, %27 : vector<8x128xf32>
    %cst_5 = arith.constant dense<0.000000e+00> : vector<8xf32>
    %29 = vector.multi_reduction <add>, %28, %cst_5 [1] : vector<8x128xf32> to vector<8xf32>
    %30 = vector.shape_cast %29 : vector<8xf32> to vector<8x1xf32>
    %cst_6 = arith.constant 3.125000e-02 : f32
    %31 = vector.broadcast %cst_6 : f32 to vector<8x1xf32>
    %32 = arith.mulf %30, %31 : vector<8x1xf32>
    %cst_7 = arith.constant 9.99999996E-13 : f32
    %33 = vector.broadcast %cst_7 : f32 to vector<8x1xf32>
    %34 = arith.addf %32, %33 : vector<8x1xf32>
    %35 = math.rsqrt %34 : vector<8x1xf32>
    %36 = vector.broadcast %35 : vector<8x1xf32> to vector<8x128xf32>
    %37 = arith.mulf %27, %36 : vector<8x128xf32>
    %38 = vector.broadcast %18 : vector<1x128xf32> to vector<8x128xf32>
    %39 = arith.mulf %37, %38 : vector<8x128xf32>
    %40 = vector.broadcast %19 : vector<1x128xf32> to vector<8x128xf32>
    %41 = arith.addf %39, %40 : vector<8x128xf32>
    %42 = arith.mulf %41, %6 : vector<8x128xf32>
    %c0_8 = arith.constant 0 : index
    %c0_9 = arith.constant 0 : index
    %c0_10 = arith.constant 0 : index
    %43 = vector.load %arg4[%c0_8, %c0_9, %c0_10] : memref<2x128x1536xbf16, #tpu.memory_space<vmem>>, vector<1x128x1536xbf16>
    %44 = vector.shape_cast %43 : vector<1x128x1536xbf16> to vector<128x1536xbf16>
    %c0_11 = arith.constant 0 : index
    %c0_12 = arith.constant 0 : index
    %c0_13 = arith.constant 0 : index
    %45 = vector.load %arg5[%c0_11, %c0_12, %c0_13] : memref<2x1x1536xf32, #tpu.memory_space<vmem>>, vector<1x1x1536xf32>
    %46 = vector.shape_cast %45 : vector<1x1x1536xf32> to vector<1x1536xf32>
    %47 = arith.truncf %42 : vector<8x128xf32> to vector<8x128xbf16>
    %cst_14 = arith.constant dense<0.000000e+00> : vector<8x1536xf32>
    %48 = tpu.matmul %47, %44, %cst_14 {dimension_numbers = #tpu.dot_dimension_numbers<[1], [0], [0], [1], [0, 0, 1, 1], [], []>} : vector<8x128xbf16>, vector<128x1536xbf16>, vector<8x1536xf32> -> vector<8x1536xf32>
    %49 = vector.broadcast %46 : vector<1x1536xf32> to vector<8x1536xf32>
    %50 = arith.addf %48, %49 : vector<8x1536xf32>
    %cst_15 = arith.constant 0.000000e+00 : f32
    %51 = vector.broadcast %cst_15 : f32 to vector<8x128xf32>
    %52 = vector.extract_strided_slice %50 {offsets = [0, 0], sizes = [8, 128], strides = [1, 1]} : vector<8x1536xf32> to vector<8x128xf32>
    %53 = vector.extract_strided_slice %50 {offsets = [0, 512], sizes = [8, 128], strides = [1, 1]} : vector<8x1536xf32> to vector<8x128xf32>
    %54 = vector.extract_strided_slice %50 {offsets = [0, 1024], sizes = [8, 128], strides = [1, 1]} : vector<8x1536xf32> to vector<8x128xf32>
    %55 = arith.truncf %52 : vector<8x128xf32> to vector<8x128xbf16>
    %56 = arith.truncf %53 : vector<8x128xf32> to vector<8x128xbf16>
    %cst_16 = arith.constant dense<0.000000e+00> : vector<8x8xf32>
    %57 = tpu.matmul %55, %56, %cst_16 {dimension_numbers = #tpu.dot_dimension_numbers<[1], [1], [0], [0], [0, 0, 1, 0], [], []>} : vector<8x128xbf16>, vector<8x128xbf16>, vector<8x8xf32> -> vector<8x8xf32>
    %cst_17 = arith.constant 0.353553385 : f32
    %58 = vector.broadcast %cst_17 : f32 to vector<8x8xf32>
    %59 = arith.mulf %57, %58 : vector<8x8xf32>
    %cst_18 = arith.constant -1.000000e+30 : f32
    %60 = vector.broadcast %cst_18 : f32 to vector<8x8xf32>
    %61 = arith.select %14, %59, %60 : vector<8x8xi1>, vector<8x8xf32>
    %cst_19 = arith.constant dense<0xFF800000> : vector<8xf32>
    %62 = vector.multi_reduction <maximumf>, %61, %cst_19 [1] : vector<8x8xf32> to vector<8xf32>
    %63 = vector.shape_cast %62 : vector<8xf32> to vector<8x1xf32>
    %64 = vector.broadcast %63 : vector<8x1xf32> to vector<8x8xf32>
    %65 = arith.subf %61, %64 : vector<8x8xf32>
    %66 = math.exp %65 : vector<8x8xf32>
    %cst_20 = arith.constant dense<0.000000e+00> : vector<8xf32>
    %67 = vector.multi_reduction <add>, %66, %cst_20 [1] : vector<8x8xf32> to vector<8xf32>
    %68 = vector.shape_cast %67 : vector<8xf32> to vector<8x1xf32>
    %69 = tpu.reciprocal %68 {approx = true} : vector<8x1xf32> -> vector<8x1xf32>
    %70 = vector.broadcast %69 : vector<8x1xf32> to vector<8x8xf32>
    %71 = arith.mulf %66, %70 : vector<8x8xf32>
    %72 = arith.truncf %71 : vector<8x8xf32> to vector<8x8xbf16>
    %73 = arith.truncf %54 : vector<8x128xf32> to vector<8x128xbf16>
    %cst_21 = arith.constant dense<0.000000e+00> : vector<8x128xf32>
    %74 = tpu.matmul %72, %73, %cst_21 {dimension_numbers = #tpu.dot_dimension_numbers<[1], [0], [0], [1], [0, 0, 1, 1], [], []>} : vector<8x8xbf16>, vector<8x128xbf16>, vector<8x128xf32> -> vector<8x128xf32>
    %75 = arith.truncf %74 : vector<8x128xf32> to vector<8x128xbf16>
    %c0_22 = arith.constant 0 : index
    %c0_23 = arith.constant 0 : index
    %c0_24 = arith.constant 0 : index
    %c0_25 = arith.constant 0 : index
    %76 = vector.load %arg6[%c0_22, %c0_23, %c0_24, %c0_25] : memref<2x4x128x128xbf16, #tpu.memory_space<vmem>>, vector<1x1x128x128xbf16>
    %77 = vector.shape_cast %76 : vector<1x1x128x128xbf16> to vector<128x128xbf16>
    %cst_26 = arith.constant dense<0.000000e+00> : vector<8x128xf32>
    %78 = tpu.matmul %75, %77, %cst_26 {dimension_numbers = #tpu.dot_dimension_numbers<[1], [0], [0], [1], [0, 0, 1, 1], [], []>} : vector<8x128xbf16>, vector<128x128xbf16>, vector<8x128xf32> -> vector<8x128xf32>
    %79 = arith.addf %51, %78 : vector<8x128xf32>
    %80 = vector.extract_strided_slice %50 {offsets = [0, 128], sizes = [8, 128], strides = [1, 1]} : vector<8x1536xf32> to vector<8x128xf32>
    %81 = vector.extract_strided_slice %50 {offsets = [0, 640], sizes = [8, 128], strides = [1, 1]} : vector<8x1536xf32> to vector<8x128xf32>
    %82 = vector.extract_strided_slice %50 {offsets = [0, 1152], sizes = [8, 128], strides = [1, 1]} : vector<8x1536xf32> to vector<8x128xf32>
    %83 = arith.truncf %80 : vector<8x128xf32> to vector<8x128xbf16>
    %84 = arith.truncf %81 : vector<8x128xf32> to vector<8x128xbf16>
    %cst_27 = arith.constant dense<0.000000e+00> : vector<8x8xf32>
    %85 = tpu.matmul %83, %84, %cst_27 {dimension_numbers = #tpu.dot_dimension_numbers<[1], [1], [0], [0], [0, 0, 1, 0], [], []>} : vector<8x128xbf16>, vector<8x128xbf16>, vector<8x8xf32> -> vector<8x8xf32>
    %cst_28 = arith.constant 0.353553385 : f32
    %86 = vector.broadcast %cst_28 : f32 to vector<8x8xf32>
    %87 = arith.mulf %85, %86 : vector<8x8xf32>
    %cst_29 = arith.constant -1.000000e+30 : f32
    %88 = vector.broadcast %cst_29 : f32 to vector<8x8xf32>
    %89 = arith.select %14, %87, %88 : vector<8x8xi1>, vector<8x8xf32>
    %cst_30 = arith.constant dense<0xFF800000> : vector<8xf32>
    %90 = vector.multi_reduction <maximumf>, %89, %cst_30 [1] : vector<8x8xf32> to vector<8xf32>
    %91 = vector.shape_cast %90 : vector<8xf32> to vector<8x1xf32>
    %92 = vector.broadcast %91 : vector<8x1xf32> to vector<8x8xf32>
    %93 = arith.subf %89, %92 : vector<8x8xf32>
    %94 = math.exp %93 : vector<8x8xf32>
    %cst_31 = arith.constant dense<0.000000e+00> : vector<8xf32>
    %95 = vector.multi_reduction <add>, %94, %cst_31 [1] : vector<8x8xf32> to vector<8xf32>
    %96 = vector.shape_cast %95 : vector<8xf32> to vector<8x1xf32>
    %97 = tpu.reciprocal %96 {approx = true} : vector<8x1xf32> -> vector<8x1xf32>
    %98 = vector.broadcast %97 : vector<8x1xf32> to vector<8x8xf32>
    %99 = arith.mulf %94, %98 : vector<8x8xf32>
    %100 = arith.truncf %99 : vector<8x8xf32> to vector<8x8xbf16>
    %101 = arith.truncf %82 : vector<8x128xf32> to vector<8x128xbf16>
    %cst_32 = arith.constant dense<0.000000e+00> : vector<8x128xf32>
    %102 = tpu.matmul %100, %101, %cst_32 {dimension_numbers = #tpu.dot_dimension_numbers<[1], [0], [0], [1], [0, 0, 1, 1], [], []>} : vector<8x8xbf16>, vector<8x128xbf16>, vector<8x128xf32> -> vector<8x128xf32>
    %103 = arith.truncf %102 : vector<8x128xf32> to vector<8x128xbf16>
    %c0_33 = arith.constant 0 : index
    %c1 = arith.constant 1 : index
    %c0_34 = arith.constant 0 : index
    %c0_35 = arith.constant 0 : index
    %104 = vector.load %arg6[%c0_33, %c1, %c0_34, %c0_35] : memref<2x4x128x128xbf16, #tpu.memory_space<vmem>>, vector<1x1x128x128xbf16>
    %105 = vector.shape_cast %104 : vector<1x1x128x128xbf16> to vector<128x128xbf16>
    %cst_36 = arith.constant dense<0.000000e+00> : vector<8x128xf32>
    %106 = tpu.matmul %103, %105, %cst_36 {dimension_numbers = #tpu.dot_dimension_numbers<[1], [0], [0], [1], [0, 0, 1, 1], [], []>} : vector<8x128xbf16>, vector<128x128xbf16>, vector<8x128xf32> -> vector<8x128xf32>
    %107 = arith.addf %79, %106 : vector<8x128xf32>
    %108 = vector.extract_strided_slice %50 {offsets = [0, 256], sizes = [8, 128], strides = [1, 1]} : vector<8x1536xf32> to vector<8x128xf32>
    %109 = vector.extract_strided_slice %50 {offsets = [0, 768], sizes = [8, 128], strides = [1, 1]} : vector<8x1536xf32> to vector<8x128xf32>
    %110 = vector.extract_strided_slice %50 {offsets = [0, 1280], sizes = [8, 128], strides = [1, 1]} : vector<8x1536xf32> to vector<8x128xf32>
    %111 = arith.truncf %108 : vector<8x128xf32> to vector<8x128xbf16>
    %112 = arith.truncf %109 : vector<8x128xf32> to vector<8x128xbf16>
    %cst_37 = arith.constant dense<0.000000e+00> : vector<8x8xf32>
    %113 = tpu.matmul %111, %112, %cst_37 {dimension_numbers = #tpu.dot_dimension_numbers<[1], [1], [0], [0], [0, 0, 1, 0], [], []>} : vector<8x128xbf16>, vector<8x128xbf16>, vector<8x8xf32> -> vector<8x8xf32>
    %cst_38 = arith.constant 0.353553385 : f32
    %114 = vector.broadcast %cst_38 : f32 to vector<8x8xf32>
    %115 = arith.mulf %113, %114 : vector<8x8xf32>
    %cst_39 = arith.constant -1.000000e+30 : f32
    %116 = vector.broadcast %cst_39 : f32 to vector<8x8xf32>
    %117 = arith.select %14, %115, %116 : vector<8x8xi1>, vector<8x8xf32>
    %cst_40 = arith.constant dense<0xFF800000> : vector<8xf32>
    %118 = vector.multi_reduction <maximumf>, %117, %cst_40 [1] : vector<8x8xf32> to vector<8xf32>
    %119 = vector.shape_cast %118 : vector<8xf32> to vector<8x1xf32>
    %120 = vector.broadcast %119 : vector<8x1xf32> to vector<8x8xf32>
    %121 = arith.subf %117, %120 : vector<8x8xf32>
    %122 = math.exp %121 : vector<8x8xf32>
    %cst_41 = arith.constant dense<0.000000e+00> : vector<8xf32>
    %123 = vector.multi_reduction <add>, %122, %cst_41 [1] : vector<8x8xf32> to vector<8xf32>
    %124 = vector.shape_cast %123 : vector<8xf32> to vector<8x1xf32>
    %125 = tpu.reciprocal %124 {approx = true} : vector<8x1xf32> -> vector<8x1xf32>
    %126 = vector.broadcast %125 : vector<8x1xf32> to vector<8x8xf32>
    %127 = arith.mulf %122, %126 : vector<8x8xf32>
    %128 = arith.truncf %127 : vector<8x8xf32> to vector<8x8xbf16>
    %129 = arith.truncf %110 : vector<8x128xf32> to vector<8x128xbf16>
    %cst_42 = arith.constant dense<0.000000e+00> : vector<8x128xf32>
    %130 = tpu.matmul %128, %129, %cst_42 {dimension_numbers = #tpu.dot_dimension_numbers<[1], [0], [0], [1], [0, 0, 1, 1], [], []>} : vector<8x8xbf16>, vector<8x128xbf16>, vector<8x128xf32> -> vector<8x128xf32>
    %131 = arith.truncf %130 : vector<8x128xf32> to vector<8x128xbf16>
    %c0_43 = arith.constant 0 : index
    %c2 = arith.constant 2 : index
    %c0_44 = arith.constant 0 : index
    %c0_45 = arith.constant 0 : index
    %132 = vector.load %arg6[%c0_43, %c2, %c0_44, %c0_45] : memref<2x4x128x128xbf16, #tpu.memory_space<vmem>>, vector<1x1x128x128xbf16>
    %133 = vector.shape_cast %132 : vector<1x1x128x128xbf16> to vector<128x128xbf16>
    %cst_46 = arith.constant dense<0.000000e+00> : vector<8x128xf32>
    %134 = tpu.matmul %131, %133, %cst_46 {dimension_numbers = #tpu.dot_dimension_numbers<[1], [0], [0], [1], [0, 0, 1, 1], [], []>} : vector<8x128xbf16>, vector<128x128xbf16>, vector<8x128xf32> -> vector<8x128xf32>
    %135 = arith.addf %107, %134 : vector<8x128xf32>
    %136 = vector.extract_strided_slice %50 {offsets = [0, 384], sizes = [8, 128], strides = [1, 1]} : vector<8x1536xf32> to vector<8x128xf32>
    %137 = vector.extract_strided_slice %50 {offsets = [0, 896], sizes = [8, 128], strides = [1, 1]} : vector<8x1536xf32> to vector<8x128xf32>
    %138 = vector.extract_strided_slice %50 {offsets = [0, 1408], sizes = [8, 128], strides = [1, 1]} : vector<8x1536xf32> to vector<8x128xf32>
    %139 = arith.truncf %136 : vector<8x128xf32> to vector<8x128xbf16>
    %140 = arith.truncf %137 : vector<8x128xf32> to vector<8x128xbf16>
    %cst_47 = arith.constant dense<0.000000e+00> : vector<8x8xf32>
    %141 = tpu.matmul %139, %140, %cst_47 {dimension_numbers = #tpu.dot_dimension_numbers<[1], [1], [0], [0], [0, 0, 1, 0], [], []>} : vector<8x128xbf16>, vector<8x128xbf16>, vector<8x8xf32> -> vector<8x8xf32>
    %cst_48 = arith.constant 0.353553385 : f32
    %142 = vector.broadcast %cst_48 : f32 to vector<8x8xf32>
    %143 = arith.mulf %141, %142 : vector<8x8xf32>
    %cst_49 = arith.constant -1.000000e+30 : f32
    %144 = vector.broadcast %cst_49 : f32 to vector<8x8xf32>
    %145 = arith.select %14, %143, %144 : vector<8x8xi1>, vector<8x8xf32>
    %cst_50 = arith.constant dense<0xFF800000> : vector<8xf32>
    %146 = vector.multi_reduction <maximumf>, %145, %cst_50 [1] : vector<8x8xf32> to vector<8xf32>
    %147 = vector.shape_cast %146 : vector<8xf32> to vector<8x1xf32>
    %148 = vector.broadcast %147 : vector<8x1xf32> to vector<8x8xf32>
    %149 = arith.subf %145, %148 : vector<8x8xf32>
    %150 = math.exp %149 : vector<8x8xf32>
    %cst_51 = arith.constant dense<0.000000e+00> : vector<8xf32>
    %151 = vector.multi_reduction <add>, %150, %cst_51 [1] : vector<8x8xf32> to vector<8xf32>
    %152 = vector.shape_cast %151 : vector<8xf32> to vector<8x1xf32>
    %153 = tpu.reciprocal %152 {approx = true} : vector<8x1xf32> -> vector<8x1xf32>
    %154 = vector.broadcast %153 : vector<8x1xf32> to vector<8x8xf32>
    %155 = arith.mulf %150, %154 : vector<8x8xf32>
    %156 = arith.truncf %155 : vector<8x8xf32> to vector<8x8xbf16>
    %157 = arith.truncf %138 : vector<8x128xf32> to vector<8x128xbf16>
    %cst_52 = arith.constant dense<0.000000e+00> : vector<8x128xf32>
    %158 = tpu.matmul %156, %157, %cst_52 {dimension_numbers = #tpu.dot_dimension_numbers<[1], [0], [0], [1], [0, 0, 1, 1], [], []>} : vector<8x8xbf16>, vector<8x128xbf16>, vector<8x128xf32> -> vector<8x128xf32>
    %159 = arith.truncf %158 : vector<8x128xf32> to vector<8x128xbf16>
    %c0_53 = arith.constant 0 : index
    %c3 = arith.constant 3 : index
    %c0_54 = arith.constant 0 : index
    %c0_55 = arith.constant 0 : index
    %160 = vector.load %arg6[%c0_53, %c3, %c0_54, %c0_55] : memref<2x4x128x128xbf16, #tpu.memory_space<vmem>>, vector<1x1x128x128xbf16>
    %161 = vector.shape_cast %160 : vector<1x1x128x128xbf16> to vector<128x128xbf16>
    %cst_56 = arith.constant dense<0.000000e+00> : vector<8x128xf32>
    %162 = tpu.matmul %159, %161, %cst_56 {dimension_numbers = #tpu.dot_dimension_numbers<[1], [0], [0], [1], [0, 0, 1, 1], [], []>} : vector<8x128xbf16>, vector<128x128xbf16>, vector<8x128xf32> -> vector<8x128xf32>
    %163 = arith.addf %135, %162 : vector<8x128xf32>
    %164 = arith.addf %42, %163 : vector<8x128xf32>
    %c0_57 = arith.constant 0 : index
    %c0_58 = arith.constant 0 : index
    %c0_59 = arith.constant 0 : index
    %165 = vector.load %arg7[%c0_57, %c0_58, %c0_59] : memref<2x1x128xf32, #tpu.memory_space<vmem>>, vector<1x1x128xf32>
    %166 = vector.shape_cast %165 : vector<1x1x128xf32> to vector<1x128xf32>
    %167 = vector.broadcast %166 : vector<1x128xf32> to vector<8x128xf32>
    %168 = arith.addf %164, %167 : vector<8x128xf32>
    %c0_60 = arith.constant 0 : index
    %c0_61 = arith.constant 0 : index
    %c0_62 = arith.constant 0 : index
    %169 = vector.load %arg8[%c0_60, %c0_61, %c0_62] : memref<2x2x128xf32, #tpu.memory_space<vmem>>, vector<1x2x128xf32>
    %170 = vector.shape_cast %169 : vector<1x2x128xf32> to vector<2x128xf32>
    %171 = vector.extract_strided_slice %170 {offsets = [0, 0], sizes = [1, 128], strides = [1, 1]} : vector<2x128xf32> to vector<1x128xf32>
    %172 = vector.extract_strided_slice %170 {offsets = [1, 0], sizes = [1, 128], strides = [1, 1]} : vector<2x128xf32> to vector<1x128xf32>
    %173 = arith.mulf %168, %6 : vector<8x128xf32>
    %cst_63 = arith.constant dense<0.000000e+00> : vector<8xf32>
    %174 = vector.multi_reduction <add>, %173, %cst_63 [1] : vector<8x128xf32> to vector<8xf32>
    %175 = vector.shape_cast %174 : vector<8xf32> to vector<8x1xf32>
    %cst_64 = arith.constant 3.125000e-02 : f32
    %176 = vector.broadcast %cst_64 : f32 to vector<8x1xf32>
    %177 = arith.mulf %175, %176 : vector<8x1xf32>
    %178 = vector.broadcast %177 : vector<8x1xf32> to vector<8x128xf32>
    %179 = arith.subf %168, %178 : vector<8x128xf32>
    %180 = arith.mulf %179, %6 : vector<8x128xf32>
    %181 = arith.mulf %180, %180 : vector<8x128xf32>
    %cst_65 = arith.constant dense<0.000000e+00> : vector<8xf32>
    %182 = vector.multi_reduction <add>, %181, %cst_65 [1] : vector<8x128xf32> to vector<8xf32>
    %183 = vector.shape_cast %182 : vector<8xf32> to vector<8x1xf32>
    %cst_66 = arith.constant 3.125000e-02 : f32
    %184 = vector.broadcast %cst_66 : f32 to vector<8x1xf32>
    %185 = arith.mulf %183, %184 : vector<8x1xf32>
    %cst_67 = arith.constant 9.99999996E-13 : f32
    %186 = vector.broadcast %cst_67 : f32 to vector<8x1xf32>
    %187 = arith.addf %185, %186 : vector<8x1xf32>
    %188 = math.rsqrt %187 : vector<8x1xf32>
    %189 = vector.broadcast %188 : vector<8x1xf32> to vector<8x128xf32>
    %190 = arith.mulf %180, %189 : vector<8x128xf32>
    %191 = vector.broadcast %171 : vector<1x128xf32> to vector<8x128xf32>
    %192 = arith.mulf %190, %191 : vector<8x128xf32>
    %193 = vector.broadcast %172 : vector<1x128xf32> to vector<8x128xf32>
    %194 = arith.addf %192, %193 : vector<8x128xf32>
    %195 = arith.mulf %194, %6 : vector<8x128xf32>
    %c0_68 = arith.constant 0 : index
    %c0_69 = arith.constant 0 : index
    %c0_70 = arith.constant 0 : index
    %196 = vector.load %arg9[%c0_68, %c0_69, %c0_70] : memref<2x128x128xbf16, #tpu.memory_space<vmem>>, vector<1x128x128xbf16>
    %197 = vector.shape_cast %196 : vector<1x128x128xbf16> to vector<128x128xbf16>
    %c0_71 = arith.constant 0 : index
    %c0_72 = arith.constant 0 : index
    %c0_73 = arith.constant 0 : index
    %198 = vector.load %arg10[%c0_71, %c0_72, %c0_73] : memref<2x1x128xf32, #tpu.memory_space<vmem>>, vector<1x1x128xf32>
    %199 = vector.shape_cast %198 : vector<1x1x128xf32> to vector<1x128xf32>
    %200 = arith.truncf %195 : vector<8x128xf32> to vector<8x128xbf16>
    %cst_74 = arith.constant dense<0.000000e+00> : vector<8x128xf32>
    %201 = tpu.matmul %200, %197, %cst_74 {dimension_numbers = #tpu.dot_dimension_numbers<[1], [0], [0], [1], [0, 0, 1, 1], [], []>} : vector<8x128xbf16>, vector<128x128xbf16>, vector<8x128xf32> -> vector<8x128xf32>
    %202 = vector.broadcast %199 : vector<1x128xf32> to vector<8x128xf32>
    %203 = arith.addf %201, %202 : vector<8x128xf32>
    %204 = arith.mulf %203, %203 : vector<8x128xf32>
    %205 = arith.mulf %203, %204 : vector<8x128xf32>
    %cst_75 = arith.constant 4.471500e-02 : f32
    %206 = vector.broadcast %cst_75 : f32 to vector<8x128xf32>
    %207 = arith.mulf %206, %205 : vector<8x128xf32>
    %208 = arith.addf %203, %207 : vector<8x128xf32>
    %cst_76 = arith.constant 0.797884583 : f32
    %209 = vector.broadcast %cst_76 : f32 to vector<8x128xf32>
    %210 = arith.mulf %209, %208 : vector<8x128xf32>
    %211 = math.tanh %210 : vector<8x128xf32>
    %cst_77 = arith.constant 1.000000e+00 : f32
    %212 = vector.broadcast %cst_77 : f32 to vector<8x128xf32>
    %213 = arith.addf %212, %211 : vector<8x128xf32>
    %cst_78 = arith.constant 5.000000e-01 : f32
    %214 = vector.broadcast %cst_78 : f32 to vector<8x128xf32>
    %215 = arith.mulf %214, %213 : vector<8x128xf32>
    %216 = arith.mulf %203, %215 : vector<8x128xf32>
    %c0_79 = arith.constant 0 : index
    %c0_80 = arith.constant 0 : index
    %c0_81 = arith.constant 0 : index
    %217 = vector.load %arg11[%c0_79, %c0_80, %c0_81] : memref<2x128x128xbf16, #tpu.memory_space<vmem>>, vector<1x128x128xbf16>
    %218 = vector.shape_cast %217 : vector<1x128x128xbf16> to vector<128x128xbf16>
    %c0_82 = arith.constant 0 : index
    %c0_83 = arith.constant 0 : index
    %c0_84 = arith.constant 0 : index
    %219 = vector.load %arg12[%c0_82, %c0_83, %c0_84] : memref<2x1x128xf32, #tpu.memory_space<vmem>>, vector<1x1x128xf32>
    %220 = vector.shape_cast %219 : vector<1x1x128xf32> to vector<1x128xf32>
    %221 = arith.truncf %216 : vector<8x128xf32> to vector<8x128xbf16>
    %cst_85 = arith.constant dense<0.000000e+00> : vector<8x128xf32>
    %222 = tpu.matmul %221, %218, %cst_85 {dimension_numbers = #tpu.dot_dimension_numbers<[1], [0], [0], [1], [0, 0, 1, 1], [], []>} : vector<8x128xbf16>, vector<128x128xbf16>, vector<8x128xf32> -> vector<8x128xf32>
    %223 = vector.broadcast %220 : vector<1x128xf32> to vector<8x128xf32>
    %224 = arith.addf %222, %223 : vector<8x128xf32>
    %225 = arith.addf %195, %224 : vector<8x128xf32>
    %c0_86 = arith.constant 0 : index
    %c0_87 = arith.constant 0 : index
    %c0_88 = arith.constant 0 : index
    %226 = vector.load %arg13[%c0_86, %c0_87, %c0_88] : memref<2x2x128xf32, #tpu.memory_space<vmem>>, vector<1x2x128xf32>
    %227 = vector.shape_cast %226 : vector<1x2x128xf32> to vector<2x128xf32>
    %228 = vector.extract_strided_slice %227 {offsets = [0, 0], sizes = [1, 128], strides = [1, 1]} : vector<2x128xf32> to vector<1x128xf32>
    %229 = vector.extract_strided_slice %227 {offsets = [1, 0], sizes = [1, 128], strides = [1, 1]} : vector<2x128xf32> to vector<1x128xf32>
    %230 = arith.mulf %225, %6 : vector<8x128xf32>
    %cst_89 = arith.constant dense<0.000000e+00> : vector<8xf32>
    %231 = vector.multi_reduction <add>, %230, %cst_89 [1] : vector<8x128xf32> to vector<8xf32>
    %232 = vector.shape_cast %231 : vector<8xf32> to vector<8x1xf32>
    %cst_90 = arith.constant 3.125000e-02 : f32
    %233 = vector.broadcast %cst_90 : f32 to vector<8x1xf32>
    %234 = arith.mulf %232, %233 : vector<8x1xf32>
    %235 = vector.broadcast %234 : vector<8x1xf32> to vector<8x128xf32>
    %236 = arith.subf %225, %235 : vector<8x128xf32>
    %237 = arith.mulf %236, %6 : vector<8x128xf32>
    %238 = arith.mulf %237, %237 : vector<8x128xf32>
    %cst_91 = arith.constant dense<0.000000e+00> : vector<8xf32>
    %239 = vector.multi_reduction <add>, %238, %cst_91 [1] : vector<8x128xf32> to vector<8xf32>
    %240 = vector.shape_cast %239 : vector<8xf32> to vector<8x1xf32>
    %cst_92 = arith.constant 3.125000e-02 : f32
    %241 = vector.broadcast %cst_92 : f32 to vector<8x1xf32>
    %242 = arith.mulf %240, %241 : vector<8x1xf32>
    %cst_93 = arith.constant 9.99999996E-13 : f32
    %243 = vector.broadcast %cst_93 : f32 to vector<8x1xf32>
    %244 = arith.addf %242, %243 : vector<8x1xf32>
    %245 = math.rsqrt %244 : vector<8x1xf32>
    %246 = vector.broadcast %245 : vector<8x1xf32> to vector<8x128xf32>
    %247 = arith.mulf %237, %246 : vector<8x128xf32>
    %248 = vector.broadcast %228 : vector<1x128xf32> to vector<8x128xf32>
    %249 = arith.mulf %247, %248 : vector<8x128xf32>
    %250 = vector.broadcast %229 : vector<1x128xf32> to vector<8x128xf32>
    %251 = arith.addf %249, %250 : vector<8x128xf32>
    %252 = arith.mulf %251, %6 : vector<8x128xf32>
    %c1_94 = arith.constant 1 : index
    %c0_95 = arith.constant 0 : index
    %c0_96 = arith.constant 0 : index
    %253 = vector.load %arg4[%c1_94, %c0_95, %c0_96] : memref<2x128x1536xbf16, #tpu.memory_space<vmem>>, vector<1x128x1536xbf16>
    %254 = vector.shape_cast %253 : vector<1x128x1536xbf16> to vector<128x1536xbf16>
    %c1_97 = arith.constant 1 : index
    %c0_98 = arith.constant 0 : index
    %c0_99 = arith.constant 0 : index
    %255 = vector.load %arg5[%c1_97, %c0_98, %c0_99] : memref<2x1x1536xf32, #tpu.memory_space<vmem>>, vector<1x1x1536xf32>
    %256 = vector.shape_cast %255 : vector<1x1x1536xf32> to vector<1x1536xf32>
    %257 = arith.truncf %252 : vector<8x128xf32> to vector<8x128xbf16>
    %cst_100 = arith.constant dense<0.000000e+00> : vector<8x1536xf32>
    %258 = tpu.matmul %257, %254, %cst_100 {dimension_numbers = #tpu.dot_dimension_numbers<[1], [0], [0], [1], [0, 0, 1, 1], [], []>} : vector<8x128xbf16>, vector<128x1536xbf16>, vector<8x1536xf32> -> vector<8x1536xf32>
    %259 = vector.broadcast %256 : vector<1x1536xf32> to vector<8x1536xf32>
    %260 = arith.addf %258, %259 : vector<8x1536xf32>
    %cst_101 = arith.constant 0.000000e+00 : f32
    %261 = vector.broadcast %cst_101 : f32 to vector<8x128xf32>
    %262 = vector.extract_strided_slice %260 {offsets = [0, 0], sizes = [8, 128], strides = [1, 1]} : vector<8x1536xf32> to vector<8x128xf32>
    %263 = vector.extract_strided_slice %260 {offsets = [0, 512], sizes = [8, 128], strides = [1, 1]} : vector<8x1536xf32> to vector<8x128xf32>
    %264 = vector.extract_strided_slice %260 {offsets = [0, 1024], sizes = [8, 128], strides = [1, 1]} : vector<8x1536xf32> to vector<8x128xf32>
    %265 = arith.truncf %262 : vector<8x128xf32> to vector<8x128xbf16>
    %266 = arith.truncf %263 : vector<8x128xf32> to vector<8x128xbf16>
    %cst_102 = arith.constant dense<0.000000e+00> : vector<8x8xf32>
    %267 = tpu.matmul %265, %266, %cst_102 {dimension_numbers = #tpu.dot_dimension_numbers<[1], [1], [0], [0], [0, 0, 1, 0], [], []>} : vector<8x128xbf16>, vector<8x128xbf16>, vector<8x8xf32> -> vector<8x8xf32>
    %cst_103 = arith.constant 0.353553385 : f32
    %268 = vector.broadcast %cst_103 : f32 to vector<8x8xf32>
    %269 = arith.mulf %267, %268 : vector<8x8xf32>
    %cst_104 = arith.constant -1.000000e+30 : f32
    %270 = vector.broadcast %cst_104 : f32 to vector<8x8xf32>
    %271 = arith.select %14, %269, %270 : vector<8x8xi1>, vector<8x8xf32>
    %cst_105 = arith.constant dense<0xFF800000> : vector<8xf32>
    %272 = vector.multi_reduction <maximumf>, %271, %cst_105 [1] : vector<8x8xf32> to vector<8xf32>
    %273 = vector.shape_cast %272 : vector<8xf32> to vector<8x1xf32>
    %274 = vector.broadcast %273 : vector<8x1xf32> to vector<8x8xf32>
    %275 = arith.subf %271, %274 : vector<8x8xf32>
    %276 = math.exp %275 : vector<8x8xf32>
    %cst_106 = arith.constant dense<0.000000e+00> : vector<8xf32>
    %277 = vector.multi_reduction <add>, %276, %cst_106 [1] : vector<8x8xf32> to vector<8xf32>
    %278 = vector.shape_cast %277 : vector<8xf32> to vector<8x1xf32>
    %279 = tpu.reciprocal %278 {approx = true} : vector<8x1xf32> -> vector<8x1xf32>
    %280 = vector.broadcast %279 : vector<8x1xf32> to vector<8x8xf32>
    %281 = arith.mulf %276, %280 : vector<8x8xf32>
    %282 = arith.truncf %281 : vector<8x8xf32> to vector<8x8xbf16>
    %283 = arith.truncf %264 : vector<8x128xf32> to vector<8x128xbf16>
    %cst_107 = arith.constant dense<0.000000e+00> : vector<8x128xf32>
    %284 = tpu.matmul %282, %283, %cst_107 {dimension_numbers = #tpu.dot_dimension_numbers<[1], [0], [0], [1], [0, 0, 1, 1], [], []>} : vector<8x8xbf16>, vector<8x128xbf16>, vector<8x128xf32> -> vector<8x128xf32>
    %285 = arith.truncf %284 : vector<8x128xf32> to vector<8x128xbf16>
    %c1_108 = arith.constant 1 : index
    %c0_109 = arith.constant 0 : index
    %c0_110 = arith.constant 0 : index
    %c0_111 = arith.constant 0 : index
    %286 = vector.load %arg6[%c1_108, %c0_109, %c0_110, %c0_111] : memref<2x4x128x128xbf16, #tpu.memory_space<vmem>>, vector<1x1x128x128xbf16>
    %287 = vector.shape_cast %286 : vector<1x1x128x128xbf16> to vector<128x128xbf16>
    %cst_112 = arith.constant dense<0.000000e+00> : vector<8x128xf32>
    %288 = tpu.matmul %285, %287, %cst_112 {dimension_numbers = #tpu.dot_dimension_numbers<[1], [0], [0], [1], [0, 0, 1, 1], [], []>} : vector<8x128xbf16>, vector<128x128xbf16>, vector<8x128xf32> -> vector<8x128xf32>
    %289 = arith.addf %261, %288 : vector<8x128xf32>
    %290 = vector.extract_strided_slice %260 {offsets = [0, 128], sizes = [8, 128], strides = [1, 1]} : vector<8x1536xf32> to vector<8x128xf32>
    %291 = vector.extract_strided_slice %260 {offsets = [0, 640], sizes = [8, 128], strides = [1, 1]} : vector<8x1536xf32> to vector<8x128xf32>
    %292 = vector.extract_strided_slice %260 {offsets = [0, 1152], sizes = [8, 128], strides = [1, 1]} : vector<8x1536xf32> to vector<8x128xf32>
    %293 = arith.truncf %290 : vector<8x128xf32> to vector<8x128xbf16>
    %294 = arith.truncf %291 : vector<8x128xf32> to vector<8x128xbf16>
    %cst_113 = arith.constant dense<0.000000e+00> : vector<8x8xf32>
    %295 = tpu.matmul %293, %294, %cst_113 {dimension_numbers = #tpu.dot_dimension_numbers<[1], [1], [0], [0], [0, 0, 1, 0], [], []>} : vector<8x128xbf16>, vector<8x128xbf16>, vector<8x8xf32> -> vector<8x8xf32>
    %cst_114 = arith.constant 0.353553385 : f32
    %296 = vector.broadcast %cst_114 : f32 to vector<8x8xf32>
    %297 = arith.mulf %295, %296 : vector<8x8xf32>
    %cst_115 = arith.constant -1.000000e+30 : f32
    %298 = vector.broadcast %cst_115 : f32 to vector<8x8xf32>
    %299 = arith.select %14, %297, %298 : vector<8x8xi1>, vector<8x8xf32>
    %cst_116 = arith.constant dense<0xFF800000> : vector<8xf32>
    %300 = vector.multi_reduction <maximumf>, %299, %cst_116 [1] : vector<8x8xf32> to vector<8xf32>
    %301 = vector.shape_cast %300 : vector<8xf32> to vector<8x1xf32>
    %302 = vector.broadcast %301 : vector<8x1xf32> to vector<8x8xf32>
    %303 = arith.subf %299, %302 : vector<8x8xf32>
    %304 = math.exp %303 : vector<8x8xf32>
    %cst_117 = arith.constant dense<0.000000e+00> : vector<8xf32>
    %305 = vector.multi_reduction <add>, %304, %cst_117 [1] : vector<8x8xf32> to vector<8xf32>
    %306 = vector.shape_cast %305 : vector<8xf32> to vector<8x1xf32>
    %307 = tpu.reciprocal %306 {approx = true} : vector<8x1xf32> -> vector<8x1xf32>
    %308 = vector.broadcast %307 : vector<8x1xf32> to vector<8x8xf32>
    %309 = arith.mulf %304, %308 : vector<8x8xf32>
    %310 = arith.truncf %309 : vector<8x8xf32> to vector<8x8xbf16>
    %311 = arith.truncf %292 : vector<8x128xf32> to vector<8x128xbf16>
    %cst_118 = arith.constant dense<0.000000e+00> : vector<8x128xf32>
    %312 = tpu.matmul %310, %311, %cst_118 {dimension_numbers = #tpu.dot_dimension_numbers<[1], [0], [0], [1], [0, 0, 1, 1], [], []>} : vector<8x8xbf16>, vector<8x128xbf16>, vector<8x128xf32> -> vector<8x128xf32>
    %313 = arith.truncf %312 : vector<8x128xf32> to vector<8x128xbf16>
    %c1_119 = arith.constant 1 : index
    %c1_120 = arith.constant 1 : index
    %c0_121 = arith.constant 0 : index
    %c0_122 = arith.constant 0 : index
    %314 = vector.load %arg6[%c1_119, %c1_120, %c0_121, %c0_122] : memref<2x4x128x128xbf16, #tpu.memory_space<vmem>>, vector<1x1x128x128xbf16>
    %315 = vector.shape_cast %314 : vector<1x1x128x128xbf16> to vector<128x128xbf16>
    %cst_123 = arith.constant dense<0.000000e+00> : vector<8x128xf32>
    %316 = tpu.matmul %313, %315, %cst_123 {dimension_numbers = #tpu.dot_dimension_numbers<[1], [0], [0], [1], [0, 0, 1, 1], [], []>} : vector<8x128xbf16>, vector<128x128xbf16>, vector<8x128xf32> -> vector<8x128xf32>
    %317 = arith.addf %289, %316 : vector<8x128xf32>
    %318 = vector.extract_strided_slice %260 {offsets = [0, 256], sizes = [8, 128], strides = [1, 1]} : vector<8x1536xf32> to vector<8x128xf32>
    %319 = vector.extract_strided_slice %260 {offsets = [0, 768], sizes = [8, 128], strides = [1, 1]} : vector<8x1536xf32> to vector<8x128xf32>
    %320 = vector.extract_strided_slice %260 {offsets = [0, 1280], sizes = [8, 128], strides = [1, 1]} : vector<8x1536xf32> to vector<8x128xf32>
    %321 = arith.truncf %318 : vector<8x128xf32> to vector<8x128xbf16>
    %322 = arith.truncf %319 : vector<8x128xf32> to vector<8x128xbf16>
    %cst_124 = arith.constant dense<0.000000e+00> : vector<8x8xf32>
    %323 = tpu.matmul %321, %322, %cst_124 {dimension_numbers = #tpu.dot_dimension_numbers<[1], [1], [0], [0], [0, 0, 1, 0], [], []>} : vector<8x128xbf16>, vector<8x128xbf16>, vector<8x8xf32> -> vector<8x8xf32>
    %cst_125 = arith.constant 0.353553385 : f32
    %324 = vector.broadcast %cst_125 : f32 to vector<8x8xf32>
    %325 = arith.mulf %323, %324 : vector<8x8xf32>
    %cst_126 = arith.constant -1.000000e+30 : f32
    %326 = vector.broadcast %cst_126 : f32 to vector<8x8xf32>
    %327 = arith.select %14, %325, %326 : vector<8x8xi1>, vector<8x8xf32>
    %cst_127 = arith.constant dense<0xFF800000> : vector<8xf32>
    %328 = vector.multi_reduction <maximumf>, %327, %cst_127 [1] : vector<8x8xf32> to vector<8xf32>
    %329 = vector.shape_cast %328 : vector<8xf32> to vector<8x1xf32>
    %330 = vector.broadcast %329 : vector<8x1xf32> to vector<8x8xf32>
    %331 = arith.subf %327, %330 : vector<8x8xf32>
    %332 = math.exp %331 : vector<8x8xf32>
    %cst_128 = arith.constant dense<0.000000e+00> : vector<8xf32>
    %333 = vector.multi_reduction <add>, %332, %cst_128 [1] : vector<8x8xf32> to vector<8xf32>
    %334 = vector.shape_cast %333 : vector<8xf32> to vector<8x1xf32>
    %335 = tpu.reciprocal %334 {approx = true} : vector<8x1xf32> -> vector<8x1xf32>
    %336 = vector.broadcast %335 : vector<8x1xf32> to vector<8x8xf32>
    %337 = arith.mulf %332, %336 : vector<8x8xf32>
    %338 = arith.truncf %337 : vector<8x8xf32> to vector<8x8xbf16>
    %339 = arith.truncf %320 : vector<8x128xf32> to vector<8x128xbf16>
    %cst_129 = arith.constant dense<0.000000e+00> : vector<8x128xf32>
    %340 = tpu.matmul %338, %339, %cst_129 {dimension_numbers = #tpu.dot_dimension_numbers<[1], [0], [0], [1], [0, 0, 1, 1], [], []>} : vector<8x8xbf16>, vector<8x128xbf16>, vector<8x128xf32> -> vector<8x128xf32>
    %341 = arith.truncf %340 : vector<8x128xf32> to vector<8x128xbf16>
    %c1_130 = arith.constant 1 : index
    %c2_131 = arith.constant 2 : index
    %c0_132 = arith.constant 0 : index
    %c0_133 = arith.constant 0 : index
    %342 = vector.load %arg6[%c1_130, %c2_131, %c0_132, %c0_133] : memref<2x4x128x128xbf16, #tpu.memory_space<vmem>>, vector<1x1x128x128xbf16>
    %343 = vector.shape_cast %342 : vector<1x1x128x128xbf16> to vector<128x128xbf16>
    %cst_134 = arith.constant dense<0.000000e+00> : vector<8x128xf32>
    %344 = tpu.matmul %341, %343, %cst_134 {dimension_numbers = #tpu.dot_dimension_numbers<[1], [0], [0], [1], [0, 0, 1, 1], [], []>} : vector<8x128xbf16>, vector<128x128xbf16>, vector<8x128xf32> -> vector<8x128xf32>
    %345 = arith.addf %317, %344 : vector<8x128xf32>
    %346 = vector.extract_strided_slice %260 {offsets = [0, 384], sizes = [8, 128], strides = [1, 1]} : vector<8x1536xf32> to vector<8x128xf32>
    %347 = vector.extract_strided_slice %260 {offsets = [0, 896], sizes = [8, 128], strides = [1, 1]} : vector<8x1536xf32> to vector<8x128xf32>
    %348 = vector.extract_strided_slice %260 {offsets = [0, 1408], sizes = [8, 128], strides = [1, 1]} : vector<8x1536xf32> to vector<8x128xf32>
    %349 = arith.truncf %346 : vector<8x128xf32> to vector<8x128xbf16>
    %350 = arith.truncf %347 : vector<8x128xf32> to vector<8x128xbf16>
    %cst_135 = arith.constant dense<0.000000e+00> : vector<8x8xf32>
    %351 = tpu.matmul %349, %350, %cst_135 {dimension_numbers = #tpu.dot_dimension_numbers<[1], [1], [0], [0], [0, 0, 1, 0], [], []>} : vector<8x128xbf16>, vector<8x128xbf16>, vector<8x8xf32> -> vector<8x8xf32>
    %cst_136 = arith.constant 0.353553385 : f32
    %352 = vector.broadcast %cst_136 : f32 to vector<8x8xf32>
    %353 = arith.mulf %351, %352 : vector<8x8xf32>
    %cst_137 = arith.constant -1.000000e+30 : f32
    %354 = vector.broadcast %cst_137 : f32 to vector<8x8xf32>
    %355 = arith.select %14, %353, %354 : vector<8x8xi1>, vector<8x8xf32>
    %cst_138 = arith.constant dense<0xFF800000> : vector<8xf32>
    %356 = vector.multi_reduction <maximumf>, %355, %cst_138 [1] : vector<8x8xf32> to vector<8xf32>
    %357 = vector.shape_cast %356 : vector<8xf32> to vector<8x1xf32>
    %358 = vector.broadcast %357 : vector<8x1xf32> to vector<8x8xf32>
    %359 = arith.subf %355, %358 : vector<8x8xf32>
    %360 = math.exp %359 : vector<8x8xf32>
    %cst_139 = arith.constant dense<0.000000e+00> : vector<8xf32>
    %361 = vector.multi_reduction <add>, %360, %cst_139 [1] : vector<8x8xf32> to vector<8xf32>
    %362 = vector.shape_cast %361 : vector<8xf32> to vector<8x1xf32>
    %363 = tpu.reciprocal %362 {approx = true} : vector<8x1xf32> -> vector<8x1xf32>
    %364 = vector.broadcast %363 : vector<8x1xf32> to vector<8x8xf32>
    %365 = arith.mulf %360, %364 : vector<8x8xf32>
    %366 = arith.truncf %365 : vector<8x8xf32> to vector<8x8xbf16>
    %367 = arith.truncf %348 : vector<8x128xf32> to vector<8x128xbf16>
    %cst_140 = arith.constant dense<0.000000e+00> : vector<8x128xf32>
    %368 = tpu.matmul %366, %367, %cst_140 {dimension_numbers = #tpu.dot_dimension_numbers<[1], [0], [0], [1], [0, 0, 1, 1], [], []>} : vector<8x8xbf16>, vector<8x128xbf16>, vector<8x128xf32> -> vector<8x128xf32>
    %369 = arith.truncf %368 : vector<8x128xf32> to vector<8x128xbf16>
    %c1_141 = arith.constant 1 : index
    %c3_142 = arith.constant 3 : index
    %c0_143 = arith.constant 0 : index
    %c0_144 = arith.constant 0 : index
    %370 = vector.load %arg6[%c1_141, %c3_142, %c0_143, %c0_144] : memref<2x4x128x128xbf16, #tpu.memory_space<vmem>>, vector<1x1x128x128xbf16>
    %371 = vector.shape_cast %370 : vector<1x1x128x128xbf16> to vector<128x128xbf16>
    %cst_145 = arith.constant dense<0.000000e+00> : vector<8x128xf32>
    %372 = tpu.matmul %369, %371, %cst_145 {dimension_numbers = #tpu.dot_dimension_numbers<[1], [0], [0], [1], [0, 0, 1, 1], [], []>} : vector<8x128xbf16>, vector<128x128xbf16>, vector<8x128xf32> -> vector<8x128xf32>
    %373 = arith.addf %345, %372 : vector<8x128xf32>
    %374 = arith.addf %252, %373 : vector<8x128xf32>
    %c1_146 = arith.constant 1 : index
    %c0_147 = arith.constant 0 : index
    %c0_148 = arith.constant 0 : index
    %375 = vector.load %arg7[%c1_146, %c0_147, %c0_148] : memref<2x1x128xf32, #tpu.memory_space<vmem>>, vector<1x1x128xf32>
    %376 = vector.shape_cast %375 : vector<1x1x128xf32> to vector<1x128xf32>
    %377 = vector.broadcast %376 : vector<1x128xf32> to vector<8x128xf32>
    %378 = arith.addf %374, %377 : vector<8x128xf32>
    %c1_149 = arith.constant 1 : index
    %c0_150 = arith.constant 0 : index
    %c0_151 = arith.constant 0 : index
    %379 = vector.load %arg8[%c1_149, %c0_150, %c0_151] : memref<2x2x128xf32, #tpu.memory_space<vmem>>, vector<1x2x128xf32>
    %380 = vector.shape_cast %379 : vector<1x2x128xf32> to vector<2x128xf32>
    %381 = vector.extract_strided_slice %380 {offsets = [0, 0], sizes = [1, 128], strides = [1, 1]} : vector<2x128xf32> to vector<1x128xf32>
    %382 = vector.extract_strided_slice %380 {offsets = [1, 0], sizes = [1, 128], strides = [1, 1]} : vector<2x128xf32> to vector<1x128xf32>
    %383 = arith.mulf %378, %6 : vector<8x128xf32>
    %cst_152 = arith.constant dense<0.000000e+00> : vector<8xf32>
    %384 = vector.multi_reduction <add>, %383, %cst_152 [1] : vector<8x128xf32> to vector<8xf32>
    %385 = vector.shape_cast %384 : vector<8xf32> to vector<8x1xf32>
    %cst_153 = arith.constant 3.125000e-02 : f32
    %386 = vector.broadcast %cst_153 : f32 to vector<8x1xf32>
    %387 = arith.mulf %385, %386 : vector<8x1xf32>
    %388 = vector.broadcast %387 : vector<8x1xf32> to vector<8x128xf32>
    %389 = arith.subf %378, %388 : vector<8x128xf32>
    %390 = arith.mulf %389, %6 : vector<8x128xf32>
    %391 = arith.mulf %390, %390 : vector<8x128xf32>
    %cst_154 = arith.constant dense<0.000000e+00> : vector<8xf32>
    %392 = vector.multi_reduction <add>, %391, %cst_154 [1] : vector<8x128xf32> to vector<8xf32>
    %393 = vector.shape_cast %392 : vector<8xf32> to vector<8x1xf32>
    %cst_155 = arith.constant 3.125000e-02 : f32
    %394 = vector.broadcast %cst_155 : f32 to vector<8x1xf32>
    %395 = arith.mulf %393, %394 : vector<8x1xf32>
    %cst_156 = arith.constant 9.99999996E-13 : f32
    %396 = vector.broadcast %cst_156 : f32 to vector<8x1xf32>
    %397 = arith.addf %395, %396 : vector<8x1xf32>
    %398 = math.rsqrt %397 : vector<8x1xf32>
    %399 = vector.broadcast %398 : vector<8x1xf32> to vector<8x128xf32>
    %400 = arith.mulf %390, %399 : vector<8x128xf32>
    %401 = vector.broadcast %381 : vector<1x128xf32> to vector<8x128xf32>
    %402 = arith.mulf %400, %401 : vector<8x128xf32>
    %403 = vector.broadcast %382 : vector<1x128xf32> to vector<8x128xf32>
    %404 = arith.addf %402, %403 : vector<8x128xf32>
    %405 = arith.mulf %404, %6 : vector<8x128xf32>
    %c1_157 = arith.constant 1 : index
    %c0_158 = arith.constant 0 : index
    %c0_159 = arith.constant 0 : index
    %406 = vector.load %arg9[%c1_157, %c0_158, %c0_159] : memref<2x128x128xbf16, #tpu.memory_space<vmem>>, vector<1x128x128xbf16>
    %407 = vector.shape_cast %406 : vector<1x128x128xbf16> to vector<128x128xbf16>
    %c1_160 = arith.constant 1 : index
    %c0_161 = arith.constant 0 : index
    %c0_162 = arith.constant 0 : index
    %408 = vector.load %arg10[%c1_160, %c0_161, %c0_162] : memref<2x1x128xf32, #tpu.memory_space<vmem>>, vector<1x1x128xf32>
    %409 = vector.shape_cast %408 : vector<1x1x128xf32> to vector<1x128xf32>
    %410 = arith.truncf %405 : vector<8x128xf32> to vector<8x128xbf16>
    %cst_163 = arith.constant dense<0.000000e+00> : vector<8x128xf32>
    %411 = tpu.matmul %410, %407, %cst_163 {dimension_numbers = #tpu.dot_dimension_numbers<[1], [0], [0], [1], [0, 0, 1, 1], [], []>} : vector<8x128xbf16>, vector<128x128xbf16>, vector<8x128xf32> -> vector<8x128xf32>
    %412 = vector.broadcast %409 : vector<1x128xf32> to vector<8x128xf32>
    %413 = arith.addf %411, %412 : vector<8x128xf32>
    %414 = arith.mulf %413, %413 : vector<8x128xf32>
    %415 = arith.mulf %413, %414 : vector<8x128xf32>
    %cst_164 = arith.constant 4.471500e-02 : f32
    %416 = vector.broadcast %cst_164 : f32 to vector<8x128xf32>
    %417 = arith.mulf %416, %415 : vector<8x128xf32>
    %418 = arith.addf %413, %417 : vector<8x128xf32>
    %cst_165 = arith.constant 0.797884583 : f32
    %419 = vector.broadcast %cst_165 : f32 to vector<8x128xf32>
    %420 = arith.mulf %419, %418 : vector<8x128xf32>
    %421 = math.tanh %420 : vector<8x128xf32>
    %cst_166 = arith.constant 1.000000e+00 : f32
    %422 = vector.broadcast %cst_166 : f32 to vector<8x128xf32>
    %423 = arith.addf %422, %421 : vector<8x128xf32>
    %cst_167 = arith.constant 5.000000e-01 : f32
    %424 = vector.broadcast %cst_167 : f32 to vector<8x128xf32>
    %425 = arith.mulf %424, %423 : vector<8x128xf32>
    %426 = arith.mulf %413, %425 : vector<8x128xf32>
    %c1_168 = arith.constant 1 : index
    %c0_169 = arith.constant 0 : index
    %c0_170 = arith.constant 0 : index
    %427 = vector.load %arg11[%c1_168, %c0_169, %c0_170] : memref<2x128x128xbf16, #tpu.memory_space<vmem>>, vector<1x128x128xbf16>
    %428 = vector.shape_cast %427 : vector<1x128x128xbf16> to vector<128x128xbf16>
    %c1_171 = arith.constant 1 : index
    %c0_172 = arith.constant 0 : index
    %c0_173 = arith.constant 0 : index
    %429 = vector.load %arg12[%c1_171, %c0_172, %c0_173] : memref<2x1x128xf32, #tpu.memory_space<vmem>>, vector<1x1x128xf32>
    %430 = vector.shape_cast %429 : vector<1x1x128xf32> to vector<1x128xf32>
    %431 = arith.truncf %426 : vector<8x128xf32> to vector<8x128xbf16>
    %cst_174 = arith.constant dense<0.000000e+00> : vector<8x128xf32>
    %432 = tpu.matmul %431, %428, %cst_174 {dimension_numbers = #tpu.dot_dimension_numbers<[1], [0], [0], [1], [0, 0, 1, 1], [], []>} : vector<8x128xbf16>, vector<128x128xbf16>, vector<8x128xf32> -> vector<8x128xf32>
    %433 = vector.broadcast %430 : vector<1x128xf32> to vector<8x128xf32>
    %434 = arith.addf %432, %433 : vector<8x128xf32>
    %435 = arith.addf %405, %434 : vector<8x128xf32>
    %c1_175 = arith.constant 1 : index
    %c0_176 = arith.constant 0 : index
    %c0_177 = arith.constant 0 : index
    %436 = vector.load %arg13[%c1_175, %c0_176, %c0_177] : memref<2x2x128xf32, #tpu.memory_space<vmem>>, vector<1x2x128xf32>
    %437 = vector.shape_cast %436 : vector<1x2x128xf32> to vector<2x128xf32>
    %438 = vector.extract_strided_slice %437 {offsets = [0, 0], sizes = [1, 128], strides = [1, 1]} : vector<2x128xf32> to vector<1x128xf32>
    %439 = vector.extract_strided_slice %437 {offsets = [1, 0], sizes = [1, 128], strides = [1, 1]} : vector<2x128xf32> to vector<1x128xf32>
    %440 = arith.mulf %435, %6 : vector<8x128xf32>
    %cst_178 = arith.constant dense<0.000000e+00> : vector<8xf32>
    %441 = vector.multi_reduction <add>, %440, %cst_178 [1] : vector<8x128xf32> to vector<8xf32>
    %442 = vector.shape_cast %441 : vector<8xf32> to vector<8x1xf32>
    %cst_179 = arith.constant 3.125000e-02 : f32
    %443 = vector.broadcast %cst_179 : f32 to vector<8x1xf32>
    %444 = arith.mulf %442, %443 : vector<8x1xf32>
    %445 = vector.broadcast %444 : vector<8x1xf32> to vector<8x128xf32>
    %446 = arith.subf %435, %445 : vector<8x128xf32>
    %447 = arith.mulf %446, %6 : vector<8x128xf32>
    %448 = arith.mulf %447, %447 : vector<8x128xf32>
    %cst_180 = arith.constant dense<0.000000e+00> : vector<8xf32>
    %449 = vector.multi_reduction <add>, %448, %cst_180 [1] : vector<8x128xf32> to vector<8xf32>
    %450 = vector.shape_cast %449 : vector<8xf32> to vector<8x1xf32>
    %cst_181 = arith.constant 3.125000e-02 : f32
    %451 = vector.broadcast %cst_181 : f32 to vector<8x1xf32>
    %452 = arith.mulf %450, %451 : vector<8x1xf32>
    %cst_182 = arith.constant 9.99999996E-13 : f32
    %453 = vector.broadcast %cst_182 : f32 to vector<8x1xf32>
    %454 = arith.addf %452, %453 : vector<8x1xf32>
    %455 = math.rsqrt %454 : vector<8x1xf32>
    %456 = vector.broadcast %455 : vector<8x1xf32> to vector<8x128xf32>
    %457 = arith.mulf %447, %456 : vector<8x128xf32>
    %458 = vector.broadcast %438 : vector<1x128xf32> to vector<8x128xf32>
    %459 = arith.mulf %457, %458 : vector<8x128xf32>
    %460 = vector.broadcast %439 : vector<1x128xf32> to vector<8x128xf32>
    %461 = arith.addf %459, %460 : vector<8x128xf32>
    %462 = arith.mulf %461, %6 : vector<8x128xf32>
    %463 = arith.mulf %462, %11 : vector<8x128xf32>
    %c0_183 = arith.constant 0 : index
    %c0_184 = arith.constant 0 : index
    %c0_185 = arith.constant 0 : index
    %464 = vector.load %arg14[%c0_183, %c0_184, %c0_185] : memref<1x8x128xf32, #tpu.memory_space<vmem>>, vector<1x8x128xf32>
    %465 = vector.shape_cast %464 : vector<1x8x128xf32> to vector<8x128xf32>
    %466 = vector.shape_cast %463 : vector<8x128xf32> to vector<1x8x128xf32>
    tpu.vector_store %arg14[%c0_183, %c0_184, %c0_185], %466 {strides = array<i32>} : memref<1x8x128xf32, #tpu.memory_space<vmem>>, vector<1x8x128xf32>,
    return
  }
  func.func @transform_0(%arg0: i32, %arg1: memref<2xi32, #tpu.memory_space<smem>>) -> (i32, i32, i32) {
    %c0_i32 = arith.constant 0 : i32
    %c0_i32_0 = arith.constant 0 : i32
    %c0_i32_1 = arith.constant 0 : i32
    return %arg0, %c0_i32, %c0_i32_0 : i32, i32, i32
  }
  func.func @transform_1(%arg0: i32, %arg1: memref<2xi32, #tpu.memory_space<smem>>) -> (i32, i32) {
    %c0_i32 = arith.constant 0 : i32
    %c0_i32_0 = arith.constant 0 : i32
    %c0_i32_1 = arith.constant 0 : i32
    return %c0_i32, %c0_i32_0 : i32, i32
  }
  func.func @transform_2(%arg0: i32, %arg1: memref<2xi32, #tpu.memory_space<smem>>) -> (i32, i32, i32) {
    %c0_i32 = arith.constant 0 : i32
    %c0_i32_0 = arith.constant 0 : i32
    %c0_i32_1 = arith.constant 0 : i32
    %c0_i32_2 = arith.constant 0 : i32
    return %c0_i32, %c0_i32_0, %c0_i32_1 : i32, i32, i32
  }
  func.func @transform_3(%arg0: i32, %arg1: memref<2xi32, #tpu.memory_space<smem>>) -> (i32, i32, i32) {
    %c0_i32 = arith.constant 0 : i32
    %c0_i32_0 = arith.constant 0 : i32
    %c0_i32_1 = arith.constant 0 : i32
    %c0_i32_2 = arith.constant 0 : i32
    return %c0_i32, %c0_i32_0, %c0_i32_1 : i32, i32, i32
  }
  func.func @transform_4(%arg0: i32, %arg1: memref<2xi32, #tpu.memory_space<smem>>) -> (i32, i32, i32, i32) {
    %c0_i32 = arith.constant 0 : i32
    %c0_i32_0 = arith.constant 0 : i32
    %c0_i32_1 = arith.constant 0 : i32
    %c0_i32_2 = arith.constant 0 : i32
    %c0_i32_3 = arith.constant 0 : i32
    return %c0_i32, %c0_i32_0, %c0_i32_1, %c0_i32_2 : i32, i32, i32, i32
  }
  func.func @transform_5(%arg0: i32, %arg1: memref<2xi32, #tpu.memory_space<smem>>) -> (i32, i32, i32) {
    %c0_i32 = arith.constant 0 : i32
    %c0_i32_0 = arith.constant 0 : i32
    %c0_i32_1 = arith.constant 0 : i32
    %c0_i32_2 = arith.constant 0 : i32
    return %c0_i32, %c0_i32_0, %c0_i32_1 : i32, i32, i32
  }
  func.func @transform_6(%arg0: i32, %arg1: memref<2xi32, #tpu.memory_space<smem>>) -> (i32, i32, i32) {
    %c0_i32 = arith.constant 0 : i32
    %c0_i32_0 = arith.constant 0 : i32
    %c0_i32_1 = arith.constant 0 : i32
    %c0_i32_2 = arith.constant 0 : i32
    return %c0_i32, %c0_i32_0, %c0_i32_1 : i32, i32, i32
  }
  func.func @transform_7(%arg0: i32, %arg1: memref<2xi32, #tpu.memory_space<smem>>) -> (i32, i32, i32) {
    %c0_i32 = arith.constant 0 : i32
    %c0_i32_0 = arith.constant 0 : i32
    %c0_i32_1 = arith.constant 0 : i32
    %c0_i32_2 = arith.constant 0 : i32
    return %c0_i32, %c0_i32_0, %c0_i32_1 : i32, i32, i32
  }
  func.func @transform_8(%arg0: i32, %arg1: memref<2xi32, #tpu.memory_space<smem>>) -> (i32, i32, i32) {
    %c0_i32 = arith.constant 0 : i32
    %c0_i32_0 = arith.constant 0 : i32
    %c0_i32_1 = arith.constant 0 : i32
    %c0_i32_2 = arith.constant 0 : i32
    return %c0_i32, %c0_i32_0, %c0_i32_1 : i32, i32, i32
  }
  func.func @transform_9(%arg0: i32, %arg1: memref<2xi32, #tpu.memory_space<smem>>) -> (i32, i32, i32) {
    %c0_i32 = arith.constant 0 : i32
    %c0_i32_0 = arith.constant 0 : i32
    %c0_i32_1 = arith.constant 0 : i32
    %c0_i32_2 = arith.constant 0 : i32
    return %c0_i32, %c0_i32_0, %c0_i32_1 : i32, i32, i32
  }
  func.func @transform_10(%arg0: i32, %arg1: memref<2xi32, #tpu.memory_space<smem>>) -> (i32, i32, i32) {
    %c0_i32 = arith.constant 0 : i32
    %c0_i32_0 = arith.constant 0 : i32
    %c0_i32_1 = arith.constant 0 : i32
    %c0_i32_2 = arith.constant 0 : i32
    return %c0_i32, %c0_i32_0, %c0_i32_1 : i32, i32, i32
  }
  func.func @transform_11(%arg0: i32, %arg1: memref<2xi32, #tpu.memory_space<smem>>) -> (i32, i32, i32) {
    %c0_i32 = arith.constant 0 : i32
    %c0_i32_0 = arith.constant 0 : i32
    %c0_i32_1 = arith.constant 0 : i32
    %c0_i32_2 = arith.constant 0 : i32
    return %c0_i32, %c0_i32_0, %c0_i32_1 : i32, i32, i32
  }
  func.func @transform_12(%arg0: i32, %arg1: memref<2xi32, #tpu.memory_space<smem>>) -> (i32, i32, i32) {
    %c0_i32 = arith.constant 0 : i32
    %c0_i32_0 = arith.constant 0 : i32
    %c0_i32_1 = arith.constant 0 : i32
    return %arg0, %c0_i32, %c0_i32_0 : i32, i32, i32
  }
}

</mosaic_0001>

<bundles_post_ra>
// kernel: tpu_custom_call.1
= control target key start
LH: loop header
LB: loop body
LE: loop exit
PB: predicated region body
PF: predicated region fallthrough
CT: control target
= control target key end

     0   :  { %s6376_s25 = smov [#allocation3]   ;;  %s7175_s0 = inlined_call_operand.hbm [shape: s32[2], index: 0, kind: input, shape index: {}]   ;;  %s7176_s1 = inlined_call_operand.hbm [shape: f32[2,8,128], index: 1, kind: input, shape index: {}]   ;;  %s7177_s2 = inlined_call_operand.hbm [shape: f32[2,128], index: 2, kind: input, shape index: {}]   ;;  %s7178_s3 = inlined_call_operand.hbm [shape: bf16[2,128,1536], index: 3, kind: input, shape index: {}]   ;;  %s7179_s4 = inlined_call_operand.hbm [shape: f32[2,1,1536], index: 4, kind: input, shape index: {}]   ;;  %s7180_s5 = inlined_call_operand.hbm [shape: bf16[2,4,128,128], index: 5, kind: input, shape index: {}]   ;;  %s7181_s6 = inlined_call_operand.vmem [shape: f32[2,1,128], index: 6, kind: input, shape index: {}]   ;;  %s7182_s7 = inlined_call_operand.vmem [shape: f32[2,2,128], index: 7, kind: input, shape index: {}]   ;;  %s7183_s8 = inlined_call_operand.hbm [shape: bf16[2,128,128], index: 8, kind: input, shape index: {}]   ;;  %s7184_s9 = inlined_call_operand.vmem [shape: f32[2,1,128], index: 9, kind: input, shape index: {}]   ;;  %s7185_s10 = inlined_call_operand.hbm [shape: bf16[2,128,128], index: 10, kind: input, shape index: {}]   ;;  %s7186_s11 = inlined_call_operand.vmem [shape: f32[2,1,128], index: 11, kind: input, shape index: {}]   ;;  %s7187_s12 = inlined_call_operand.vmem [shape: f32[2,2,128], index: 12, kind: input, shape index: {}]   ;;  %s7188_s13 = inlined_call_operand.hbm [shape: f32[2,8,128], index: 13, kind: output, shape index: {}]  }
   0x1   :  { %7197 = sst [smem:[#allocation24_spill]] %s7177_s2 }
   0x2   :  { %7198 = sst [smem:[#allocation25_spill]] %s7178_s3 }
   0x3   :  { %7199 = sst [smem:[#allocation26_spill]] %s7179_s4 }
   0x4   :  { %7200 = sst [smem:[#allocation27_spill]] %s7180_s5 }
   0x5   :  { %7201 = sst [smem:[#allocation28_spill]] %s7183_s8 }
   0x6   :  { %7202 = sst [smem:[#allocation29_spill]] %s7185_s10 }
   0x7   :  { %19 = dma.hbm_to_smem %s7175_s0, 16, %s6376_s25, [#allocation2] }
   0x8   :  { %6338 = dma.done.wait [#allocation2], 16 }
   0x9   :  { %6339 = vsyncadd [#allocation2], 4294967280 }
   0xa   :  { %21 = sfence }
   0xb   :  { %22 = vsyncpa [#allocation5], 0 }
   0xc   :  { %24 = vsyncpa [#allocation5 + $0x1], 0 }
   0xd   :  { %25 = vsyncpa [#allocation8], 0 }
   0xe   :  { %26 = vsyncpa [#allocation11], 0 }
   0xf   :  { %27 = vsyncpa [#allocation14], 0 }
  0x10   :  { %28 = vsyncpa [#allocation6], 0 }
  0x11   :  { %30 = vsyncpa [#allocation6 + $0x1], 0  ;;  %s6467_s28 = smov 0   ;;  %s6469_s29 = smov 0  }
  0x12   :  { %s6471_s30 = smov 0   ;;  %s6473_s14 = smov 0  }
  0x13 LB: > { %s6377_s0 = smov [#allocation7]   ;;  %s6488_s16 = sadd.s32 4294967295, %s6374_s14   ;;  %s6374_s14 = sphi %s6473_s14, %s7237_s14   ;;  %s6370_s30 = sphi %s6471_s30, %s7236_s30   ;;  %s6366_s29 = sphi %s6469_s29, %s7235_s29   ;;  %s6362_s28 = sphi %s6467_s28, %s7234_s28  }
  0x14   : > { %s337_s15 = sshll.u32 %s6377_s0, 4  ;;  %p4749_p0 = scmp.ge.s32.totalorder %s6374_s14, 1  ;;  %s338_s15 = int_to_ptr.vmem [resolvable:$true] %s337_s15 }
  0x15   : > { %p7193_p1 = scmp.eq.s32.totalorder %s6488_s16, 0  ;;  %p324_p2 = scmp.lt.s32.totalorder %s6374_s14, 3 }
  0x16   : > { %s6378_s18 = smov [#allocation10]   ;;  %s6379_s21 = smov [#allocation13]  }
  0x17   : > { %p6493_p3 = pnand %p4749_p0, %p324_p2  ;;  %s360_s19 = sshll.u32 %s6378_s18, 4  ;;  %s6500_s19 = int_to_ptr.vmem [resolvable:$true] %s360_s19 }
  0x18   : > { %s392_s22 = sshll.u32 %s6379_s21, 4  ;;  %s6123_s24 = scalar_lea.vmem %s338_s15, 32  ;;  %s393_s22 = int_to_ptr.vmem [resolvable:$true] %s392_s22 }
  0x19   : > { %s7203_s17 = scalar_select %p6493_p3, 1, 0 }
  0x1a   : > { %p5585_p5 = pneg %p6493_p3  ;;  %p6124_p8 = scmp.ne.s32.totalorder %s338_s15, %s6123_s24 }
  0x1b   : > { %p6131_p11 = scmp.lt.s32.totalorder %s338_s15, %s338_s15  ;;  %p6132_p12 = scmp.lt.s32.totalorder %s6123_s24, %s6123_s24 }
  0x1c   : > { %p6504_p6 = pnand %p5585_p5, %p7193_p1 }
  0x1d   : > { %p6133_p13 = por %p6132_p12, %p6131_p11 }
  0x1e   : > { %p6510_p7 = pneg %p6504_p6 }
  0x20   : > { %p6126_p9 = pnand %p6124_p8, %p6510_p7 }
  0x22   : > { %p6127_p10 = pneg %p6126_p9 }
  0x24   : > { %p6134_p0 = pnand %p6133_p13, %p6127_p10 }
  0x26   : > { %6137 = shalt.err (!%p6134_p0)
}
  0x27   : > { %s7206_s2 = sld [smem:[#allocation24_spill]]  ;;  %s6149_s27 = scalar_lea.vmem %s6500_s19, 384 }
  0x28   : > { %p6150_p2 = scmp.ne.s32.totalorder %s6500_s19, %s6149_s27  ;;  %p6157_p9 = scmp.lt.s32.totalorder %s6500_s19, %s6500_s19 }
  0x29   : > { %p6158_p11 = scmp.lt.s32.totalorder %s6149_s27, %s6149_s27 }
  0x2a   : > { %p6152_p5 = pnand %p6150_p2, %p6510_p7 }
  0x2b   : > { %p6159_p10 = por %p6158_p11, %p6157_p9 }
  0x2c   : > { %p6153_p8 = pneg %p6152_p5 }
  0x2d   : > { %5588 = dma.hbm_to_vmem [thread:$0]  (!%p6504_p6), %s7206_s2, 32, %s338_s15, [#allocation8]  }
  0x2e   : > { %p6160_p12 = pnand %p6159_p10, %p6153_p8 }
  0x30   : > { %6163 = shalt.err (!%p6160_p12)
}
  0x31   : > { %s6380_s0 = smov 192   ;;  %s6381_s18 = smov 12  }
  0x32   : > { %s7207_s4 = sld [smem:[#allocation26_spill]]  ;;  %s6175_s15 = scalar_lea.vmem %s393_s22, 2048 }
  0x33   : > { %p6176_p13 = scmp.ne.s32.totalorder %s393_s22, %s6175_s15  ;;  %p6183_p5 = scmp.lt.s32.totalorder %s393_s22, %s393_s22 }
  0x34   : > { %p6184_p9 = scmp.lt.s32.totalorder %s6175_s15, %s6175_s15 }
  0x35   : > { %p6178_p0 = pnand %p6176_p13, %p6510_p7 }
  0x36   : > { %p6185_p8 = por %p6184_p9, %p6183_p5 }
  0x37   : > { %p6179_p2 = pneg %p6178_p0 }
  0x38   : > { %5594 = dma.hbm_to_vmem [thread:$0]  (!%p6504_p6), %s7207_s4, 384, %s6500_s19, [#allocation11], %s6380_s0, %s6380_s0, %s6381_s18  }
  0x39   : > { %p6186_p11 = pnand %p6185_p8, %p6179_p2 }
  0x3b   : > { %6189 = shalt.err (!%p6186_p11)
}
  0x3c   : > { %s7189_s25 = smov 64   ;;  %s7191_s26 = smov 4  }
  0x3d   : > { %s7208_s8 = sld [smem:[#allocation28_spill]]  ;;  %s6384_s0 = smov [#allocation9]  }
  0x3e   : > { %s347_s18 = sshll.u32 %s6384_s0, 4  ;;  %s348_s18 = int_to_ptr.vmem [resolvable:$true] %s347_s18 }
  0x3f   : > { %s6201_s21 = scalar_lea.vmem %s348_s18, 24576  ;;  %p6209_p0 = scmp.lt.s32.totalorder %s348_s18, %s348_s18 }
  0x40   : > { %p6202_p10 = scmp.ne.s32.totalorder %s348_s18, %s6201_s21  ;;  %p6210_p2 = scmp.lt.s32.totalorder %s6201_s21, %s6201_s21 }
  0x42   : > { %p6204_p12 = pnand %p6202_p10, %p6510_p7  ;;  %p6211_p5 = por %p6210_p2, %p6209_p0 }
  0x43   : > { %5600 = dma.hbm_to_vmem [thread:$0]  (!%p6504_p6), %s7208_s8, 2048, %s393_s22, [#allocation14], %s7189_s25, %s7189_s25, %s7191_s26  }
  0x44   : > { %p6205_p13 = pneg %p6204_p12 }
  0x46   : > { %p6212_p9 = pnand %p6211_p5, %p6205_p13 }
  0x48   : > { %6215 = shalt.err (!%p6212_p9)
}
  0x49   : > { %s6385_s24 = smov 768   ;;  %s6386_s15 = smov 48  }
  0x4a   : > { %s7209_s3 = sld [smem:[#allocation25_spill]]  ;;  %s6387_s27 = smov [#allocation12]  }
  0x4b   : > { %s373_s0 = sshll.u32 %s6387_s27, 4  ;;  %s6388_s25 = smov [#allocation15]   ;;  %s374_s0 = int_to_ptr.vmem [resolvable:$true] %s373_s0 }
  0x4c   : > { %s408_s26 = sshll.u32 %s6388_s25, 4  ;;  %s6227_s2 = scalar_lea.vmem %s374_s0, 8192  ;;  %s409_s26 = int_to_ptr.vmem [resolvable:$true] %s408_s26 }
  0x4d   : > { %p6228_p8 = scmp.ne.s32.totalorder %s374_s0, %s6227_s2  ;;  %p6235_p12 = scmp.lt.s32.totalorder %s374_s0, %s374_s0 }
  0x4e   : > { %p6236_p13 = scmp.lt.s32.totalorder %s6227_s2, %s6227_s2 }
  0x4f   : > { %p6230_p11 = pnand %p6228_p8, %p6510_p7 }
  0x50   : > { %5591 = dma.hbm_to_vmem [thread:$0]  (!%p6504_p6), %s7209_s3, 24576, %s348_s18, [#allocation8], %s6385_s24, %s6385_s24, %s6386_s15  }
  0x51   : > { %p6231_p10 = pneg %p6230_p11  ;;  %p6237_p0 = por %p6236_p13, %p6235_p12 }
  0x53   : > { %p6238_p2 = pnand %p6237_p0, %p6231_p10 }
  0x55   : > { %6241 = shalt.err (!%p6238_p2)
}
  0x56   : > { %s7210_s21 = smov 4   ;;  %s7211_s18 = smov 64  }
  0x57   : > { %s7212_s5 = sld [smem:[#allocation27_spill]]  ;;  %s6253_s25 = scalar_lea.vmem %s409_s26, 2048 }
  0x58   : > { %p6254_p5 = scmp.ne.s32.totalorder %s409_s26, %s6253_s25  ;;  %p6261_p11 = scmp.lt.s32.totalorder %s409_s26, %s409_s26 }
  0x59   : > { %p6262_p4 = scmp.lt.s32.totalorder %s6253_s25, %s6253_s25 }
  0x5a   : > { %p6256_p9 = pnand %p6254_p5, %p6510_p7 }
  0x5b   : > { %p6263_p12 = por %p6262_p4, %p6261_p11 }
  0x5c   : > { %p6257_p8 = pneg %p6256_p9 }
  0x5d   : > { %5597 = dma.hbm_to_vmem [thread:$0]  (!%p6504_p6), %s7212_s5, 8192, %s374_s0, [#allocation11], %s7211_s18, %s7211_s18, %s7210_s21  }
  0x5e   : > { %p6264_p10 = pnand %p6263_p12, %p6257_p8 }
  0x60   : > { %6267 = shalt.err (!%p6264_p10)
}
  0x61   : > { %s7213_s10 = sld [smem:[#allocation29_spill]]  ;;  %s4748_s20 = sadd.s32 4294967294, %s6374_s14  }
  0x62   : > { %s6572_s23 = sadd.s32 1, %s6374_s14   ;;  %s43_s27 = sadd.s32 1, %s6370_s30 }
  0x63   : > { %s40_s22 = ssub.s32 %s6374_s14, %s6572_s23  ;;  %p50_p7 = scmp.ne.s32.totalorder %s6370_s30, %s6366_s29 }
  0x64   : > { %p41_p4 = scmp.eq.s32.totalorder %s40_s22, 0  ;;  %p51_p13 = scmp.eq.s32.totalorder %s6374_s14, 0 }
  0x65   : > { %p56_p0 = scmp.ne.s32.totalorder %s6366_s29, %s6362_s28  ;;  %p311_p5 = scmp.eq.s32.totalorder %s6488_s16, 1 }
  0x66   : > { %s6583_s0 = scalar_select %p41_p4, %s6370_s30, %s43_s27  }
  0x67   : > { %5603 = dma.hbm_to_vmem [thread:$0]  (!%p6504_p6), %s7213_s10, 2048, %s409_s26, [#allocation14], %s7211_s18, %s7211_s18, %s7210_s21  }
  0x68   : > { %7214 = sst [smem:[#allocation23_spill]] %s6583_s0  ;;  %p6585_p2 = por %p51_p13, %p50_p7 }
  0x69   : > { %p6591_p6 = por %p7193_p1, %p56_p0  ;;  %p317_p9 = scmp.eq.s32.totalorder %s4748_s20, 1 }
  0x6a   : > { %p5618_p8 = scmp.lt.s32.totalorder %s6374_s14, 2  ;;  %s428_s21 = sand.u32 1, %s6370_s30  }
  0x6b   : > { %s7216_s26 = scalar_select %p6591_p6, 1, 0 }
  0x6c   : > { %p6598_p11 = por %p311_p5, %p50_p7  ;;  %p6602_p12 = por %p317_p9, %p56_p0 }
  0x6d   : > { %s4757_s25 = sshll.u32 %s428_s21, 3  ;;  %s4758_s2 = sshll.u32 %s6374_s14, 7 }
  0x6e   : > { %s7217_s18 = scalar_select %p6598_p11, 1, 0 }
  0x6f   : > { %s7218_s15 = scalar_select %p6602_p12, 1, 0 }
  0x70   : > { %s6610_s27 = scalar_lea.hbm %s7176_s1, %s4758_s2  ;;  %s432_s20 = scalar_lea.vmem [#allocation4], %s4757_s25 }
  0x71   : > { %s439_s3 = sshll.u32 %s432_s20, 4  ;;  %p6614_p10 = pnand %p5618_p8, %p6585_p2  ;;  %s440_s3 = int_to_ptr.vmem [resolvable:$true] %s439_s3 }
  0x72   : > { %s429_s5 = scalar_lea.sflag [#allocation5], %s428_s21  ;;  %s6268_s8 = scalar_lea.hbm %s6610_s27, 128 }
  0x73   : > { %p6269_p4 = scmp.ne.s32.totalorder %s6610_s27, %s6268_s8  ;;  %p6270_p7 = pneg %p6614_p10 }
  0x74   : > { %s6273_s22 = scalar_lea.hbm %s7176_s1, 256  ;;  %p6274_p5 = scmp.lt.s32.totalorder %s6610_s27, %s7176_s1 }
  0x75   : > { %p6271_p13 = pnand %p6270_p7, %p6269_p4  ;;  %p6275_p2 = scmp.lt.s32.totalorder %s6273_s22, %s6268_s8 }
  0x77   : > { %p6272_p0 = pneg %p6271_p13  ;;  %p6276_p9 = por %p6275_p2, %p6274_p5 }
  0x79   : > { %p6277_p8 = pnand %p6276_p9, %p6272_p0 }
  0x7b   : > { %6280 = shalt.err (!%p6277_p8)
}
  0x7c   : > { %s6281_s24 = scalar_lea.vmem %s440_s3, 128  ;;  %s6389_s21 = smov [#allocation4]  }
  0x7d   : > { %p6282_p1 = scmp.ne.s32.totalorder %s440_s3, %s6281_s24  ;;  %s6286_s10 = sshll.u32 %s6389_s21, 4  ;;  %s6287_s10 = int_to_ptr.vmem [resolvable:$false] %s6286_s10 }
  0x7e   : > { %s6288_s0 = scalar_lea.vmem %s6287_s10, 256  ;;  %p6289_p4 = scmp.lt.s32.totalorder %s440_s3, %s6287_s10 }
  0x7f   : > { %p6284_p12 = pnand %p6282_p1, %p6270_p7  ;;  %p6290_p13 = scmp.lt.s32.totalorder %s6288_s0, %s6281_s24 }
  0x81   : > { %p6285_p11 = pneg %p6284_p12  ;;  %p6291_p6 = por %p6290_p13, %p6289_p4 }
  0x83   : > { %p6292_p3 = pnand %p6291_p6, %p6285_p11 }
  0x85   : > { %6295 = shalt.err (!%p6292_p3)
}
  0x86   : > { %5607 = dma.hbm_to_vmem [thread:$0]  (!%p6614_p10), %s6610_s27, 128, %s440_s3, %s429_s5  }
  0x87   : > { %p7220_p0 = scmp.ne.s32.totalorder %s7203_s17, 0 }
  0x88   : > { %s6635_s8 = sand.u32 (!%p7220_p0), 1, %s6366_s29   ;;  %p7221_p1 = scmp.ne.s32.totalorder (!%p7220_p0), %s7216_s26, 0 }
  0x89   : > { %448 = sbr.rel (%p7220_p0) target bundleno = 8367 (0x20af), region = 68  ;;  %s4760_s2 = sshll.u32 (!%p7220_p0), %s6635_s8, 3 }
  0x8a   : > { %s451_s10 = scalar_lea.sflag (!%p7220_p0), [#allocation5], %s6635_s8  ;;  %s454_s0 = scalar_lea.vmem (!%p7220_p0), [#allocation4], %s4760_s2 }
  0x8e   : > { %6341 = dma.done.wait (%p7221_p1), %s451_s10, 128  }
  0x8f   : > { %6343 = vsyncadd (%p7221_p1), %s451_s10, 4294967168  ;;  %p7222_p3 = scmp.eq.s32.totalorder %s6488_s16, 0 }
  0x91   : > { %6345 = dma.done.wait (%p7222_p3), [#allocation8], 24608   ;;  %p7223_p6 = pmov %p7222_p3 }
  0x92   : > { %p7224_p11 = pmov %p7222_p3 }
  0x93   : > { %6347 = vsyncadd (%p7223_p6), [#allocation8], 4294942688 }
  0x94   : > { %6349 = dma.done.wait (%p7224_p11), [#allocation11], 8576   ;;  %p7225_p12 = pmov %p7222_p3 }
  0x95   : > { %p7226_p10 = pmov %p7222_p3 }
  0x96   : > { %6351 = vsyncadd (%p7225_p12), [#allocation11], 4294958720 }
  0x97   : > { %6353 = dma.done.wait (%p7226_p10), [#allocation14], 4096   ;;  %p7227_p7 = pmov %p7222_p3 }
  0x98   : > { %v521_v0 = vlaneseq  ;;  %v6390_v2 = vmov 0.0   ;;  %v533_v4 = vld [vmem:[%s454_s0] sm:$0xff]  ;;  %v6391_v45 = vmov 0   ;;  %v534_v51 = vld [vmem:[#allocation7] sm:$0x3]  ;;  %vm6392_vm1 = vmmov 0  }
  0x99   : > { %6355 = vsyncadd (%p7227_p7), [#allocation14], 4294963200  ;;  %v5674_v6 = vld [vmem:[#allocation9 + $0x2a4] ss:$48 sps:$4 sm:$0xff]   ;;  %v5676_v7 = vld [vmem:[#allocation9 + $0x2ac] ss:$48 sps:$4 sm:$0xff]   ;;  %1232 = vmatprep.mubr.bf16.mxu0 %v6391_v45  ;;  %1273 = vmatprep.mubr.bf16.mxu1 %v6391_v45 }
  0x9a   : > { %v6658_v1 = vand.u32 127, %v521_v0  ;;  %v5678_v8 = vld [vmem:[#allocation9 + $0x2a0] ss:$48 sps:$4 sm:$0xff]   ;;  %v5679_v9 = vld [vmem:[#allocation9 + $0x2a8] ss:$48 sps:$4 sm:$0xff]   ;;  %1200 = vmatprep.subr.bf16.mxu0 %v5674_v6  ;;  %1241 = vmatprep.subr.bf16.mxu1 %v5676_v7  ;;  %v6673_v49 = vshrl.u32 %v521_v0, 7 }
  0x9b   : > { %v5680_v10 = vld [vmem:[#allocation9 + $0x244] ss:$48 sps:$4 sm:$0xff]   ;;  %v5682_v11 = vld [vmem:[#allocation9 + $0x24c] ss:$48 sps:$4 sm:$0xff]   ;;  %1201 = vmatpush1.bf16.msra.mxu0 %v5678_v8  ;;  %1242 = vmatpush1.bf16.msra.mxu1 %v5679_v9  ;;  %v5684_v17 = vld [vmem:[#allocation9 + $0x240] ss:$48 sps:$4 sm:$0xff]  }
  0x9c   : > { %vm523_vm0 = vcmp.lt.s32.totalorder %v6658_v1, 32  ;;  %1202 = vmatprep.subr.bf16.mxu0 %v5680_v10  ;;  %1243 = vmatprep.subr.bf16.mxu1 %v5682_v11  ;;  %v5685_v18 = vld [vmem:[#allocation9 + $0x248] ss:$48 sps:$4 sm:$0xff]   ;;  %v5686_v19 = vld [vmem:[#allocation9 + $0x1e4] ss:$48 sps:$4 sm:$0xff]   ;;  %v6676_v50 = vsub.s32 0, %v6673_v49 }
  0x9d   : > { %v6662_v3 = vsel %vm523_vm0, 1.0, %v6390_v2  ;;  %v5688_v20 = vld [vmem:[#allocation9 + $0x1ec] ss:$48 sps:$4 sm:$0xff]   ;;  %v5690_v21 = vld [vmem:[#allocation9 + $0x1e0] ss:$48 sps:$4 sm:$0xff]   ;;  %v6679_v52 = vsub.s32 1, %v6673_v49 }
  0x9e   : > { %v535_v5 = vmul.f32 %v6662_v3, %v533_v4  ;;  %v5691_v22 = vld [vmem:[#allocation9 + $0x1e8] ss:$48 sps:$4 sm:$0xff]   ;;  %v5692_v23 = vld [vmem:[#allocation9 + $0x184] ss:$48 sps:$4 sm:$0xff]   ;;  %v5694_v24 = vld [vmem:[#allocation9 + $0x18c] ss:$48 sps:$4 sm:$0xff]   ;;  %v551_v53 = vrot.slane %v534_v51, %v6676_v50 }
  0x9f   : > { %1203 = vmatpush1.bf16.msra.mxu0 %v5684_v17  ;;  %1244 = vmatpush1.bf16.msra.mxu1 %v5685_v18  ;;  %v5696_v25 = vld [vmem:[#allocation9 + $0x180] ss:$48 sps:$4 sm:$0xff]   ;;  %v5697_v26 = vld [vmem:[#allocation9 + $0x188] ss:$48 sps:$4 sm:$0xff]   ;;  %v5698_v27 = vld [vmem:[#allocation9 + $0x124] ss:$48 sps:$4 sm:$0xff]   ;;  %v556_v55 = vrot.slane %v534_v51, %v6679_v52 }
  0xa0   : > { %536 = vadd.xlane.f32.xlu0 %v535_v5  ;;  %1204 = vmatprep.subr.bf16.mxu0 %v5686_v19  ;;  %v5700_v28 = vld [vmem:[#allocation9 + $0x12c] ss:$48 sps:$4 sm:$0xff]   ;;  %v5702_v29 = vld [vmem:[#allocation9 + $0x120] ss:$48 sps:$4 sm:$0xff]   ;;  %v5703_v30 = vld [vmem:[#allocation9 + $0x128] ss:$48 sps:$4 sm:$0xff]  }
  0xa1   : > { %1245 = vmatprep.subr.bf16.mxu1 %v5688_v20  ;;  %v5704_v31 = vld [vmem:[#allocation9 + $0xc4] ss:$48 sps:$4 sm:$0xff]   ;;  %v5706_v32 = vld [vmem:[#allocation9 + $0xcc] ss:$48 sps:$4 sm:$0xff]   ;;  %v5708_v33 = vld [vmem:[#allocation9 + $0xc0] ss:$48 sps:$4 sm:$0xff]  }
  0xa2   : > { %v5709_v34 = vld [vmem:[#allocation9 + $0xc8] ss:$48 sps:$4 sm:$0xff]   ;;  %v5710_v35 = vld [vmem:[#allocation9 + $0x64] ss:$48 sps:$4 sm:$0xff]   ;;  %v5712_v36 = vld [vmem:[#allocation9 + $0x6c] ss:$48 sps:$4 sm:$0xff]  }
  0xa3   : > { %1205 = vmatpush1.bf16.msra.mxu0 %v5690_v21  ;;  %1246 = vmatpush1.bf16.msra.mxu1 %v5691_v22  ;;  %v5714_v37 = vld [vmem:[#allocation9 + $0x60] ss:$48 sps:$4 sm:$0xff]   ;;  %v5715_v38 = vld [vmem:[#allocation9 + $0x68] ss:$48 sps:$4 sm:$0xff]   ;;  %v5716_v39 = vld [vmem:[#allocation9 + $0x4] ss:$48 sps:$4 sm:$0xff]  }
  0xa4   : > { %1206 = vmatprep.subr.bf16.mxu0 %v5692_v23  ;;  %1247 = vmatprep.subr.bf16.mxu1 %v5694_v24  ;;  %v5718_v40 = vld [vmem:[#allocation9 + $0xc] ss:$48 sps:$4 sm:$0xff]   ;;  %v5720_v41 = vld [vmem:[#allocation9] ss:$48 sps:$4 sm:$0xff]   ;;  %v5721_v42 = vld [vmem:[#allocation9 + $0x8] ss:$48 sps:$4 sm:$0xff]  }
  0xa5   : > { %v5724_v43 = vld [vmem:[#allocation9 + $0x2b4] ss:$48 sps:$4 sm:$0xff]   ;;  %v5727_v44 = vld [vmem:[#allocation9 + $0x2bc] ss:$48 sps:$4 sm:$0xff]   ;;  %v5722_v60 = vld [vmem:[#allocation9 + $0x2b0] ss:$48 sps:$4 sm:$0xff]  }
  0xa6   : > { %v5725_v61 = vld [vmem:[#allocation9 + $0x2b8] ss:$48 sps:$4 sm:$0xff]   ;;  %v5730_v63 = vld [vmem:[#allocation9 + $0x254] ss:$48 sps:$4 sm:$0xff]   ;;  %v5733_v0 = vld [vmem:[#allocation9 + $0x25c] ss:$48 sps:$4 sm:$0xff]  }
  0xa7   : > { %1207 = vmatpush1.bf16.msra.mxu0 %v5696_v25  ;;  %1248 = vmatpush1.bf16.msra.mxu1 %v5697_v26  ;;  %v5731_v5 = vld [vmem:[#allocation9 + $0x258] ss:$48 sps:$4 sm:$0xff]   ;;  %v5736_v6 = vld [vmem:[#allocation9 + $0x1f4] ss:$48 sps:$4 sm:$0xff]   ;;  %v5739_v7 = vld [vmem:[#allocation9 + $0x1fc] ss:$48 sps:$4 sm:$0xff]  }
  0xa8   : > { %1208 = vmatprep.subr.bf16.mxu0 %v5698_v27  ;;  %1249 = vmatprep.subr.bf16.mxu1 %v5700_v28  ;;  %v5734_v8 = vld [vmem:[#allocation9 + $0x1f0] ss:$48 sps:$4 sm:$0xff]   ;;  %v5737_v9 = vld [vmem:[#allocation9 + $0x1f8] ss:$48 sps:$4 sm:$0xff]   ;;  %v5742_v10 = vld [vmem:[#allocation9 + $0x194] ss:$48 sps:$4 sm:$0xff]  }
  0xa9   : > { %v5745_v11 = vld [vmem:[#allocation9 + $0x19c] ss:$48 sps:$4 sm:$0xff]   ;;  %v5749_v17 = vld [vmem:[#allocation9 + $0x138] ss:$48 sps:$4 sm:$0xff]   ;;  %v5754_v18 = vld [vmem:[#allocation9 + $0xd4] ss:$48 sps:$4 sm:$0xff]  }
  0xaa   : > { %v5757_v19 = vld [vmem:[#allocation9 + $0xdc] ss:$48 sps:$4 sm:$0xff]   ;;  %v5752_v20 = vld [vmem:[#allocation9 + $0xd0] ss:$48 sps:$4 sm:$0xff]   ;;  %v5755_v21 = vld [vmem:[#allocation9 + $0xd8] ss:$48 sps:$4 sm:$0xff]  }
  0xab   : > { %1209 = vmatpush1.bf16.msra.mxu0 %v5702_v29  ;;  %1250 = vmatpush1.bf16.msra.mxu1 %v5703_v30  ;;  %v5760_v22 = vld [vmem:[#allocation9 + $0x74] ss:$48 sps:$4 sm:$0xff]   ;;  %v5763_v23 = vld [vmem:[#allocation9 + $0x7c] ss:$48 sps:$4 sm:$0xff]   ;;  %v5758_v24 = vld [vmem:[#allocation9 + $0x70] ss:$48 sps:$4 sm:$0xff]  }
  0xac   : > { %1210 = vmatprep.subr.bf16.mxu0 %v5704_v31  ;;  %1251 = vmatprep.subr.bf16.mxu1 %v5706_v32  ;;  %v5761_v25 = vld [vmem:[#allocation9 + $0x78] ss:$48 sps:$4 sm:$0xff]   ;;  %v5766_v26 = vld [vmem:[#allocation9 + $0x14] ss:$48 sps:$4 sm:$0xff]   ;;  %v5769_v27 = vld [vmem:[#allocation9 + $0x1c] ss:$48 sps:$4 sm:$0xff]  }
  0xad   : > { %v5764_v28 = vld [vmem:[#allocation9 + $0x10] ss:$48 sps:$4 sm:$0xff]   ;;  %v5767_v29 = vld [vmem:[#allocation9 + $0x18] ss:$48 sps:$4 sm:$0xff]   ;;  %v5772_v30 = vld [vmem:[#allocation9 + $0x2c4] ss:$48 sps:$4 sm:$0xff]  }
  0xae   : > { %v5775_v31 = vld [vmem:[#allocation9 + $0x2cc] ss:$48 sps:$4 sm:$0xff]   ;;  %v5770_v32 = vld [vmem:[#allocation9 + $0x2c0] ss:$48 sps:$4 sm:$0xff]   ;;  %vm1507_vm2 = vcmask 1043456   ;;  %s6749_s3 = sld [smem:[#allocation3 + %s6488_s16]] }
  0xaf   : > { %1211 = vmatpush1.bf16.msra.mxu0 %v5708_v33  ;;  %1252 = vmatpush1.bf16.msra.mxu1 %v5709_v34  ;;  %v5773_v33 = vld [vmem:[#allocation9 + $0x2c8] ss:$48 sps:$4 sm:$0xff]   ;;  %v5778_v34 = vld [vmem:[#allocation9 + $0x264] ss:$48 sps:$4 sm:$0xff]   ;;  %v5794_v51 = vld [vmem:[#allocation9 + $0x140] ss:$48 sps:$4 sm:$0xff]  }
  0xb0   : > { %1212 = vmatprep.subr.bf16.mxu0 %v5710_v35  ;;  %1253 = vmatprep.subr.bf16.mxu1 %v5712_v36  ;;  %v5781_v35 = vld [vmem:[#allocation9 + $0x26c] ss:$48 sps:$4 sm:$0xff]   ;;  %v5776_v36 = vld [vmem:[#allocation9 + $0x260] ss:$48 sps:$4 sm:$0xff]   ;;  %vm1490_vm4 = vcmask 64512   ;;  %s5078_s25 = sshll.u32 %s6488_s16, 7 }
  0xb1   : > { %s518_s20 = scalar_lea.vmem [#allocation16], %s4760_s2  ;;  %s4619_s0 = scalar_lea.hbm %s7188_s13, %s5078_s25 }
  0xb2   : > { %s4621_s24 = sshll.u32 %s518_s20, 4  ;;  %p7230_p2 = scmp.ne.s32.totalorder %s7217_s18, 0  ;;  %s4622_s24 = int_to_ptr.vmem [resolvable:$true] %s4621_s24 }
  0xb3   : > { %1213 = vmatpush1.bf16.msra.mxu0 %v5714_v37  ;;  %1254 = vmatpush1.bf16.msra.mxu1 %v5715_v38  ;;  %v5779_v37 = vld [vmem:[#allocation9 + $0x268] ss:$48 sps:$4 sm:$0xff]   ;;  %v5784_v38 = vld [vmem:[#allocation9 + $0x204] ss:$48 sps:$4 sm:$0xff]   ;;  %s6296_s4 = scalar_lea.vmem %s4622_s24, 128  ;;  %s6393_s5 = smov [#allocation16]  }
  0xb4   : > { %1214 = vmatprep.subr.bf16.mxu0 %v5716_v39  ;;  %1255 = vmatprep.subr.bf16.mxu1 %v5718_v40  ;;  %v5787_v39 = vld [vmem:[#allocation9 + $0x20c] ss:$48 sps:$4 sm:$0xff]   ;;  %v5782_v40 = vld [vmem:[#allocation9 + $0x200] ss:$48 sps:$4 sm:$0xff]   ;;  %p6297_p5 = scmp.ne.s32.totalorder %s4622_s24, %s6296_s4  ;;  %s6300_s16 = sshll.u32 %s6393_s5, 4  ;;  %s6301_s16 = int_to_ptr.vmem [resolvable:$false] %s6300_s16 }
  0xb5   : > { %s6302_s2 = scalar_lea.vmem %s6301_s16, 256  ;;  %p6303_p4 = scmp.lt.s32.totalorder %s4622_s24, %s6301_s16 }
  0xb6   : > { %p6298_p9 = pnand %p6297_p5, %p7230_p2  ;;  %p6304_p13 = scmp.lt.s32.totalorder %s6302_s2, %s6296_s4 }
  0xb7   : > { %1215 = vmatpush1.bf16.msra.mxu0 %v5720_v41  ;;  %1256 = vmatpush1.bf16.msra.mxu1 %v5721_v42  ;;  %v5785_v41 = vld [vmem:[#allocation9 + $0x208] ss:$48 sps:$4 sm:$0xff]   ;;  %v5790_v42 = vld [vmem:[#allocation9 + $0x1a4] ss:$48 sps:$4 sm:$0xff]  }
  0xb8   : > { %1282 = vmatprep.subr.bf16.mxu0 %v5724_v43  ;;  %1323 = vmatprep.subr.bf16.mxu1 %v5727_v44  ;;  %v5793_v43 = vld [vmem:[#allocation9 + $0x1ac] ss:$48 sps:$4 sm:$0xff]   ;;  %v5788_v44 = vld [vmem:[#allocation9 + $0x1a0] ss:$48 sps:$4 sm:$0xff]   ;;  %p6299_p8 = pneg %p6298_p9  ;;  %p6305_p0 = por %p6304_p13, %p6303_p4 }
  0xba   : > { %p6306_p1 = pnand %p6305_p0, %p6299_p8 }
 0x129   : > { %v537_v12 = vpop.xlane.xlu0 %536 }
 0x12a   : > { %v538_v13 = vmul.f32 0.03125, %v537_v12  ;;  %v5740_v12 = vld [vmem:[#allocation9 + $0x190] ss:$48 sps:$4 sm:$0xff]  }
 0x12c   : > { %v539_v14 = vsub.f32 %v533_v4, %v538_v13  ;;  %v5728_v4 = vld [vmem:[#allocation9 + $0x250] ss:$48 sps:$4 sm:$0xff]   ;;  %v5743_v13 = vld [vmem:[#allocation9 + $0x198] ss:$48 sps:$4 sm:$0xff]  }
 0x12e   : > { %v6666_v15 = vmul.f32 %v6662_v3, %v539_v14  ;;  %v5748_v14 = vld [vmem:[#allocation9 + $0x134] ss:$48 sps:$4 sm:$0xff]  }
 0x130   : > { %v541_v16 = vmul.f32 %v6666_v15, %v6666_v15 }
 0x132   : > { %542 = vadd.xlane.f32.xlu0 %v541_v16  ;;  %v5746_v16 = vld [vmem:[#allocation9 + $0x130] ss:$48 sps:$4 sm:$0xff]  }
 0x1bb   : > { %v543_v46 = vpop.xlane.xlu0 %542 }
 0x1bc   : > { %v544_v47 = vmul.f32 0.03125, %v543_v46  ;;  %v5791_v46 = vld [vmem:[#allocation9 + $0x1a8] ss:$48 sps:$4 sm:$0xff]  }
 0x1be   : > { %v545_v48 = vadd.f32 1e-12, %v544_v47  ;;  %v5796_v47 = vld [vmem:[#allocation9 + $0x144] ss:$48 sps:$4 sm:$0xff]  }
 0x1c0   : > { %6058 = vrsqrt.f32 %v545_v48  ;;  %v5799_v48 = vld [vmem:[#allocation9 + $0x14c] ss:$48 sps:$4 sm:$0xff]  }
 0x1cd   : > { %v6059_v54 = vpop.eup %6058 }
 0x1ce   : > { %v547_v56 = vmul.f32 %v6059_v54, %v6666_v15  ;;  %v5751_v15 = vld [vmem:[#allocation9 + $0x13c] ss:$48 sps:$4 sm:$0xff]   ;;  %v5802_v54 = vld [vmem:[#allocation9 + $0xe4] ss:$48 sps:$4 sm:$0xff]  }
 0x1d0   : > { %v552_v57 = vmul.f32 %v551_v53, %v547_v56  ;;  %v5797_v53 = vld [vmem:[#allocation9 + $0x148] ss:$48 sps:$4 sm:$0xff]   ;;  %v5800_v56 = vld [vmem:[#allocation9 + $0xe0] ss:$48 sps:$4 sm:$0xff]  }
 0x1d2   : > { %v557_v58 = vadd.f32 %v556_v55, %v552_v57  ;;  %v5805_v55 = vld [vmem:[#allocation9 + $0xec] ss:$48 sps:$4 sm:$0xff]   ;;  %v5803_v57 = vld [vmem:[#allocation9 + $0xe8] ss:$48 sps:$4 sm:$0xff]  }
 0x1d4   : > { %v6685_v59 = vmul.f32 %v6662_v3, %v557_v58  ;;  %v5808_v58 = vld [vmem:[#allocation9 + $0x84] ss:$48 sps:$4 sm:$0xff]  }
 0x1d6   : > { %v6689_v62 = vpack.c.bf16 %v6685_v59, %v6685_v59 }
 0x1d8   : > { %1233 = vmatmul.mubr.bf16.vlgmr.msra.gmra.mxu0 %v6689_v62  ;;  %1274 = vmatmul.mubr.bf16.vlgmr.msra.gmra.mxu1 %v6689_v62 }
 0x1d9   : > { %1283 = vmatpush1.bf16.msra.mxu0 %v5722_v60  ;;  %1324 = vmatpush1.bf16.msra.mxu1 %v5725_v61  ;;  %v5811_v60 = vld [vmem:[#allocation9 + $0x8c] ss:$48 sps:$4 sm:$0xff]   ;;  %v5806_v61 = vld [vmem:[#allocation9 + $0x80] ss:$48 sps:$4 sm:$0xff]  }
 0x1da   : > { %1284 = vmatprep.subr.bf16.mxu0 %v5730_v63  ;;  %1325 = vmatprep.subr.bf16.mxu1 %v5733_v0  ;;  %v5809_v63 = vld [vmem:[#allocation9 + $0x88] ss:$48 sps:$4 sm:$0xff]   ;;  %v5814_v0 = vld [vmem:[#allocation9 + $0x24] ss:$48 sps:$4 sm:$0xff]  }
 0x1db   : > { %1314 = vmatprep.mubr.bf16.mxu0 %v6391_v45  ;;  %1355 = vmatprep.mubr.bf16.mxu1 %v6391_v45 }
 0x1dd   : > { %1285 = vmatpush1.bf16.msra.mxu0 %v5728_v4  ;;  %1326 = vmatpush1.bf16.msra.mxu1 %v5731_v5  ;;  %v5817_v4 = vld [vmem:[#allocation9 + $0x2c] ss:$48 sps:$4 sm:$0xff]   ;;  %v5812_v5 = vld [vmem:[#allocation9 + $0x20] ss:$48 sps:$4 sm:$0xff]  }
 0x1de   : > { %1286 = vmatprep.subr.bf16.mxu0 %v5736_v6  ;;  %1327 = vmatprep.subr.bf16.mxu1 %v5739_v7  ;;  %v5815_v6 = vld [vmem:[#allocation9 + $0x28] ss:$48 sps:$4 sm:$0xff]  }
 0x1e1   : > { %1287 = vmatpush1.bf16.msra.mxu0 %v5734_v8  ;;  %1328 = vmatpush1.bf16.msra.mxu1 %v5737_v9 }
 0x1e2   : > { %1288 = vmatprep.subr.bf16.mxu0 %v5742_v10  ;;  %1329 = vmatprep.subr.bf16.mxu1 %v5745_v11 }
 0x1e5   : > { %1289 = vmatpush1.bf16.msra.mxu0 %v5740_v12  ;;  %1330 = vmatpush1.bf16.msra.mxu1 %v5743_v13 }
 0x1e6   : > { %1290 = vmatprep.subr.bf16.mxu0 %v5748_v14  ;;  %1331 = vmatprep.subr.bf16.mxu1 %v5751_v15  ;;  %v6714_v15 = vld [vmem:[#allocation10] sm:$0xff] }
 0x1e9   : > { %1291 = vmatpush1.bf16.msra.mxu0 %v5746_v16  ;;  %1332 = vmatpush1.bf16.msra.mxu1 %v5749_v17 }
 0x1ea   : > { %1292 = vmatprep.subr.bf16.mxu0 %v5754_v18  ;;  %1333 = vmatprep.subr.bf16.mxu1 %v5757_v19 }
 0x1ed   : > { %1293 = vmatpush1.bf16.msra.mxu0 %v5752_v20  ;;  %1334 = vmatpush1.bf16.msra.mxu1 %v5755_v21  ;;  %v663_v20 = vrot.slane %v6714_v15, %v6676_v50 }
 0x1ee   : > { %1294 = vmatprep.subr.bf16.mxu0 %v5760_v22  ;;  %1335 = vmatprep.subr.bf16.mxu1 %v5763_v23 }
 0x1f1   : > { %1295 = vmatpush1.bf16.msra.mxu0 %v5758_v24  ;;  %1336 = vmatpush1.bf16.msra.mxu1 %v5761_v25 }
 0x1f2   : > { %1296 = vmatprep.subr.bf16.mxu0 %v5766_v26  ;;  %1337 = vmatprep.subr.bf16.mxu1 %v5769_v27 }
 0x1f5   : > { %1297 = vmatpush1.bf16.msra.mxu0 %v5764_v28  ;;  %1338 = vmatpush1.bf16.msra.mxu1 %v5767_v29 }
 0x1f6   : > { %1364 = vmatprep.subr.bf16.mxu0 %v5772_v30  ;;  %1405 = vmatprep.subr.bf16.mxu1 %v5775_v31  ;;  %v656_v30 = vld [vmem:[#allocation10 + $0x8] sm:$0xf]  ;;  %v6731_v31 = vsub.s32 2, %v6673_v49 }
 0x1f8   : > { %1315 = vmatmul.mubr.bf16.vlgmr.msra.gmra.mxu0 %v6689_v62  ;;  %1356 = vmatmul.mubr.bf16.vlgmr.msra.gmra.mxu1 %v6689_v62 }
 0x1f9   : > { %1365 = vmatpush1.bf16.msra.mxu0 %v5770_v32  ;;  %1406 = vmatpush1.bf16.msra.mxu1 %v5773_v33  ;;  %v6734_v32 = vsub.s32 3, %v6673_v49  ;;  %v695_v33 = vrot.slane %v656_v30, %v6676_v50 }
 0x1fa   : > { %1366 = vmatprep.subr.bf16.mxu0 %v5778_v34  ;;  %1407 = vmatprep.subr.bf16.mxu1 %v5781_v35  ;;  %v703_v34 = vrot.slane %v656_v30, %v6731_v31  ;;  %v699_v35 = vrot.slane %v656_v30, %v6679_v52 }
 0x1fb   : > { %1396 = vmatprep.mubr.bf16.mxu0 %v6391_v45  ;;  %1437 = vmatprep.mubr.bf16.mxu1 %v6391_v45 }
 0x1fd   : > { %1367 = vmatpush1.bf16.msra.mxu0 %v5776_v36  ;;  %1408 = vmatpush1.bf16.msra.mxu1 %v5779_v37  ;;  %v707_v36 = vrot.slane %v656_v30, %v6734_v32 }
 0x1fe   : > { %1368 = vmatprep.subr.bf16.mxu0 %v5784_v38  ;;  %1409 = vmatprep.subr.bf16.mxu1 %v5787_v39 }
 0x201   : > { %1369 = vmatpush1.bf16.msra.mxu0 %v5782_v40  ;;  %1410 = vmatpush1.bf16.msra.mxu1 %v5785_v41 }
 0x202   : > { %1370 = vmatprep.subr.bf16.mxu0 %v5790_v42  ;;  %1411 = vmatprep.subr.bf16.mxu1 %v5793_v43 }
 0x205   : > { %1371 = vmatpush1.bf16.msra.mxu0 %v5788_v44  ;;  %1412 = vmatpush1.bf16.msra.mxu1 %v5791_v46 }
 0x206   : > { %1372 = vmatprep.subr.bf16.mxu0 %v5796_v47  ;;  %1413 = vmatprep.subr.bf16.mxu1 %v5799_v48 }
 0x209   : > { %1373 = vmatpush1.bf16.msra.mxu0 %v5794_v51  ;;  %1414 = vmatpush1.bf16.msra.mxu1 %v5797_v53 }
 0x20a   : > { %1374 = vmatprep.subr.bf16.mxu0 %v5802_v54  ;;  %1415 = vmatprep.subr.bf16.mxu1 %v5805_v55 }
 0x20d   : > { %1375 = vmatpush1.bf16.msra.mxu0 %v5800_v56  ;;  %1416 = vmatpush1.bf16.msra.mxu1 %v5803_v57  ;;  %v528_v57 = vstv %s6749_s3  ;;  %s4608_s3 = scalar_lea.sflag [#allocation6], %s6635_s8 }
 0x20e   : > { %1376 = vmatprep.subr.bf16.mxu0 %v5808_v58  ;;  %1417 = vmatprep.subr.bf16.mxu1 %v5811_v60  ;;  %vm6755_vm3 = vcmp.lt.s32.totalorder %v6658_v1, %v528_v57  ;;  %vm529_vm5 = vcmp.lt.s32.totalorder %v6673_v49, %v528_v57 }
 0x211   : > { %1377 = vmatpush1.bf16.msra.mxu0 %v5806_v61  ;;  %1418 = vmatpush1.bf16.msra.mxu1 %v5809_v63 }
 0x212   : > { %1378 = vmatprep.subr.bf16.mxu0 %v5814_v0  ;;  %1419 = vmatprep.subr.bf16.mxu1 %v5817_v4 }
 0x215   : > { %1379 = vmatpush1.bf16.msra.mxu0 %v5812_v5  ;;  %1420 = vmatpush1.bf16.msra.mxu1 %v5815_v6 }
 0x216   : > { %5221 = vmatprep.subr.bf16.mxu0 %v6390_v2  ;;  %5239 = vmatprep.subr.bf16.mxu1 %v6390_v2 }
 0x218   : > { %1397 = vmatmul.mubr.bf16.vlgmr.msra.gmra.mxu0 %v6689_v62  ;;  %1438 = vmatmul.mubr.bf16.vlgmr.msra.gmra.mxu1 %v6689_v62  ;;  %v678_v62 = vsub.s32 4, %v6673_v49 }
 0x219   : > { %5223 = vmatprep.mubr.msk.bf16.mxu0 %vm6392_vm1, %v6390_v2  ;;  %5241 = vmatprep.mubr.msk.bf16.mxu1 %vm6392_vm1, %v6390_v2 }
 0x21a   : > { %v679_v16 = vrot.slane %v6714_v15, %v678_v62 }
 0x298   : > { %v1234_v7 = vpop.f32.mrf.mxu0  ;;  %v6707_v8 = vpop.f32.mrf.mxu1 }
 0x299   : > { %v1235_v26 = vadd.f32 %v1234_v7, %v663_v20 }
 0x29a   : > { %v6709_v9 = vpop.f32.mrf.mxu0  ;;  %v6711_v10 = vpop.f32.mrf.mxu1 }
 0x29b   : > { %v1446_v29 = vpack.c.bf16 %v1235_v26, %v1235_v26 }
 0x29c   : > { %v1238_v11 = vpop.f32.mrf.mxu0  ;;  %v1279_v12 = vpop.f32.mrf.mxu1 }
 0x29e   : > { %v1239_v13 = vpop.f32.mrf.mxu0  ;;  %v1280_v14 = vpop.f32.mrf.mxu1 }
 0x2b8   : > { %v1316_v17 = vpop.f32.mrf.mxu0  ;;  %v6719_v18 = vpop.f32.mrf.mxu1 }
 0x2b9   : > { %v1317_v19 = vadd.f32 %v1316_v17, %v679_v16  ;;  %v682_v16 = vsub.s32 5, %v6673_v49 }
 0x2ba   : > { %v6723_v21 = vpop.f32.mrf.mxu0  ;;  %v6725_v22 = vpop.f32.mrf.mxu1 }
 0x2bb   : > { %v1447_v23 = vpack.c.bf16 %v1317_v19, %v1317_v19  ;;  %v683_v17 = vrot.slane %v6714_v15, %v682_v16 }
 0x2bc   : > { %v1320_v24 = vpop.f32.mrf.mxu0  ;;  %v1361_v25 = vpop.f32.mrf.mxu1 }
 0x2bd   : > { %5222 = vmatpush3.bf16.xpose.msra.mxu0 %v1447_v23  ;;  %v1319_v20 = vadd.f32 %v6723_v21, %v683_v17  ;;  %v667_v24 = vrot.slane %v6714_v15, %v6679_v52  ;;  %v5825_v17 = vld [vmem:[#allocation12] sm:$0xff]  }
 0x2be   : > { %v1321_v27 = vpop.f32.mrf.mxu0  ;;  %v1362_v28 = vpop.f32.mrf.mxu1  ;;  %5227 = vmatprep.subr.bf16.mxu0 %v6390_v2 }
 0x2bf   : > { %v1569_v26 = vpack.c.bf16 %v1319_v20, %v1319_v20  ;;  %v1237_v27 = vadd.f32 %v6709_v9, %v667_v24  ;;  %v686_v24 = vsub.s32 6, %v6673_v49 }
 0x2c1   : > { %v1568_v28 = vpack.c.bf16 %v1237_v27, %v1237_v27  ;;  %v671_v27 = vrot.slane %v6714_v15, %v6731_v31 }
 0x2c4   : > { %5224 = vmatmul.mubr.bf16.vlgmr.msra.gmra.mxu0 %v1446_v29 }
 0x2c5   : > { %5229 = vmatprep.mubr.msk.bf16.mxu0 %vm6392_vm1, %v6390_v2 }
 0x2d8   : > { %v1398_v37 = vpop.f32.mrf.mxu0  ;;  %v1439_v38 = vpop.f32.mrf.mxu1 }
 0x2d9   : > { %v1399_v39 = vadd.f32 %v1398_v37, %v695_v33  ;;  %v6740_v40 = vadd.f32 %v1439_v38, %v703_v34 }
 0x2da   : > { %v1400_v41 = vpop.f32.mrf.mxu0  ;;  %v1441_v42 = vpop.f32.mrf.mxu1 }
 0x2db   : > { %v1503_v43 = vpack.c.bf16 %v1399_v39, %v1399_v39  ;;  %v1401_v44 = vadd.f32 %v1400_v41, %v699_v35  ;;  %v6742_v46 = vadd.f32 %v1441_v42, %v707_v36 }
 0x2dc   : > { %v1402_v47 = vpop.f32.mrf.mxu0  ;;  %v1443_v48 = vpop.f32.mrf.mxu1 }
 0x2dd   : > { %v1509_v51 = vsel %vm1507_vm2, %v1503_v43, 0  ;;  %v1624_v53 = vpack.c.bf16 %v1401_v44, %v1401_v44  ;;  %v5826_v48 = vld [vmem:[#allocation12 + $0x78] sm:$0xff]  }
 0x2de   : > { %v1403_v54 = vpop.f32.mrf.mxu0  ;;  %v1444_v55 = vpop.f32.mrf.mxu1  ;;  %5228 = vmatpush3.bf16.msra.mxu0 %v1509_v51  ;;  %v5827_v51 = vld [vmem:[#allocation12 + $0x70] sm:$0xff]  }
 0x2df   : > { %v1629_v56 = vsel %vm1507_vm2, %v1624_v53, 0  ;;  %5233 = vmatprep.subr.bf16.mxu0 %v6390_v2  ;;  %v5828_v53 = vld [vmem:[#allocation12 + $0x68] sm:$0xff]   ;;  %v5829_v54 = vld [vmem:[#allocation12 + $0x60] sm:$0xff]   ;;  %v5830_v55 = vld [vmem:[#allocation12 + $0x58] sm:$0xff]  }
 0x2e0   : > { %5240 = vmatpush3.bf16.msra.mxu1 %v1629_v56  ;;  %v5831_v56 = vld [vmem:[#allocation12 + $0x50] sm:$0xff]  }
 0x2e1   : > { %5265 = vmatprep.subr.bf16.mxu1 %v6390_v2 }
 0x384   : > { %v1482_v58 = vpop.f32.mrf.mxu0 }
 0x385   : > { %v1488_v61 = vmul.f32 0.35355338, %v1482_v58  ;;  %v5832_v58 = vld [vmem:[#allocation12 + $0x48] sm:$0xff]  }
 0x386   : > { %v5225_v63 = vpop.f32.mrf.mxu0 }
 0x387   : > { %v1489_v0 = vsel %vm6755_vm3, %v1488_v61, -1e+30  ;;  %v5833_v61 = vld [vmem:[#allocation12 + $0x40] sm:$0xff]  }
 0x388   : > { %v1485_v4 = vpop.f32.mrf.mxu0  ;;  %v1491_v5 = vsel %vm1490_vm4, %v1489_v0, -inf }
 0x389   : > { %1492 = vmax.xlane.f32.xlu1 %v1491_v5  ;;  %v5818_v5 = vld [vmem:[#allocation12 + $0x38] sm:$0xff]  }
 0x38a   : > { %v5226_v6 = vpop.f32.mrf.mxu0 }
 0x412   : > { %v1493_v7 = vpop.xlane.xlu1 %1492 }
 0x413   : > { %v1494_v11 = vsub.f32 %v1489_v0, %v1493_v7  ;;  %v5819_v7 = vld [vmem:[#allocation12 + $0x30] sm:$0xff]  }
 0x415   : > { %v1495_v12 = vmul.f32 1.442695, %v1494_v11  ;;  %v5820_v11 = vld [vmem:[#allocation12 + $0x28] sm:$0xff]  }
 0x417   : > { %6060 = vpow2.f32 %v1495_v12  ;;  %v5821_v12 = vld [vmem:[#allocation12 + $0x20] sm:$0xff]  }
 0x424   : > { %v6061_v13 = vpop.eup %6060 }
 0x425   : > { %v1497_v1 = vsel %vm1490_vm4, %v6061_v13, 0.0 }
 0x426   : > { %1498 = vadd.xlane.f32.xlu1 %v1497_v1  ;;  %v5823_v1 = vld [vmem:[#allocation12 + $0x10] sm:$0xff]  }
 0x4af   : > { %v1499_v14 = vpop.xlane.xlu1 %1498 }
 0x4b0   : > { %6062 = vrcp.f32 %v1499_v14  ;;  %v5824_v14 = vld [vmem:[#allocation12 + $0x8] sm:$0xff]  }
 0x4bd   : > { %v6063_v19 = vpop.eup %6062 }
 0x4be   : > { %v1501_v23 = vmul.f32 %v6063_v19, %v6061_v13  ;;  %v5822_v13 = vld [vmem:[#allocation12 + $0x18] sm:$0xff]   ;;  %v1921_v19 = vpack.c.bf16 %v6740_v40, %v6740_v40  ;;  %v687_v40 = vrot.slane %v6714_v15, %v686_v24 }
 0x4c0   : > { %v1502_v25 = vpack.c.bf16 %v1501_v23, %v1501_v23  ;;  %v1926_v23 = vsel %vm1507_vm2, %v1921_v19, 0 }
 0x4c2   : > { %5230 = vmatmul.mubr.msk.bf16.vlgmr.msra.gmra.mxu0 %vm1490_vm4, %v1502_v25  ;;  %v1358_v25 = vadd.f32 %v6719_v18, %v687_v40 }
 0x4c3   : > { %5234 = vmatpush3.bf16.xpose.msra.mxu0 %v1569_v26  ;;  %5235 = vmatprep.mubr.msk.bf16.mxu0 %vm6392_vm1, %v6390_v2 }
 0x4c4   : > { %5245 = vmatprep.subr.bf16.mxu0 %v6390_v2 }
 0x4ca   : > { %5236 = vmatmul.mubr.bf16.vlgmr.msra.gmra.mxu0 %v1568_v28 }
 0x4cb   : > { %5261 = vmatprep.mubr.msk.bf16.mxu0 %vm6392_vm1, %v6390_v2  ;;  %5246 = vmatpush3.bf16.msra.mxu0 %v5826_v48 }
 0x4cc   : > { %5247 = vmatprep.subr.bf16.mxu0 %v6390_v2 }
 0x4cf   : > { %5248 = vmatpush3.bf16.msra.mxu0 %v5827_v51 }
 0x4d0   : > { %5249 = vmatprep.subr.bf16.mxu0 %v6390_v2 }
 0x4d3   : > { %5250 = vmatpush3.bf16.msra.mxu0 %v5828_v53 }
 0x4d4   : > { %5251 = vmatprep.subr.bf16.mxu0 %v6390_v2 }
 0x4d7   : > { %5252 = vmatpush3.bf16.msra.mxu0 %v5829_v54 }
 0x4d8   : > { %5253 = vmatprep.subr.bf16.mxu0 %v6390_v2 }
 0x4db   : > { %5254 = vmatpush3.bf16.msra.mxu0 %v5830_v55 }
 0x4dc   : > { %5255 = vmatprep.subr.bf16.mxu0 %v6390_v2 }
 0x4df   : > { %5256 = vmatpush3.bf16.msra.mxu0 %v5831_v56 }
 0x4e0   : > { %5257 = vmatprep.subr.bf16.mxu0 %v6390_v2 }
 0x4e3   : > { %5258 = vmatpush3.bf16.msra.mxu0 %v5832_v58 }
 0x4e4   : > { %5259 = vmatprep.subr.bf16.mxu0 %v6390_v2 }
 0x4e7   : > { %5260 = vmatpush3.bf16.msra.mxu0 %v5833_v61 }
 0x4e8   : > { %5285 = vmatprep.subr.bf16.mxu0 %v6390_v2 }
 0x582   : > { %v6777_v21 = vpop.f32.mrf.mxu0 }
 0x583   : > { %v1551_v20 = vpack.c.bf16 %v6777_v21, %v6777_v21  ;;  %v1866_v21 = vpack.c.bf16 %v1358_v25, %v1358_v25 }
 0x584   : > { %v5231_v29 = vpop.f32.mrf.mxu0 }
 0x586   : > { %v1548_v30 = vpop.f32.mrf.mxu0 }
 0x588   : > { %v5232_v33 = vpop.f32.mrf.mxu0 }
 0x589   : > { %v1276_v33 = vadd.f32 %v6707_v8, %v671_v27 }
 0x58a   : > { %v1604_v34 = vpop.f32.mrf.mxu0 }
 0x58b   : > { %v1610_v35 = vmul.f32 0.35355338, %v1604_v34 }
 0x58c   : > { %v5237_v36 = vpop.f32.mrf.mxu0 }
 0x58d   : > { %v1611_v37 = vsel %vm6755_vm3, %v1610_v35, -1e+30  ;;  %v1865_v35 = vpack.c.bf16 %v1276_v33, %v1276_v33 }
 0x58e   : > { %v1607_v38 = vpop.f32.mrf.mxu0  ;;  %v1612_v9 = vsel %vm1490_vm4, %v1611_v37, -inf }
 0x58f   : > { %1613 = vmax.xlane.f32.xlu0 %v1612_v9 }
 0x590   : > { %v5238_v39 = vpop.f32.mrf.mxu0 }
 0x618   : > { %v1614_v41 = vpop.xlane.xlu0 %1613 }
 0x619   : > { %v1615_v42 = vsub.f32 %v1611_v37, %v1614_v41 }
 0x61b   : > { %v1616_v43 = vmul.f32 1.442695, %v1615_v42 }
 0x61d   : > { %6064 = vpow2.f32 %v1616_v43 }
 0x62a   : > { %v6065_v44 = vpop.eup %6064 }
 0x62b   : > { %v1618_v47 = vsel %vm1490_vm4, %v6065_v44, 0.0 }
 0x62c   : > { %1619 = vadd.xlane.f32.xlu1 %v1618_v47 }
 0x6b5   : > { %v1620_v63 = vpop.xlane.xlu1 %1619 }
 0x6b6   : > { %6066 = vrcp.f32 %v1620_v63  ;;  %v5834_v63 = vld [vmem:[#allocation12 + $0xb8] sm:$0xff]  }
 0x6c3   : > { %v6067_v0 = vpop.eup %6066 }
 0x6c4   : > { %v1622_v4 = vmul.f32 %v6067_v0, %v6065_v44  ;;  %v5835_v0 = vld [vmem:[#allocation12 + $0xb0] sm:$0xff]  }
 0x6c6   : > { %v1623_v6 = vpack.c.bf16 %v1622_v4, %v1622_v4  ;;  %v5836_v4 = vld [vmem:[#allocation12 + $0xa8] sm:$0xff]  }
 0x6c8   : > { %5242 = vmatmul.mubr.msk.bf16.vlgmr.msra.gmra.mxu1 %vm1490_vm4, %v1623_v6  ;;  %v5838_v6 = vld [vmem:[#allocation12 + $0x98] sm:$0xff]  }
 0x6c9   : > { %5266 = vmatpush3.bf16.msra.mxu1 %v5818_v5  ;;  %5281 = vmatprep.mubr.msk.bf16.mxu1 %vm6392_vm1, %v6390_v2  ;;  %v5837_v5 = vld [vmem:[#allocation12 + $0xa0] sm:$0xff]  }
 0x6ca   : > { %5267 = vmatprep.subr.bf16.mxu1 %v6390_v2 }
 0x6cd   : > { %5268 = vmatpush3.bf16.msra.mxu1 %v5819_v7  ;;  %v5839_v7 = vld [vmem:[#allocation12 + $0x90] sm:$0xff]  }
 0x6ce   : > { %5269 = vmatprep.subr.bf16.mxu1 %v6390_v2 }
 0x6d1   : > { %5270 = vmatpush3.bf16.msra.mxu1 %v5820_v11  ;;  %v5840_v11 = vld [vmem:[#allocation12 + $0x88] sm:$0xff]  }
 0x6d2   : > { %5271 = vmatprep.subr.bf16.mxu1 %v6390_v2 }
 0x6d5   : > { %5272 = vmatpush3.bf16.msra.mxu1 %v5821_v12 }
 0x6d6   : > { %5273 = vmatprep.subr.bf16.mxu1 %v6390_v2 }
 0x6d9   : > { %5274 = vmatpush3.bf16.msra.mxu1 %v5822_v13  ;;  %v690_v13 = vsub.s32 7, %v6673_v49 }
 0x6da   : > { %5275 = vmatprep.subr.bf16.mxu1 %v6390_v2 }
 0x6dd   : > { %5276 = vmatpush3.bf16.msra.mxu1 %v5823_v1  ;;  %v691_v1 = vrot.slane %v6714_v15, %v690_v13 }
 0x6de   : > { %5277 = vmatprep.subr.bf16.mxu1 %v6390_v2 }
 0x6e1   : > { %5278 = vmatpush3.bf16.msra.mxu1 %v5824_v14 }
 0x6e2   : > { %5279 = vmatprep.subr.bf16.mxu1 %v6390_v2 }
 0x6e5   : > { %5280 = vmatpush3.bf16.msra.mxu1 %v5825_v17  ;;  %v1360_v17 = vadd.f32 %v6725_v22, %v691_v1 }
 0x6e6   : > { %5291 = vmatprep.subr.bf16.mxu1 %v6390_v2 }
 0x6e7   : > { %v2076_v40 = vpack.c.bf16 %v1360_v17, %v1360_v17 }
 0x6e8   : > { %5282 = vmatmul.mubr.bf16.vlgmr.msra.gmra.mxu1 %v1551_v20  ;;  %v675_v20 = vrot.slane %v6714_v15, %v6734_v32  ;;  %v5841_v15 = vld [vmem:[#allocation12 + $0x80] sm:$0xff]  }
 0x6e9   : > { %5292 = vmatpush3.bf16.msra.mxu1 %v1926_v23  ;;  %5293 = vmatprep.mubr.msk.bf16.mxu1 %vm6392_vm1, %v6390_v2 }
 0x6ea   : > { %5317 = vmatprep.subr.bf16.mxu1 %v6390_v2  ;;  %v1278_v25 = vadd.f32 %v6711_v10, %v675_v20 }
 0x6ec   : > { %v2075_v22 = vpack.c.bf16 %v1278_v25, %v1278_v25 }
 0x788   : > { %v1665_v26 = vpop.f32.mrf.mxu1 }
 0x789   : > { %v1671_v28 = vpack.c.bf16 %v1665_v26, %v1665_v26  ;;  %v2131_v26 = vpack.c.bf16 %v6742_v46, %v6742_v46 }
 0x78a   : > { %v5243_v29 = vpop.f32.mrf.mxu1 }
 0x78b   : > { %5262 = vmatmul.mubr.bf16.vlgmr.msra.gmra.mxu0 %v1671_v28  ;;  %v2136_v27 = vsel %vm1507_vm2, %v2131_v26, 0 }
 0x78c   : > { %5286 = vmatpush3.bf16.xpose.msra.mxu0 %v1866_v21  ;;  %v1668_v30 = vpop.f32.mrf.mxu1  ;;  %5287 = vmatprep.mubr.msk.bf16.mxu0 %vm6392_vm1, %v6390_v2 }
 0x78d   : > { %5297 = vmatprep.subr.bf16.mxu0 %v6390_v2 }
 0x78e   : > { %v5244_v34 = vpop.f32.mrf.mxu1 }
 0x793   : > { %5288 = vmatmul.mubr.bf16.vlgmr.msra.gmra.mxu0 %v1865_v35 }
 0x794   : > { %5313 = vmatprep.mubr.msk.bf16.mxu0 %vm6392_vm1, %v6390_v2  ;;  %5298 = vmatpush3.bf16.msra.mxu0 %v5834_v63 }
 0x795   : > { %5299 = vmatprep.subr.bf16.mxu0 %v6390_v2 }
 0x798   : > { %5300 = vmatpush3.bf16.msra.mxu0 %v5835_v0  ;;  %v5843_v0 = vld [vmem:[#allocation12 + $0xf0] sm:$0xff]  }
 0x799   : > { %5301 = vmatprep.subr.bf16.mxu0 %v6390_v2 }
 0x79c   : > { %5302 = vmatpush3.bf16.msra.mxu0 %v5836_v4  ;;  %v5846_v4 = vld [vmem:[#allocation12 + $0xd8] sm:$0xff]  }
 0x79d   : > { %5303 = vmatprep.subr.bf16.mxu0 %v6390_v2 }
 0x7a0   : > { %5304 = vmatpush3.bf16.msra.mxu0 %v5837_v5  ;;  %v5847_v5 = vld [vmem:[#allocation12 + $0xd0] sm:$0xff]  }
 0x7a1   : > { %5305 = vmatprep.subr.bf16.mxu0 %v6390_v2 }
 0x7a4   : > { %5306 = vmatpush3.bf16.msra.mxu0 %v5838_v6  ;;  %v5848_v6 = vld [vmem:[#allocation12 + $0xc8] sm:$0xff]  }
 0x7a5   : > { %5307 = vmatprep.subr.bf16.mxu0 %v6390_v2 }
 0x7a8   : > { %v6823_v18 = vpop.f32.mrf.mxu1  ;;  %5308 = vmatpush3.bf16.msra.mxu0 %v5839_v7  ;;  %v5849_v7 = vld [vmem:[#allocation12 + $0xc0] sm:$0xff]  }
 0x7a9   : > { %5309 = vmatprep.subr.bf16.mxu0 %v6390_v2 }
 0x7aa   : > { %v5283_v36 = vpop.f32.mrf.mxu1 }
 0x7ac   : > { %v1862_v37 = vpop.f32.mrf.mxu1  ;;  %5310 = vmatpush3.bf16.msra.mxu0 %v5840_v11 }
 0x7ad   : > { %5311 = vmatprep.subr.bf16.mxu0 %v6390_v2 }
 0x7ae   : > { %v5284_v38 = vpop.f32.mrf.mxu1 }
 0x7b0   : > { %5312 = vmatpush3.bf16.msra.mxu0 %v5841_v15 }
 0x7b1   : > { %5349 = vmatprep.subr.bf16.mxu0 %v6390_v2 }
 0x84b   : > { %v6825_v9 = vpop.f32.mrf.mxu0 }
 0x84d   : > { %v5263_v39 = vpop.f32.mrf.mxu0 }
 0x84f   : > { %v1774_v41 = vpop.f32.mrf.mxu0 }
 0x851   : > { %v5264_v42 = vpop.f32.mrf.mxu0 }
 0x853   : > { %v1901_v43 = vpop.f32.mrf.mxu0 }
 0x854   : > { %v1907_v8 = vmul.f32 0.35355338, %v1901_v43 }
 0x855   : > { %v5289_v44 = vpop.f32.mrf.mxu0 }
 0x856   : > { %v1908_v47 = vsel %vm6755_vm3, %v1907_v8, -1e+30  ;;  %v1860_v44 = vadd.f32 %v6823_v18, %v6825_v9  ;;  %v5844_v18 = vld [vmem:[#allocation12 + $0xe8] sm:$0xff]   ;;  %v5845_v9 = vld [vmem:[#allocation12 + $0xe0] sm:$0xff]  }
 0x857   : > { %v1904_v48 = vpop.f32.mrf.mxu0  ;;  %v1909_v51 = vsel %vm1490_vm4, %v1908_v47, -inf }
 0x858   : > { %1910 = vmax.xlane.f32.xlu0 %v1909_v51 }
 0x859   : > { %v5290_v53 = vpop.f32.mrf.mxu0 }
 0x8e1   : > { %v1911_v54 = vpop.xlane.xlu0 %1910 }
 0x8e2   : > { %v1912_v55 = vsub.f32 %v1908_v47, %v1911_v54 }
 0x8e4   : > { %v1913_v56 = vmul.f32 1.442695, %v1912_v55 }
 0x8e6   : > { %6068 = vpow2.f32 %v1913_v56 }
 0x8f3   : > { %v6069_v58 = vpop.eup %6068 }
 0x8f4   : > { %v1915_v61 = vsel %vm1490_vm4, %v6069_v58, 0.0 }
 0x8f5   : > { %1916 = vadd.xlane.f32.xlu1 %v1915_v61  ;;  %v5842_v61 = vld [vmem:[#allocation12 + $0xf8] sm:$0xff]  }
 0x97e   : > { %v1917_v12 = vpop.xlane.xlu1 %1916 }
 0x97f   : > { %6070 = vrcp.f32 %v1917_v12 }
 0x98c   : > { %v6071_v14 = vpop.eup %6070 }
 0x98d   : > { %v1919_v19 = vmul.f32 %v6071_v14, %v6069_v58 }
 0x98f   : > { %v1920_v23 = vpack.c.bf16 %v1919_v19, %v1919_v19 }
 0x991   : > { %5294 = vmatmul.mubr.msk.bf16.vlgmr.msra.gmra.mxu1 %vm1490_vm4, %v1920_v23 }
 0x992   : > { %5318 = vmatpush3.bf16.xpose.msra.mxu1 %v2076_v40  ;;  %5319 = vmatprep.mubr.msk.bf16.mxu1 %vm6392_vm1, %v6390_v2  ;;  %v4902_v40 = vld [vmem:[%s7181_s6] ss:$0 sm:$0xff] }
 0x993   : > { %5323 = vmatprep.subr.bf16.mxu1 %v6390_v2 }
 0x999   : > { %5320 = vmatmul.mubr.bf16.vlgmr.msra.gmra.mxu1 %v2075_v22 }
 0x99a   : > { %5324 = vmatpush3.bf16.msra.mxu1 %v2136_v27  ;;  %5325 = vmatprep.mubr.msk.bf16.mxu1 %vm6392_vm1, %v6390_v2 }
 0x99b   : > { %5329 = vmatprep.subr.bf16.mxu1 %v6390_v2 }
 0xa51   : > { %v1962_v10 = vpop.f32.mrf.mxu1 }
 0xa52   : > { %v1968_v28 = vpack.c.bf16 %v1962_v10, %v1962_v10  ;;  %v5850_v10 = vld [vmem:[#allocation13 + $0x38] sm:$0xff]  }
 0xa53   : > { %v5295_v21 = vpop.f32.mrf.mxu1 }
 0xa54   : > { %5314 = vmatmul.mubr.bf16.vlgmr.msra.gmra.mxu0 %v1968_v28 }
 0xa55   : > { %v1965_v29 = vpop.f32.mrf.mxu1  ;;  %5365 = vmatprep.mubr.msk.bf16.mxu0 %vm6392_vm1, %v6390_v2  ;;  %5350 = vmatpush3.bf16.msra.mxu0 %v5850_v10 }
 0xa56   : > { %5351 = vmatprep.subr.bf16.mxu0 %v6390_v2 }
 0xa57   : > { %v5296_v46 = vpop.f32.mrf.mxu1 }
 0xa59   : > { %v2111_v30 = vpop.f32.mrf.mxu1 }
 0xa5a   : > { %v2117_v33 = vmul.f32 0.35355338, %v2111_v30 }
 0xa5b   : > { %v5321_v34 = vpop.f32.mrf.mxu1 }
 0xa5c   : > { %v2118_v35 = vsel %vm6755_vm3, %v2117_v33, -1e+30  ;;  %v5851_v33 = vld [vmem:[#allocation13 + $0x30] sm:$0xff]   ;;  %v5853_v34 = vld [vmem:[#allocation13 + $0x20] sm:$0xff]  }
 0xa5d   : > { %v2114_v36 = vpop.f32.mrf.mxu1  ;;  %v2119_v37 = vsel %vm1490_vm4, %v2118_v35, -inf  ;;  %5352 = vmatpush3.bf16.msra.mxu0 %v5851_v33 }
 0xa5e   : > { %2120 = vmax.xlane.f32.xlu0 %v2119_v37  ;;  %5353 = vmatprep.subr.bf16.mxu0 %v6390_v2  ;;  %v5855_v36 = vld [vmem:[#allocation13 + $0x10] sm:$0xff]   ;;  %v5856_v37 = vld [vmem:[#allocation13 + $0x8] sm:$0xff]  }
 0xa5f   : > { %v5322_v38 = vpop.f32.mrf.mxu1 }
 0xa60   : > { %v5857_v38 = vld [vmem:[#allocation13] sm:$0xff]  }
 0xae7   : > { %v2121_v39 = vpop.xlane.xlu0 %2120 }
 0xae8   : > { %v2122_v41 = vsub.f32 %v2118_v35, %v2121_v39  ;;  %v5854_v35 = vld [vmem:[#allocation13 + $0x18] sm:$0xff]  }
 0xaea   : > { %v2123_v42 = vmul.f32 1.442695, %v2122_v41 }
 0xaec   : > { %6072 = vpow2.f32 %v2123_v42 }
 0xaf9   : > { %v6073_v43 = vpop.eup %6072 }
 0xafa   : > { %v2125_v8 = vsel %vm1490_vm4, %v6073_v43, 0.0 }
 0xafb   : > { %2126 = vadd.xlane.f32.xlu1 %v2125_v8 }
 0xb14   : > { %v2068_v47 = vpop.f32.mrf.mxu0 }
 0xb15   : > { %v2074_v48 = vadd.f32 %v2068_v47, %v1860_v44 }
 0xb16   : > { %v5315_v51 = vpop.f32.mrf.mxu0 }
 0xb18   : > { %v2071_v53 = vpop.f32.mrf.mxu0 }
 0xb1a   : > { %v5316_v54 = vpop.f32.mrf.mxu0 }
 0xb84   : > { %v2127_v55 = vpop.xlane.xlu1 %2126 }
 0xb85   : > { %6074 = vrcp.f32 %v2127_v55 }
 0xb92   : > { %v6075_v56 = vpop.eup %6074 }
 0xb93   : > { %v2129_v58 = vmul.f32 %v6075_v56, %v6073_v43  ;;  %v2294_v43 = vld [vmem:[%s7182_s7] sm:$0x3]  ;;  %v5858_v56 = vld [vmem:[#allocation15 + $0x38] sm:$0xff]  }
 0xb94   : > { %v2311_v8 = vrot.slane %v2294_v43, %v6676_v50 }
 0xb95   : > { %v2130_v63 = vpack.c.bf16 %v2129_v58, %v2129_v58  ;;  %v5859_v58 = vld [vmem:[#allocation15 + $0x30] sm:$0xff]  }
 0xb97   : > { %5326 = vmatmul.mubr.msk.bf16.vlgmr.msra.gmra.mxu1 %vm1490_vm4, %v2130_v63  ;;  %v5861_v63 = vld [vmem:[#allocation15 + $0x20] sm:$0xff]  }
 0xb98   : > { %5330 = vmatpush3.bf16.msra.mxu1 %v5842_v61  ;;  %5345 = vmatprep.mubr.msk.bf16.mxu1 %vm6392_vm1, %v6390_v2  ;;  %v5860_v61 = vld [vmem:[#allocation15 + $0x28] sm:$0xff]  }
 0xb99   : > { %5331 = vmatprep.subr.bf16.mxu1 %v6390_v2 }
 0xb9c   : > { %5332 = vmatpush3.bf16.msra.mxu1 %v5843_v0  ;;  %v5862_v0 = vld [vmem:[#allocation15 + $0x18] sm:$0xff]  }
 0xb9d   : > { %5333 = vmatprep.subr.bf16.mxu1 %v6390_v2 }
 0xba0   : > { %5334 = vmatpush3.bf16.msra.mxu1 %v5844_v18  ;;  %v5863_v18 = vld [vmem:[#allocation15 + $0x10] sm:$0xff]  }
 0xba1   : > { %5335 = vmatprep.subr.bf16.mxu1 %v6390_v2 }
 0xba4   : > { %5336 = vmatpush3.bf16.msra.mxu1 %v5845_v9  ;;  %v5864_v9 = vld [vmem:[#allocation15 + $0x8] sm:$0xff]  }
 0xba5   : > { %5337 = vmatprep.subr.bf16.mxu1 %v6390_v2 }
 0xba8   : > { %5338 = vmatpush3.bf16.msra.mxu1 %v5846_v4  ;;  %v5865_v4 = vld [vmem:[#allocation15] sm:$0xff]  }
 0xba9   : > { %5339 = vmatprep.subr.bf16.mxu1 %v6390_v2 }
 0xbac   : > { %5340 = vmatpush3.bf16.msra.mxu1 %v5847_v5  ;;  %v4903_v5 = vld [vmem:[%s7184_s9] ss:$0 sm:$0xff] }
 0xbad   : > { %5341 = vmatprep.subr.bf16.mxu1 %v6390_v2 }
 0xbb0   : > { %5342 = vmatpush3.bf16.msra.mxu1 %v5848_v6 }
 0xbb1   : > { %5343 = vmatprep.subr.bf16.mxu1 %v6390_v2 }
 0xbb4   : > { %5344 = vmatpush3.bf16.msra.mxu1 %v5849_v7 }
 0xbb5   : > { %5369 = vmatprep.subr.bf16.mxu1 %v6390_v2 }
 0xc57   : > { %v2172_v11 = vpop.f32.mrf.mxu1 }
 0xc58   : > { %v2178_v12 = vpack.c.bf16 %v2172_v11, %v2172_v11 }
 0xc59   : > { %v5327_v1 = vpop.f32.mrf.mxu1 }
 0xc5a   : > { %5346 = vmatmul.mubr.bf16.vlgmr.msra.gmra.mxu1 %v2178_v12 }
 0xc5b   : > { %v2175_v14 = vpop.f32.mrf.mxu1  ;;  %5385 = vmatprep.mubr.msk.bf16.mxu1 %vm6392_vm1, %v6390_v2  ;;  %5370 = vmatpush3.bf16.msra.mxu1 %v5858_v56  ;;  %v5889_v56 = vld [vmem:[#allocation9 + $0x48c] ss:$48 sps:$4 sm:$0xff]  }
 0xc5c   : > { %5371 = vmatprep.subr.bf16.mxu1 %v6390_v2 }
 0xc5d   : > { %v5328_v17 = vpop.f32.mrf.mxu1 }
 0xc5f   : > { %5372 = vmatpush3.bf16.msra.mxu1 %v5859_v58  ;;  %v5884_v58 = vld [vmem:[#allocation9 + $0x480] ss:$48 sps:$4 sm:$0xff]  }
 0xc60   : > { %5373 = vmatprep.subr.bf16.mxu1 %v6390_v2 }
 0xc63   : > { %5374 = vmatpush3.bf16.msra.mxu1 %v5860_v61  ;;  %v5887_v61 = vld [vmem:[#allocation9 + $0x488] ss:$48 sps:$4 sm:$0xff]  }
 0xc64   : > { %5375 = vmatprep.subr.bf16.mxu1 %v6390_v2 }
 0xc67   : > { %5376 = vmatpush3.bf16.msra.mxu1 %v5861_v63  ;;  %v5892_v63 = vld [vmem:[#allocation9 + $0x424] ss:$48 sps:$4 sm:$0xff]  }
 0xc68   : > { %5377 = vmatprep.subr.bf16.mxu1 %v6390_v2 }
 0xc6b   : > { %5378 = vmatpush3.bf16.msra.mxu1 %v5862_v0  ;;  %v5895_v0 = vld [vmem:[#allocation9 + $0x42c] ss:$48 sps:$4 sm:$0xff]  }
 0xc6c   : > { %5379 = vmatprep.subr.bf16.mxu1 %v6390_v2 }
 0xc6f   : > { %5380 = vmatpush3.bf16.msra.mxu1 %v5863_v18  ;;  %v5890_v18 = vld [vmem:[#allocation9 + $0x420] ss:$48 sps:$4 sm:$0xff]  }
 0xc70   : > { %5381 = vmatprep.subr.bf16.mxu1 %v6390_v2 }
 0xc73   : > { %5382 = vmatpush3.bf16.msra.mxu1 %v5864_v9  ;;  %v5893_v9 = vld [vmem:[#allocation9 + $0x428] ss:$48 sps:$4 sm:$0xff]  }
 0xc74   : > { %5383 = vmatprep.subr.bf16.mxu1 %v6390_v2 }
 0xc77   : > { %5384 = vmatpush3.bf16.msra.mxu1 %v5865_v4  ;;  %v5898_v4 = vld [vmem:[#allocation9 + $0x3c4] ss:$48 sps:$4 sm:$0xff]  }
 0xd1a   : > { %v2278_v19 = vpop.f32.mrf.mxu1 }
 0xd1b   : > { %v2284_v20 = vadd.f32 %v2278_v19, %v2074_v48  ;;  %v2316_v48 = vrot.slane %v2294_v43, %v6679_v52 }
 0xd1c   : > { %v5347_v23 = vpop.f32.mrf.mxu1 }
 0xd1d   : > { %v2285_v25 = vadd.f32 %v2284_v20, %v6685_v59  ;;  %v5852_v59 = vld [vmem:[#allocation13 + $0x28] sm:$0xff]  }
 0xd1e   : > { %v2281_v26 = vpop.f32.mrf.mxu1  ;;  %5354 = vmatpush3.bf16.msra.mxu0 %v5852_v59  ;;  %v5866_v59 = vld [vmem:[#allocation9 + $0x5a0] ss:$48 sps:$4 sm:$0xff]  }
 0xd1f   : > { %v2293_v22 = vadd.f32 %v4902_v40, %v2285_v25  ;;  %5355 = vmatprep.subr.bf16.mxu0 %v6390_v2 }
 0xd20   : > { %v5348_v27 = vpop.f32.mrf.mxu1 }
 0xd21   : > { %v2295_v15 = vmul.f32 %v6662_v3, %v2293_v22 }
 0xd22   : > { %5356 = vmatpush3.bf16.msra.mxu0 %v5853_v34  ;;  %v5868_v34 = vld [vmem:[#allocation9 + $0x5a4] ss:$48 sps:$4 sm:$0xff]  }
 0xd23   : > { %2296 = vadd.xlane.f32.xlu0 %v2295_v15  ;;  %5357 = vmatprep.subr.bf16.mxu0 %v6390_v2  ;;  %v4912_v15 = vld [vmem:[%s7186_s11] ss:$0 sm:$0xff] }
 0xd26   : > { %5358 = vmatpush3.bf16.msra.mxu0 %v5854_v35  ;;  %v5869_v35 = vld [vmem:[#allocation9 + $0x5a8] ss:$48 sps:$4 sm:$0xff]  }
 0xd27   : > { %5359 = vmatprep.subr.bf16.mxu0 %v6390_v2 }
 0xd2a   : > { %5360 = vmatpush3.bf16.msra.mxu0 %v5855_v36  ;;  %v5871_v36 = vld [vmem:[#allocation9 + $0x5ac] ss:$48 sps:$4 sm:$0xff]  }
 0xd2b   : > { %5361 = vmatprep.subr.bf16.mxu0 %v6390_v2  ;;  %3262 = vmatprep.subr.bf16.mxu1 %v5871_v36  ;;  %v5922_v36 = vld [vmem:[#allocation9 + $0x554] ss:$48 sps:$4 sm:$0xff]  }
 0xd2e   : > { %5362 = vmatpush3.bf16.msra.mxu0 %v5856_v37  ;;  %v5874_v37 = vld [vmem:[#allocation9 + $0x544] ss:$48 sps:$4 sm:$0xff]  }
 0xd2f   : > { %5363 = vmatprep.subr.bf16.mxu0 %v6390_v2 }
 0xd32   : > { %5364 = vmatpush3.bf16.msra.mxu0 %v5857_v38  ;;  %v5877_v38 = vld [vmem:[#allocation9 + $0x54c] ss:$48 sps:$4 sm:$0xff]  }
 0xd33   : > { %3221 = vmatprep.subr.bf16.mxu0 %v5868_v34  ;;  %v5917_v34 = vld [vmem:[#allocation9 + $0x5b8] ss:$48 sps:$4 sm:$0xff]  }
 0xdac   : > { %v2297_v28 = vpop.xlane.xlu0 %2296 }
 0xdad   : > { %v2298_v21 = vmul.f32 0.03125, %v2297_v28 }
 0xdaf   : > { %v2299_v29 = vsub.f32 %v2293_v22, %v2298_v21 }
 0xdb1   : > { %v2300_v46 = vmul.f32 %v6662_v3, %v2299_v29 }
 0xdb3   : > { %v2301_v30 = vmul.f32 %v2300_v46, %v2300_v46 }
 0xdb5   : > { %2302 = vadd.xlane.f32.xlu1 %v2301_v30 }
 0xe3e   : > { %v2303_v39 = vpop.xlane.xlu1 %2302 }
 0xe3f   : > { %v2304_v41 = vmul.f32 0.03125, %v2303_v39  ;;  %v5872_v39 = vld [vmem:[#allocation9 + $0x540] ss:$48 sps:$4 sm:$0xff]  }
 0xe41   : > { %v2305_v42 = vadd.f32 1e-12, %v2304_v41  ;;  %v5875_v41 = vld [vmem:[#allocation9 + $0x548] ss:$48 sps:$4 sm:$0xff]  }
 0xe43   : > { %6076 = vrsqrt.f32 %v2305_v42 }
 0xe50   : > { %v6077_v44 = vpop.eup %6076 }
 0xe51   : > { %v2307_v47 = vmul.f32 %v6077_v44, %v2300_v46 }
 0xe53   : > { %v2312_v51 = vmul.f32 %v2311_v8, %v2307_v47 }
 0xe55   : > { %v2317_v53 = vadd.f32 %v2316_v48, %v2312_v51  ;;  %v5880_v48 = vld [vmem:[#allocation9 + $0x4e4] ss:$48 sps:$4 sm:$0xff]   ;;  %v5883_v51 = vld [vmem:[#allocation9 + $0x4ec] ss:$48 sps:$4 sm:$0xff]  }
 0xe57   : > { %v2318_v54 = vmul.f32 %v6662_v3, %v2317_v53  ;;  %v5878_v53 = vld [vmem:[#allocation9 + $0x4e0] ss:$48 sps:$4 sm:$0xff]  }
 0xe59   : > { %v2336_v55 = vpack.c.bf16 %v2318_v54, %v2318_v54 }
 0xe5b   : > { %5366 = vmatmul.mubr.bf16.vlgmr.msra.gmra.mxu0 %v2336_v55  ;;  %v5886_v55 = vld [vmem:[#allocation9 + $0x484] ss:$48 sps:$4 sm:$0xff]  }
 0xe5c   : > { %3253 = vmatprep.mubr.bf16.mxu0 %v6391_v45  ;;  %3222 = vmatpush1.bf16.msra.mxu0 %v5866_v59  ;;  %v5914_v59 = vld [vmem:[#allocation9 + $0x5b0] ss:$48 sps:$4 sm:$0xff]  }
 0xe5d   : > { %3223 = vmatprep.subr.bf16.mxu0 %v5874_v37  ;;  %v5925_v37 = vld [vmem:[#allocation9 + $0x55c] ss:$48 sps:$4 sm:$0xff]  }
 0xe60   : > { %3224 = vmatpush1.bf16.msra.mxu0 %v5872_v39  ;;  %v5923_v39 = vld [vmem:[#allocation9 + $0x558] ss:$48 sps:$4 sm:$0xff]  }
 0xe61   : > { %3225 = vmatprep.subr.bf16.mxu0 %v5880_v48  ;;  %v5932_v48 = vld [vmem:[#allocation9 + $0x490] ss:$48 sps:$4 sm:$0xff]  }
 0xe64   : > { %3226 = vmatpush1.bf16.msra.mxu0 %v5878_v53  ;;  %v5940_v53 = vld [vmem:[#allocation9 + $0x434] ss:$48 sps:$4 sm:$0xff]  }
 0xe65   : > { %3227 = vmatprep.subr.bf16.mxu0 %v5886_v55  ;;  %v5938_v55 = vld [vmem:[#allocation9 + $0x430] ss:$48 sps:$4 sm:$0xff]  }
 0xe68   : > { %3228 = vmatpush1.bf16.msra.mxu0 %v5884_v58  ;;  %v5946_v58 = vld [vmem:[#allocation9 + $0x3d4] ss:$48 sps:$4 sm:$0xff]  }
 0xe69   : > { %3229 = vmatprep.subr.bf16.mxu0 %v5892_v63  ;;  %v5944_v63 = vld [vmem:[#allocation9 + $0x3d0] ss:$48 sps:$4 sm:$0xff]  }
 0xe6c   : > { %3230 = vmatpush1.bf16.msra.mxu0 %v5890_v18  ;;  %v5952_v18 = vld [vmem:[#allocation9 + $0x374] ss:$48 sps:$4 sm:$0xff]  }
 0xe6d   : > { %3231 = vmatprep.subr.bf16.mxu0 %v5898_v4  ;;  %v5950_v4 = vld [vmem:[#allocation9 + $0x370] ss:$48 sps:$4 sm:$0xff]  }
 0xf1b   : > { %v2425_v6 = vpop.f32.mrf.mxu0 }
 0xf1c   : > { %v2426_v7 = vadd.f32 %v4903_v5, %v2425_v6  ;;  %v5901_v5 = vld [vmem:[#allocation9 + $0x3cc] ss:$48 sps:$4 sm:$0xff]   ;;  %v5896_v6 = vld [vmem:[#allocation9 + $0x3c0] ss:$48 sps:$4 sm:$0xff]  }
 0xf1d   : > { %v5367_v11 = vpop.f32.mrf.mxu0  ;;  %3232 = vmatpush1.bf16.msra.mxu0 %v5896_v6  ;;  %v5958_v6 = vld [vmem:[#allocation9 + $0x314] ss:$48 sps:$4 sm:$0xff]  }
 0xf1e   : > { %v2431_v12 = vmul.f32 %v2426_v7, %v2426_v7  ;;  %v5904_v11 = vld [vmem:[#allocation9 + $0x364] ss:$48 sps:$4 sm:$0xff]  }
 0xf1f   : > { %v2428_v1 = vpop.f32.mrf.mxu0  ;;  %3233 = vmatprep.subr.bf16.mxu0 %v5904_v11  ;;  %v5956_v11 = vld [vmem:[#allocation9 + $0x310] ss:$48 sps:$4 sm:$0xff]  }
 0xf20   : > { %v2432_v14 = vmul.f32 %v2431_v12, %v2426_v7  ;;  %v5907_v12 = vld [vmem:[#allocation9 + $0x36c] ss:$48 sps:$4 sm:$0xff]   ;;  %v5902_v1 = vld [vmem:[#allocation9 + $0x360] ss:$48 sps:$4 sm:$0xff]  }
 0xf21   : > { %v5368_v17 = vpop.f32.mrf.mxu0  ;;  %3234 = vmatpush1.bf16.msra.mxu0 %v5902_v1  ;;  %v5964_v1 = vld [vmem:[#allocation9 + $0x5c4] ss:$48 sps:$4 sm:$0xff]  }
 0xf22   : > { %v2433_v19 = vmul.f32 0.044715, %v2432_v14  ;;  %v5905_v14 = vld [vmem:[#allocation9 + $0x368] ss:$48 sps:$4 sm:$0xff]   ;;  %v5908_v17 = vld [vmem:[#allocation9 + $0x300] ss:$48 sps:$4 sm:$0xff]  }
 0xf24   : > { %v2434_v20 = vadd.f32 %v2433_v19, %v2426_v7  ;;  %v5910_v19 = vld [vmem:[#allocation9 + $0x304] ss:$48 sps:$4 sm:$0xff]  }
 0xf25   : > { %3235 = vmatprep.subr.bf16.mxu0 %v5910_v19  ;;  %v5965_v19 = vld [vmem:[#allocation9 + $0x5c8] ss:$48 sps:$4 sm:$0xff]  }
 0xf26   : > { %v2435_v23 = vmul.f32 0.7978846, %v2434_v20  ;;  %v5911_v20 = vld [vmem:[#allocation9 + $0x308] ss:$48 sps:$4 sm:$0xff]   ;;  %3236 = vmatpush1.bf16.msra.mxu0 %v5908_v17  ;;  %v5962_v17 = vld [vmem:[#allocation9 + $0x5c0] ss:$48 sps:$4 sm:$0xff]  }
 0xf28   : > { %6078 = vtanh.f32 %v2435_v23  ;;  %v5913_v23 = vld [vmem:[#allocation9 + $0x30c] ss:$48 sps:$4 sm:$0xff]  }
 0xf35   : > { %v6079_v40 = vpop.eup %6078 }
 0xf36   : > { %v2437_v25 = vadd.f32 1.0, %v6079_v40  ;;  %v5916_v40 = vld [vmem:[#allocation9 + $0x5b4] ss:$48 sps:$4 sm:$0xff]  }
 0xf37   : > { %3303 = vmatprep.subr.bf16.mxu0 %v5916_v40  ;;  %v5968_v40 = vld [vmem:[#allocation9 + $0x560] ss:$48 sps:$4 sm:$0xff]  }
 0xf38   : > { %v2438_v26 = vmul.f32 0.5, %v2437_v25  ;;  %v5919_v25 = vld [vmem:[#allocation9 + $0x5bc] ss:$48 sps:$4 sm:$0xff]  }
 0xf3a   : > { %v2439_v22 = vmul.f32 %v2438_v26, %v2426_v7  ;;  %v5899_v7 = vld [vmem:[#allocation9 + $0x3c8] ss:$48 sps:$4 sm:$0xff]  }
 0xf3c   : > { %v2457_v27 = vpack.c.bf16 %v2439_v22, %v2439_v22 }
 0xf3e   : > { %5386 = vmatmul.mubr.bf16.vlgmr.msra.gmra.mxu1 %v2457_v27 }
 0xf3f   : > { %3294 = vmatprep.mubr.bf16.mxu1 %v6391_v45  ;;  %3263 = vmatpush1.bf16.msra.mxu1 %v5869_v35 }
 0xf40   : > { %3264 = vmatprep.subr.bf16.mxu1 %v5877_v38  ;;  %v5920_v38 = vld [vmem:[#allocation9 + $0x550] ss:$48 sps:$4 sm:$0xff]  }
 0xf43   : > { %3265 = vmatpush1.bf16.msra.mxu1 %v5875_v41  ;;  %v5928_v41 = vld [vmem:[#allocation9 + $0x4f4] ss:$48 sps:$4 sm:$0xff]  }
 0xf44   : > { %3266 = vmatprep.subr.bf16.mxu1 %v5883_v51  ;;  %v5935_v51 = vld [vmem:[#allocation9 + $0x498] ss:$48 sps:$4 sm:$0xff]  }
 0xffe   : > { %v2546_v10 = vpop.f32.mrf.mxu1 }
 0xfff   : > { %v2547_v28 = vadd.f32 %v4912_v15, %v2546_v10  ;;  %v2553_v15 = vld [vmem:[%s7187_s12] sm:$0x3] }
0x1000   : > { %v5387_v21 = vpop.f32.mrf.mxu1  ;;  %v2570_v10 = vrot.slane %v2553_v15, %v6676_v50 }
0x1001   : > { %v2552_v29 = vadd.f32 %v2547_v28, %v2318_v54  ;;  %v5881_v54 = vld [vmem:[#allocation9 + $0x4e8] ss:$48 sps:$4 sm:$0xff]   ;;  %v2575_v21 = vrot.slane %v2553_v15, %v6679_v52 }
0x1002   : > { %v2549_v46 = vpop.f32.mrf.mxu1  ;;  %3267 = vmatpush1.bf16.msra.mxu1 %v5881_v54  ;;  %v5943_v54 = vld [vmem:[#allocation9 + $0x43c] ss:$48 sps:$4 sm:$0xff]   ;;  %v5977_v15 = vld [vmem:[#allocation9 + $0x508] ss:$48 sps:$4 sm:$0xff]  }
0x1003   : > { %v2554_v30 = vmul.f32 %v6662_v3, %v2552_v29  ;;  %3268 = vmatprep.subr.bf16.mxu1 %v5889_v56  ;;  %v5941_v56 = vld [vmem:[#allocation9 + $0x438] ss:$48 sps:$4 sm:$0xff]  }
0x1004   : > { %v5388_v33 = vpop.f32.mrf.mxu1 }
0x1005   : > { %2555 = vadd.xlane.f32.xlu0 %v2554_v30 }
0x1006   : > { %3269 = vmatpush1.bf16.msra.mxu1 %v5887_v61  ;;  %v5949_v61 = vld [vmem:[#allocation9 + $0x3dc] ss:$48 sps:$4 sm:$0xff]  }
0x1007   : > { %3270 = vmatprep.subr.bf16.mxu1 %v5895_v0  ;;  %v5947_v0 = vld [vmem:[#allocation9 + $0x3d8] ss:$48 sps:$4 sm:$0xff]  }
0x100a   : > { %3271 = vmatpush1.bf16.msra.mxu1 %v5893_v9  ;;  %v5955_v9 = vld [vmem:[#allocation9 + $0x37c] ss:$48 sps:$4 sm:$0xff]  }
0x100b   : > { %3272 = vmatprep.subr.bf16.mxu1 %v5901_v5  ;;  %v5953_v5 = vld [vmem:[#allocation9 + $0x378] ss:$48 sps:$4 sm:$0xff]  }
0x100e   : > { %3273 = vmatpush1.bf16.msra.mxu1 %v5899_v7  ;;  %v5961_v7 = vld [vmem:[#allocation9 + $0x31c] ss:$48 sps:$4 sm:$0xff]  }
0x100f   : > { %3274 = vmatprep.subr.bf16.mxu1 %v5907_v12  ;;  %v5959_v12 = vld [vmem:[#allocation9 + $0x318] ss:$48 sps:$4 sm:$0xff]  }
0x1012   : > { %3275 = vmatpush1.bf16.msra.mxu1 %v5905_v14  ;;  %v5967_v14 = vld [vmem:[#allocation9 + $0x5cc] ss:$48 sps:$4 sm:$0xff]  }
0x1013   : > { %3276 = vmatprep.subr.bf16.mxu1 %v5913_v23  ;;  %v5973_v23 = vld [vmem:[#allocation9 + $0x56c] ss:$48 sps:$4 sm:$0xff]  }
0x1016   : > { %3277 = vmatpush1.bf16.msra.mxu1 %v5911_v20  ;;  %v5970_v20 = vld [vmem:[#allocation9 + $0x564] ss:$48 sps:$4 sm:$0xff]  }
0x1017   : > { %3344 = vmatprep.subr.bf16.mxu1 %v5919_v25  ;;  %v5971_v25 = vld [vmem:[#allocation9 + $0x568] ss:$48 sps:$4 sm:$0xff]  }
0x108e   : > { %v2556_v42 = vpop.xlane.xlu0 %2555 }
0x108f   : > { %v2557_v43 = vmul.f32 0.03125, %v2556_v42  ;;  %v5931_v42 = vld [vmem:[#allocation9 + $0x4fc] ss:$48 sps:$4 sm:$0xff]  }
0x1091   : > { %v2558_v8 = vsub.f32 %v2552_v29, %v2557_v43  ;;  %v5926_v43 = vld [vmem:[#allocation9 + $0x4f0] ss:$48 sps:$4 sm:$0xff]  }
0x1093   : > { %v6914_v44 = vmul.f32 %v6662_v3, %v2558_v8  ;;  %v5929_v8 = vld [vmem:[#allocation9 + $0x4f8] ss:$48 sps:$4 sm:$0xff]  }
0x1095   : > { %v2560_v47 = vmul.f32 %v6914_v44, %v6914_v44 }
0x1097   : > { %2561 = vadd.xlane.f32.xlu1 %v2560_v47  ;;  %v5937_v47 = vld [vmem:[#allocation9 + $0x49c] ss:$48 sps:$4 sm:$0xff]  }
0x1120   : > { %v2562_v26 = vpop.xlane.xlu1 %2561 }
0x1121   : > { %v2563_v22 = vmul.f32 0.03125, %v2562_v26  ;;  %v5976_v26 = vld [vmem:[#allocation9 + $0x504] ss:$48 sps:$4 sm:$0xff]  }
0x1123   : > { %v2564_v27 = vadd.f32 1e-12, %v2563_v22  ;;  %v5979_v22 = vld [vmem:[#allocation9 + $0x50c] ss:$48 sps:$4 sm:$0xff]  }
0x1125   : > { %6080 = vrsqrt.f32 %v2564_v27  ;;  %v5974_v27 = vld [vmem:[#allocation9 + $0x500] ss:$48 sps:$4 sm:$0xff]  }
0x1132   : > { %v6081_v28 = vpop.eup %6080 }
0x1133   : > { %v2566_v29 = vmul.f32 %v6081_v28, %v6914_v44  ;;  %v5934_v44 = vld [vmem:[#allocation9 + $0x494] ss:$48 sps:$4 sm:$0xff]   ;;  %v5985_v28 = vld [vmem:[#allocation9 + $0x4ac] ss:$48 sps:$4 sm:$0xff]  }
0x1135   : > { %v2571_v46 = vmul.f32 %v2570_v10, %v2566_v29  ;;  %v5982_v10 = vld [vmem:[#allocation9 + $0x4a4] ss:$48 sps:$4 sm:$0xff]   ;;  %v5983_v29 = vld [vmem:[#allocation9 + $0x4a8] ss:$48 sps:$4 sm:$0xff]  }
0x1137   : > { %v2576_v30 = vadd.f32 %v2575_v21, %v2571_v46  ;;  %v5980_v21 = vld [vmem:[#allocation9 + $0x4a0] ss:$48 sps:$4 sm:$0xff]   ;;  %v5988_v46 = vld [vmem:[#allocation9 + $0x444] ss:$48 sps:$4 sm:$0xff]  }
0x1139   : > { %v6925_v33 = vmul.f32 %v6662_v3, %v2576_v30  ;;  %v5991_v30 = vld [vmem:[#allocation9 + $0x44c] ss:$48 sps:$4 sm:$0xff]  }
0x113b   : > { %v6929_v35 = vpack.c.bf16 %v6925_v33, %v6925_v33 }
0x113d   : > { %3254 = vmatmul.mubr.bf16.vlgmr.msra.gmra.mxu0 %v6929_v35  ;;  %3295 = vmatmul.mubr.bf16.vlgmr.msra.gmra.mxu1 %v6929_v35 }
0x113e   : > { %3304 = vmatpush1.bf16.msra.mxu0 %v5914_v59  ;;  %3345 = vmatpush1.bf16.msra.mxu1 %v5917_v34  ;;  %v5986_v59 = vld [vmem:[#allocation9 + $0x440] ss:$48 sps:$4 sm:$0xff]   ;;  %v5994_v34 = vld [vmem:[#allocation9 + $0x3e4] ss:$48 sps:$4 sm:$0xff]  }
0x113f   : > { %3305 = vmatprep.subr.bf16.mxu0 %v5922_v36  ;;  %3346 = vmatprep.subr.bf16.mxu1 %v5925_v37  ;;  %v5997_v36 = vld [vmem:[#allocation9 + $0x3ec] ss:$48 sps:$4 sm:$0xff]   ;;  %v5992_v37 = vld [vmem:[#allocation9 + $0x3e0] ss:$48 sps:$4 sm:$0xff]  }
0x1140   : > { %3335 = vmatprep.mubr.bf16.mxu0 %v6391_v45  ;;  %3376 = vmatprep.mubr.bf16.mxu1 %v6391_v45 }
0x1142   : > { %3306 = vmatpush1.bf16.msra.mxu0 %v5920_v38  ;;  %3347 = vmatpush1.bf16.msra.mxu1 %v5923_v39  ;;  %v5995_v38 = vld [vmem:[#allocation9 + $0x3e8] ss:$48 sps:$4 sm:$0xff]   ;;  %v6000_v39 = vld [vmem:[#allocation9 + $0x384] ss:$48 sps:$4 sm:$0xff]  }
0x1143   : > { %3307 = vmatprep.subr.bf16.mxu0 %v5928_v41  ;;  %3348 = vmatprep.subr.bf16.mxu1 %v5931_v42  ;;  %v6003_v41 = vld [vmem:[#allocation9 + $0x38c] ss:$48 sps:$4 sm:$0xff]   ;;  %v5998_v42 = vld [vmem:[#allocation9 + $0x380] ss:$48 sps:$4 sm:$0xff]  }
0x1146   : > { %3308 = vmatpush1.bf16.msra.mxu0 %v5926_v43  ;;  %3349 = vmatpush1.bf16.msra.mxu1 %v5929_v8  ;;  %v6001_v43 = vld [vmem:[#allocation9 + $0x388] ss:$48 sps:$4 sm:$0xff]   ;;  %v6006_v8 = vld [vmem:[#allocation9 + $0x324] ss:$48 sps:$4 sm:$0xff]  }
0x1147   : > { %3309 = vmatprep.subr.bf16.mxu0 %v5934_v44  ;;  %3350 = vmatprep.subr.bf16.mxu1 %v5937_v47  ;;  %v6009_v44 = vld [vmem:[#allocation9 + $0x32c] ss:$48 sps:$4 sm:$0xff]   ;;  %v6004_v47 = vld [vmem:[#allocation9 + $0x320] ss:$48 sps:$4 sm:$0xff]  }
0x114a   : > { %3310 = vmatpush1.bf16.msra.mxu0 %v5932_v48  ;;  %3351 = vmatpush1.bf16.msra.mxu1 %v5935_v51  ;;  %v6007_v48 = vld [vmem:[#allocation9 + $0x328] ss:$48 sps:$4 sm:$0xff]  }
0x114b   : > { %3311 = vmatprep.subr.bf16.mxu0 %v5940_v53  ;;  %3352 = vmatprep.subr.bf16.mxu1 %v5943_v54 }
0x114e   : > { %3312 = vmatpush1.bf16.msra.mxu0 %v5938_v55  ;;  %3353 = vmatpush1.bf16.msra.mxu1 %v5941_v56 }
0x114f   : > { %3313 = vmatprep.subr.bf16.mxu0 %v5946_v58  ;;  %3354 = vmatprep.subr.bf16.mxu1 %v5949_v61 }
0x1152   : > { %3314 = vmatpush1.bf16.msra.mxu0 %v5944_v63  ;;  %3355 = vmatpush1.bf16.msra.mxu1 %v5947_v0  ;;  %v6953_v0 = vld [vmem:[#allocation10 + $0xc] sm:$0xff] }
0x1153   : > { %3315 = vmatprep.subr.bf16.mxu0 %v5952_v18  ;;  %3356 = vmatprep.subr.bf16.mxu1 %v5955_v9 }
0x1156   : > { %3316 = vmatpush1.bf16.msra.mxu0 %v5950_v4  ;;  %3357 = vmatpush1.bf16.msra.mxu1 %v5953_v5  ;;  %v2684_v5 = vrot.slane %v6953_v0, %v6676_v50 }
0x1157   : > { %3317 = vmatprep.subr.bf16.mxu0 %v5958_v6  ;;  %3358 = vmatprep.subr.bf16.mxu1 %v5961_v7 }
0x115a   : > { %3318 = vmatpush1.bf16.msra.mxu0 %v5956_v11  ;;  %3359 = vmatpush1.bf16.msra.mxu1 %v5959_v12 }
0x115b   : > { %3385 = vmatprep.subr.bf16.mxu0 %v5964_v1  ;;  %3426 = vmatprep.subr.bf16.mxu1 %v5967_v14 }
0x115d   : > { %3336 = vmatmul.mubr.bf16.vlgmr.msra.gmra.mxu0 %v6929_v35  ;;  %3377 = vmatmul.mubr.bf16.vlgmr.msra.gmra.mxu1 %v6929_v35 }
0x115e   : > { %3386 = vmatpush1.bf16.msra.mxu0 %v5962_v17  ;;  %3427 = vmatpush1.bf16.msra.mxu1 %v5965_v19 }
0x115f   : > { %3387 = vmatprep.subr.bf16.mxu0 %v5970_v20  ;;  %3428 = vmatprep.subr.bf16.mxu1 %v5973_v23  ;;  %v2677_v20 = vld [vmem:[#allocation10 + $0x14] sm:$0xf] }
0x1160   : > { %3417 = vmatprep.mubr.bf16.mxu0 %v6391_v45  ;;  %3458 = vmatprep.mubr.bf16.mxu1 %v6391_v45  ;;  %v5989_v45 = vld [vmem:[#allocation9 + $0x448] ss:$48 sps:$4 sm:$0xff]   ;;  %v2716_v23 = vrot.slane %v2677_v20, %v6676_v50 }
0x1162   : > { %3388 = vmatpush1.bf16.msra.mxu0 %v5968_v40  ;;  %3429 = vmatpush1.bf16.msra.mxu1 %v5971_v25  ;;  %v2724_v40 = vrot.slane %v2677_v20, %v6731_v31  ;;  %v2720_v25 = vrot.slane %v2677_v20, %v6679_v52 }
0x1163   : > { %3389 = vmatprep.subr.bf16.mxu0 %v5976_v26  ;;  %3430 = vmatprep.subr.bf16.mxu1 %v5979_v22  ;;  %v2728_v26 = vrot.slane %v2677_v20, %v6734_v32 }
0x1166   : > { %3390 = vmatpush1.bf16.msra.mxu0 %v5974_v27  ;;  %3431 = vmatpush1.bf16.msra.mxu1 %v5977_v15 }
0x1167   : > { %3391 = vmatprep.subr.bf16.mxu0 %v5982_v10  ;;  %3432 = vmatprep.subr.bf16.mxu1 %v5985_v28 }
0x116a   : > { %3392 = vmatpush1.bf16.msra.mxu0 %v5980_v21  ;;  %3433 = vmatpush1.bf16.msra.mxu1 %v5983_v29 }
0x116b   : > { %3393 = vmatprep.subr.bf16.mxu0 %v5988_v46  ;;  %3434 = vmatprep.subr.bf16.mxu1 %v5991_v30 }
0x116e   : > { %3394 = vmatpush1.bf16.msra.mxu0 %v5986_v59  ;;  %3435 = vmatpush1.bf16.msra.mxu1 %v5989_v45 }
0x116f   : > { %3395 = vmatprep.subr.bf16.mxu0 %v5994_v34  ;;  %3436 = vmatprep.subr.bf16.mxu1 %v5997_v36 }
0x1172   : > { %3396 = vmatpush1.bf16.msra.mxu0 %v5992_v37  ;;  %3437 = vmatpush1.bf16.msra.mxu1 %v5995_v38 }
0x1173   : > { %3397 = vmatprep.subr.bf16.mxu0 %v6000_v39  ;;  %3438 = vmatprep.subr.bf16.mxu1 %v6003_v41 }
0x1176   : > { %3398 = vmatpush1.bf16.msra.mxu0 %v5998_v42  ;;  %3439 = vmatpush1.bf16.msra.mxu1 %v6001_v43 }
0x1177   : > { %3399 = vmatprep.subr.bf16.mxu0 %v6006_v8  ;;  %3440 = vmatprep.subr.bf16.mxu1 %v6009_v44 }
0x117a   : > { %3400 = vmatpush1.bf16.msra.mxu0 %v6004_v47  ;;  %3441 = vmatpush1.bf16.msra.mxu1 %v6007_v48 }
0x117b   : > { %5389 = vmatprep.subr.bf16.mxu0 %v6390_v2  ;;  %5407 = vmatprep.subr.bf16.mxu1 %v6390_v2 }
0x117d   : > { %3418 = vmatmul.mubr.bf16.vlgmr.msra.gmra.mxu0 %v6929_v35  ;;  %3459 = vmatmul.mubr.bf16.vlgmr.msra.gmra.mxu1 %v6929_v35  ;;  %v2700_v35 = vrot.slane %v6953_v0, %v678_v62 }
0x117e   : > { %5391 = vmatprep.mubr.msk.bf16.mxu0 %vm6392_vm1, %v6390_v2  ;;  %5409 = vmatprep.mubr.msk.bf16.mxu1 %vm6392_vm1, %v6390_v2 }
0x11fd   : > { %v3255_v51 = vpop.f32.mrf.mxu0  ;;  %v6947_v53 = vpop.f32.mrf.mxu1 }
0x11fe   : > { %v3256_v14 = vadd.f32 %v3255_v51, %v2684_v5 }
0x11ff   : > { %v6949_v54 = vpop.f32.mrf.mxu0  ;;  %v6951_v55 = vpop.f32.mrf.mxu1 }
0x1200   : > { %v3467_v62 = vpack.c.bf16 %v3256_v14, %v3256_v14 }
0x1201   : > { %v3259_v56 = vpop.f32.mrf.mxu0  ;;  %v3300_v58 = vpop.f32.mrf.mxu1 }
0x1203   : > { %v3260_v61 = vpop.f32.mrf.mxu0  ;;  %v3301_v63 = vpop.f32.mrf.mxu1 }
0x121d   : > { %v3337_v18 = vpop.f32.mrf.mxu0  ;;  %v6958_v9 = vpop.f32.mrf.mxu1 }
0x121e   : > { %v3338_v4 = vadd.f32 %v3337_v18, %v2700_v35  ;;  %v2704_v18 = vrot.slane %v6953_v0, %v682_v16 }
0x121f   : > { %v3339_v6 = vpop.f32.mrf.mxu0  ;;  %v6962_v7 = vpop.f32.mrf.mxu1 }
0x1220   : > { %v3468_v11 = vpack.c.bf16 %v3338_v4, %v3338_v4  ;;  %v3340_v5 = vadd.f32 %v3339_v6, %v2704_v18 }
0x1221   : > { %v3341_v12 = vpop.f32.mrf.mxu0  ;;  %v3382_v1 = vpop.f32.mrf.mxu1 }
0x1222   : > { %5390 = vmatpush3.bf16.xpose.msra.mxu0 %v3468_v11  ;;  %v2688_v12 = vrot.slane %v6953_v0, %v6679_v52  ;;  %v3589_v14 = vpack.c.bf16 %v3340_v5, %v3340_v5 }
0x1223   : > { %v3342_v17 = vpop.f32.mrf.mxu0  ;;  %v3383_v19 = vpop.f32.mrf.mxu1  ;;  %5395 = vmatprep.subr.bf16.mxu0 %v6390_v2 }
0x1224   : > { %v3258_v17 = vadd.f32 %v6949_v54, %v2688_v12 }
0x1226   : > { %v3588_v19 = vpack.c.bf16 %v3258_v17, %v3258_v17 }
0x1229   : > { %5392 = vmatmul.mubr.bf16.vlgmr.msra.gmra.mxu0 %v3467_v62 }
0x122a   : > { %5397 = vmatprep.mubr.msk.bf16.mxu0 %vm6392_vm1, %v6390_v2 }
0x123d   : > { %v3419_v22 = vpop.f32.mrf.mxu0  ;;  %v3460_v27 = vpop.f32.mrf.mxu1 }
0x123e   : > { %v3420_v15 = vadd.f32 %v3419_v22, %v2716_v23  ;;  %v6971_v10 = vadd.f32 %v3460_v27, %v2724_v40 }
0x123f   : > { %v3421_v28 = vpop.f32.mrf.mxu0  ;;  %v3462_v21 = vpop.f32.mrf.mxu1 }
0x1240   : > { %v3523_v29 = vpack.c.bf16 %v3420_v15, %v3420_v15  ;;  %v3422_v46 = vadd.f32 %v3421_v28, %v2720_v25  ;;  %v6973_v30 = vadd.f32 %v3462_v21, %v2728_v26  ;;  %v3941_v18 = vpack.c.bf16 %v6971_v10, %v6971_v10 }
0x1241   : > { %v3423_v59 = vpop.f32.mrf.mxu0  ;;  %v3464_v45 = vpop.f32.mrf.mxu1 }
0x1242   : > { %v3528_v34 = vsel %vm1507_vm2, %v3523_v29, 0  ;;  %v3644_v36 = vpack.c.bf16 %v3422_v46, %v3422_v46  ;;  %v6018_v59 = vld [vmem:[#allocation12 + $0x178] sm:$0xff]   ;;  %v6019_v45 = vld [vmem:[#allocation12 + $0x170] sm:$0xff]   ;;  %v3946_v5 = vsel %vm1507_vm2, %v3941_v18, 0 }
0x1243   : > { %v3424_v37 = vpop.f32.mrf.mxu0  ;;  %v3465_v38 = vpop.f32.mrf.mxu1  ;;  %5396 = vmatpush3.bf16.msra.mxu0 %v3528_v34  ;;  %v6020_v34 = vld [vmem:[#allocation12 + $0x168] sm:$0xff]  }
0x1244   : > { %v3649_v39 = vsel %vm1507_vm2, %v3644_v36, 0  ;;  %5401 = vmatprep.subr.bf16.mxu0 %v6390_v2  ;;  %v6021_v36 = vld [vmem:[#allocation12 + $0x160] sm:$0xff]   ;;  %v6022_v37 = vld [vmem:[#allocation12 + $0x158] sm:$0xff]   ;;  %v6023_v38 = vld [vmem:[#allocation12 + $0x150] sm:$0xff]  }
0x1245   : > { %5408 = vmatpush3.bf16.msra.mxu1 %v3649_v39  ;;  %v6024_v39 = vld [vmem:[#allocation12 + $0x148] sm:$0xff]  }
0x1246   : > { %5433 = vmatprep.subr.bf16.mxu1 %v6390_v2 }
0x12e9   : > { %v3503_v41 = vpop.f32.mrf.mxu0 }
0x12ea   : > { %v3509_v42 = vmul.f32 0.35355338, %v3503_v41  ;;  %v6025_v41 = vld [vmem:[#allocation12 + $0x140] sm:$0xff]  }
0x12eb   : > { %v5393_v43 = vpop.f32.mrf.mxu0 }
0x12ec   : > { %v3510_v8 = vsel %vm6755_vm3, %v3509_v42, -1e+30 }
0x12ed   : > { %v3506_v44 = vpop.f32.mrf.mxu0  ;;  %v3511_v47 = vsel %vm1490_vm4, %v3510_v8, -inf }
0x12ee   : > { %3512 = vmax.xlane.f32.xlu0 %v3511_v47  ;;  %v6010_v44 = vld [vmem:[#allocation12 + $0x138] sm:$0xff]  }
0x12ef   : > { %v5394_v48 = vpop.f32.mrf.mxu0 }
0x12f0   : > { %v6011_v48 = vld [vmem:[#allocation12 + $0x130] sm:$0xff]  }
0x1377   : > { %v3513_v51 = vpop.xlane.xlu0 %3512 }
0x1378   : > { %v3514_v56 = vsub.f32 %v3510_v8, %v3513_v51  ;;  %v6012_v51 = vld [vmem:[#allocation12 + $0x128] sm:$0xff]  }
0x137a   : > { %v3515_v58 = vmul.f32 1.442695, %v3514_v56  ;;  %v6013_v56 = vld [vmem:[#allocation12 + $0x120] sm:$0xff]  }
0x137c   : > { %6082 = vpow2.f32 %v3515_v58  ;;  %v6014_v58 = vld [vmem:[#allocation12 + $0x118] sm:$0xff]  }
0x1389   : > { %v6083_v61 = vpop.eup %6082 }
0x138a   : > { %v3517_v63 = vsel %vm1490_vm4, %v6083_v61, 0.0 }
0x138b   : > { %3518 = vadd.xlane.f32.xlu1 %v3517_v63  ;;  %v6016_v63 = vld [vmem:[#allocation12 + $0x108] sm:$0xff]  }
0x1414   : > { %v3519_v35 = vpop.xlane.xlu1 %3518 }
0x1415   : > { %6084 = vrcp.f32 %v3519_v35  ;;  %v6017_v35 = vld [vmem:[#allocation12 + $0x100] sm:$0xff]  }
0x1422   : > { %v6085_v4 = vpop.eup %6084 }
0x1423   : > { %v3521_v11 = vmul.f32 %v6085_v4, %v6083_v61  ;;  %v6015_v61 = vld [vmem:[#allocation12 + $0x110] sm:$0xff]  }
0x1425   : > { %v3522_v1 = vpack.c.bf16 %v3521_v11, %v3521_v11  ;;  %v2708_v11 = vrot.slane %v6953_v0, %v686_v24 }
0x1427   : > { %5398 = vmatmul.mubr.msk.bf16.vlgmr.msra.gmra.mxu0 %vm1490_vm4, %v3522_v1  ;;  %v3379_v10 = vadd.f32 %v6958_v9, %v2708_v11  ;;  %v2692_v1 = vrot.slane %v6953_v0, %v6731_v31 }
0x1428   : > { %5402 = vmatpush3.bf16.xpose.msra.mxu0 %v3589_v14  ;;  %5403 = vmatprep.mubr.msk.bf16.mxu0 %vm6392_vm1, %v6390_v2 }
0x1429   : > { %5413 = vmatprep.subr.bf16.mxu0 %v6390_v2  ;;  %v3886_v17 = vpack.c.bf16 %v3379_v10, %v3379_v10 }
0x142f   : > { %5404 = vmatmul.mubr.bf16.vlgmr.msra.gmra.mxu0 %v3588_v19 }
0x1430   : > { %5429 = vmatprep.mubr.msk.bf16.mxu0 %vm6392_vm1, %v6390_v2  ;;  %5414 = vmatpush3.bf16.msra.mxu0 %v6018_v59 }
0x1431   : > { %5415 = vmatprep.subr.bf16.mxu0 %v6390_v2 }
0x1434   : > { %5416 = vmatpush3.bf16.msra.mxu0 %v6019_v45 }
0x1435   : > { %5417 = vmatprep.subr.bf16.mxu0 %v6390_v2 }
0x1438   : > { %5418 = vmatpush3.bf16.msra.mxu0 %v6020_v34 }
0x1439   : > { %5419 = vmatprep.subr.bf16.mxu0 %v6390_v2 }
0x143c   : > { %5420 = vmatpush3.bf16.msra.mxu0 %v6021_v36 }
0x143d   : > { %5421 = vmatprep.subr.bf16.mxu0 %v6390_v2 }
0x1440   : > { %5422 = vmatpush3.bf16.msra.mxu0 %v6022_v37  ;;  %v6026_v37 = vld [vmem:[#allocation12 + $0x1b8] sm:$0xff]  }
0x1441   : > { %5423 = vmatprep.subr.bf16.mxu0 %v6390_v2 }
0x1444   : > { %5424 = vmatpush3.bf16.msra.mxu0 %v6023_v38  ;;  %v6027_v38 = vld [vmem:[#allocation12 + $0x1b0] sm:$0xff]  }
0x1445   : > { %5425 = vmatprep.subr.bf16.mxu0 %v6390_v2 }
0x1448   : > { %5426 = vmatpush3.bf16.msra.mxu0 %v6024_v39  ;;  %v6028_v39 = vld [vmem:[#allocation12 + $0x1a8] sm:$0xff]  }
0x1449   : > { %5427 = vmatprep.subr.bf16.mxu0 %v6390_v2 }
0x144c   : > { %5428 = vmatpush3.bf16.msra.mxu0 %v6025_v41  ;;  %v6029_v41 = vld [vmem:[#allocation12 + $0x1a0] sm:$0xff]  }
0x144d   : > { %5453 = vmatprep.subr.bf16.mxu0 %v6390_v2 }
0x14e7   : > { %v6995_v16 = vpop.f32.mrf.mxu0 }
0x14e8   : > { %v3570_v4 = vpack.c.bf16 %v6995_v16, %v6995_v16 }
0x14e9   : > { %v5399_v6 = vpop.f32.mrf.mxu0 }
0x14ea   : > { %v3297_v6 = vadd.f32 %v6947_v53, %v2692_v1 }
0x14eb   : > { %v3567_v62 = vpop.f32.mrf.mxu0 }
0x14ec   : > { %v3885_v62 = vpack.c.bf16 %v3297_v6, %v3297_v6 }
0x14ed   : > { %v5400_v20 = vpop.f32.mrf.mxu0 }
0x14ef   : > { %v3624_v23 = vpop.f32.mrf.mxu0 }
0x14f0   : > { %v3630_v40 = vmul.f32 0.35355338, %v3624_v23 }
0x14f1   : > { %v5405_v25 = vpop.f32.mrf.mxu0 }
0x14f2   : > { %v3631_v26 = vsel %vm6755_vm3, %v3630_v40, -1e+30 }
0x14f3   : > { %v3627_v22 = vpop.f32.mrf.mxu0  ;;  %v3632_v54 = vsel %vm1490_vm4, %v3631_v26, -inf }
0x14f4   : > { %3633 = vmax.xlane.f32.xlu0 %v3632_v54 }
0x14f5   : > { %v5406_v27 = vpop.f32.mrf.mxu0 }
0x157d   : > { %v3634_v15 = vpop.xlane.xlu0 %3633 }
0x157e   : > { %v3635_v28 = vsub.f32 %v3631_v26, %v3634_v15 }
0x1580   : > { %v3636_v21 = vmul.f32 1.442695, %v3635_v28 }
0x1582   : > { %6086 = vpow2.f32 %v3636_v21 }
0x158f   : > { %v6087_v29 = vpop.eup %6086 }
0x1590   : > { %v3638_v46 = vsel %vm1490_vm4, %v6087_v29, 0.0 }
0x1591   : > { %3639 = vadd.xlane.f32.xlu1 %v3638_v46 }
0x161a   : > { %v3640_v42 = vpop.xlane.xlu1 %3639 }
0x161b   : > { %6088 = vrcp.f32 %v3640_v42  ;;  %v6030_v42 = vld [vmem:[#allocation12 + $0x198] sm:$0xff]  }
0x1628   : > { %v6089_v43 = vpop.eup %6088 }
0x1629   : > { %v3642_v8 = vmul.f32 %v6089_v43, %v6087_v29  ;;  %v6031_v43 = vld [vmem:[#allocation12 + $0x190] sm:$0xff]  }
0x162b   : > { %v3643_v47 = vpack.c.bf16 %v3642_v8, %v3642_v8  ;;  %v6032_v8 = vld [vmem:[#allocation12 + $0x188] sm:$0xff]  }
0x162d   : > { %5410 = vmatmul.mubr.msk.bf16.vlgmr.msra.gmra.mxu1 %vm1490_vm4, %v3643_v47  ;;  %v2712_v47 = vrot.slane %v6953_v0, %v690_v13  ;;  %v4151_v13 = vpack.c.bf16 %v6973_v30, %v6973_v30 }
0x162e   : > { %5434 = vmatpush3.bf16.msra.mxu1 %v6010_v44  ;;  %5449 = vmatprep.mubr.msk.bf16.mxu1 %vm6392_vm1, %v6390_v2 }
0x162f   : > { %5435 = vmatprep.subr.bf16.mxu1 %v6390_v2  ;;  %v4156_v18 = vsel %vm1507_vm2, %v4151_v13, 0 }
0x1632   : > { %5436 = vmatpush3.bf16.msra.mxu1 %v6011_v48 }
0x1633   : > { %5437 = vmatprep.subr.bf16.mxu1 %v6390_v2 }
0x1636   : > { %5438 = vmatpush3.bf16.msra.mxu1 %v6012_v51  ;;  %v3381_v51 = vadd.f32 %v6962_v7, %v2712_v47 }
0x1637   : > { %5439 = vmatprep.subr.bf16.mxu1 %v6390_v2 }
0x163a   : > { %5440 = vmatpush3.bf16.msra.mxu1 %v6013_v56 }
0x163b   : > { %5441 = vmatprep.subr.bf16.mxu1 %v6390_v2 }
0x163e   : > { %5442 = vmatpush3.bf16.msra.mxu1 %v6014_v58  ;;  %v2696_v58 = vrot.slane %v6953_v0, %v6734_v32  ;;  %v6033_v32 = vld [vmem:[#allocation12 + $0x180] sm:$0xff]  }
0x163f   : > { %5443 = vmatprep.subr.bf16.mxu1 %v6390_v2 }
0x1642   : > { %5444 = vmatpush3.bf16.msra.mxu1 %v6015_v61 }
0x1643   : > { %5445 = vmatprep.subr.bf16.mxu1 %v6390_v2 }
0x1646   : > { %5446 = vmatpush3.bf16.msra.mxu1 %v6016_v63  ;;  %v4096_v63 = vpack.c.bf16 %v3381_v51, %v3381_v51 }
0x1647   : > { %5447 = vmatprep.subr.bf16.mxu1 %v6390_v2 }
0x164a   : > { %5448 = vmatpush3.bf16.msra.mxu1 %v6017_v35  ;;  %v3299_v35 = vadd.f32 %v6951_v55, %v2696_v58  ;;  %v6042_v58 = vld [vmem:[#allocation13 + $0x78] sm:$0xff]  }
0x164b   : > { %5459 = vmatprep.subr.bf16.mxu1 %v6390_v2 }
0x164c   : > { %v4095_v7 = vpack.c.bf16 %v3299_v35, %v3299_v35 }
0x164d   : > { %5450 = vmatmul.mubr.bf16.vlgmr.msra.gmra.mxu1 %v3570_v4 }
0x164e   : > { %5460 = vmatpush3.bf16.msra.mxu1 %v3946_v5  ;;  %5461 = vmatprep.mubr.msk.bf16.mxu1 %vm6392_vm1, %v6390_v2 }
0x164f   : > { %5485 = vmatprep.subr.bf16.mxu1 %v6390_v2 }
0x16ed   : > { %v3685_v12 = vpop.f32.mrf.mxu1 }
0x16ee   : > { %v3691_v14 = vpack.c.bf16 %v3685_v12, %v3685_v12 }
0x16ef   : > { %v5411_v19 = vpop.f32.mrf.mxu1 }
0x16f0   : > { %5430 = vmatmul.mubr.bf16.vlgmr.msra.gmra.mxu0 %v3691_v14 }
0x16f1   : > { %5454 = vmatpush3.bf16.xpose.msra.mxu0 %v3886_v17  ;;  %v3688_v16 = vpop.f32.mrf.mxu1  ;;  %5455 = vmatprep.mubr.msk.bf16.mxu0 %vm6392_vm1, %v6390_v2 }
0x16f2   : > { %5465 = vmatprep.subr.bf16.mxu0 %v6390_v2 }
0x16f3   : > { %v5412_v24 = vpop.f32.mrf.mxu1 }
0x16f8   : > { %5456 = vmatmul.mubr.bf16.vlgmr.msra.gmra.mxu0 %v3885_v62 }
0x16f9   : > { %5481 = vmatprep.mubr.msk.bf16.mxu0 %vm6392_vm1, %v6390_v2  ;;  %5466 = vmatpush3.bf16.msra.mxu0 %v6026_v37 }
0x16fa   : > { %5467 = vmatprep.subr.bf16.mxu0 %v6390_v2 }
0x16fd   : > { %5468 = vmatpush3.bf16.msra.mxu0 %v6027_v38 }
0x16fe   : > { %5469 = vmatprep.subr.bf16.mxu0 %v6390_v2 }
0x1701   : > { %5470 = vmatpush3.bf16.msra.mxu0 %v6028_v39 }
0x1702   : > { %5471 = vmatprep.subr.bf16.mxu0 %v6390_v2 }
0x1705   : > { %5472 = vmatpush3.bf16.msra.mxu0 %v6029_v41 }
0x1706   : > { %5473 = vmatprep.subr.bf16.mxu0 %v6390_v2 }
0x1709   : > { %5474 = vmatpush3.bf16.msra.mxu0 %v6030_v42 }
0x170a   : > { %5475 = vmatprep.subr.bf16.mxu0 %v6390_v2 }
0x170d   : > { %v7040_v31 = vpop.f32.mrf.mxu1  ;;  %5476 = vmatpush3.bf16.msra.mxu0 %v6031_v43 }
0x170e   : > { %5477 = vmatprep.subr.bf16.mxu0 %v6390_v2 }
0x170f   : > { %v5451_v9 = vpop.f32.mrf.mxu1 }
0x1711   : > { %v3882_v20 = vpop.f32.mrf.mxu1  ;;  %5478 = vmatpush3.bf16.msra.mxu0 %v6032_v8  ;;  %v5054_v8 = vld [vmem:[%s7181_s6 + $0x1] ss:$0 sm:$0xff] }
0x1712   : > { %5479 = vmatprep.subr.bf16.mxu0 %v6390_v2 }
0x1713   : > { %v5452_v23 = vpop.f32.mrf.mxu1 }
0x1715   : > { %5480 = vmatpush3.bf16.msra.mxu0 %v6033_v32  ;;  %v6045_v32 = vld [vmem:[#allocation13 + $0x60] sm:$0xff]  }
0x1716   : > { %5517 = vmatprep.subr.bf16.mxu0 %v6390_v2 }
0x17b0   : > { %v7042_v40 = vpop.f32.mrf.mxu0 }
0x17b1   : > { %v3880_v20 = vadd.f32 %v7040_v31, %v7042_v40  ;;  %v6036_v31 = vld [vmem:[#allocation12 + $0x1e8] sm:$0xff]   ;;  %v6037_v40 = vld [vmem:[#allocation12 + $0x1e0] sm:$0xff]  }
0x17b2   : > { %v5431_v25 = vpop.f32.mrf.mxu0 }
0x17b4   : > { %v3794_v26 = vpop.f32.mrf.mxu0 }
0x17b6   : > { %v5432_v22 = vpop.f32.mrf.mxu0 }
0x17b8   : > { %v3921_v54 = vpop.f32.mrf.mxu0 }
0x17b9   : > { %v3927_v53 = vmul.f32 0.35355338, %v3921_v54 }
0x17ba   : > { %v5457_v27 = vpop.f32.mrf.mxu0 }
0x17bb   : > { %v3928_v15 = vsel %vm6755_vm3, %v3927_v53, -1e+30 }
0x17bc   : > { %v3924_v28 = vpop.f32.mrf.mxu0  ;;  %v3929_v21 = vsel %vm1490_vm4, %v3928_v15, -inf }
0x17bd   : > { %3930 = vmax.xlane.f32.xlu0 %v3929_v21  ;;  %v6035_v21 = vld [vmem:[#allocation12 + $0x1f0] sm:$0xff]  }
0x17be   : > { %v5458_v29 = vpop.f32.mrf.mxu0 }
0x17bf   : > { %v6038_v29 = vld [vmem:[#allocation12 + $0x1d8] sm:$0xff]  }
0x1846   : > { %v3931_v46 = vpop.xlane.xlu0 %3930 }
0x1847   : > { %v3932_v59 = vsub.f32 %v3928_v15, %v3931_v46  ;;  %v6034_v15 = vld [vmem:[#allocation12 + $0x1f8] sm:$0xff]   ;;  %v6039_v46 = vld [vmem:[#allocation12 + $0x1d0] sm:$0xff]  }
0x1849   : > { %v3933_v45 = vmul.f32 1.442695, %v3932_v59  ;;  %v6040_v59 = vld [vmem:[#allocation12 + $0x1c8] sm:$0xff]  }
0x184b   : > { %6090 = vpow2.f32 %v3933_v45  ;;  %v6041_v45 = vld [vmem:[#allocation12 + $0x1c0] sm:$0xff]  }
0x1858   : > { %v6091_v34 = vpop.eup %6090 }
0x1859   : > { %v3935_v36 = vsel %vm1490_vm4, %v6091_v34, 0.0 }
0x185a   : > { %3936 = vadd.xlane.f32.xlu1 %v3935_v36 }
0x18e3   : > { %v3937_v44 = vpop.xlane.xlu1 %3936 }
0x18e4   : > { %6092 = vrcp.f32 %v3937_v44 }
0x18f1   : > { %v6093_v48 = vpop.eup %6092 }
0x18f2   : > { %v3939_v56 = vmul.f32 %v6093_v48, %v6091_v34 }
0x18f4   : > { %v3940_v61 = vpack.c.bf16 %v3939_v56, %v3939_v56 }
0x18f6   : > { %5462 = vmatmul.mubr.msk.bf16.vlgmr.msra.gmra.mxu1 %vm1490_vm4, %v3940_v61 }
0x18f7   : > { %5486 = vmatpush3.bf16.xpose.msra.mxu1 %v4096_v63  ;;  %5487 = vmatprep.mubr.msk.bf16.mxu1 %vm6392_vm1, %v6390_v2 }
0x18f8   : > { %5491 = vmatprep.subr.bf16.mxu1 %v6390_v2 }
0x18fe   : > { %5488 = vmatmul.mubr.bf16.vlgmr.msra.gmra.mxu1 %v4095_v7 }
0x18ff   : > { %5492 = vmatpush3.bf16.msra.mxu1 %v4156_v18  ;;  %5493 = vmatprep.mubr.msk.bf16.mxu1 %vm6392_vm1, %v6390_v2  ;;  %v6043_v18 = vld [vmem:[#allocation13 + $0x70] sm:$0xff]  }
0x1900   : > { %5497 = vmatprep.subr.bf16.mxu1 %v6390_v2 }
0x19b6   : > { %v3982_v55 = vpop.f32.mrf.mxu1 }
0x19b7   : > { %v3988_v0 = vpack.c.bf16 %v3982_v55, %v3982_v55  ;;  %v6046_v55 = vld [vmem:[#allocation13 + $0x58] sm:$0xff]  }
0x19b8   : > { %v5463_v4 = vpop.f32.mrf.mxu1 }
0x19b9   : > { %5482 = vmatmul.mubr.bf16.vlgmr.msra.gmra.mxu0 %v3988_v0  ;;  %v6047_v0 = vld [vmem:[#allocation13 + $0x50] sm:$0xff]   ;;  %v6048_v4 = vld [vmem:[#allocation13 + $0x48] sm:$0xff]  }
0x19ba   : > { %v3985_v5 = vpop.f32.mrf.mxu1  ;;  %5533 = vmatprep.mubr.msk.bf16.mxu0 %vm6392_vm1, %v6390_v2  ;;  %5518 = vmatpush3.bf16.msra.mxu0 %v6042_v58 }
0x19bb   : > { %5519 = vmatprep.subr.bf16.mxu0 %v6390_v2  ;;  %v6049_v5 = vld [vmem:[#allocation13 + $0x40] sm:$0xff]  }
0x19bc   : > { %v5464_v30 = vpop.f32.mrf.mxu1 }
0x19be   : > { %v4131_v11 = vpop.f32.mrf.mxu1  ;;  %5520 = vmatpush3.bf16.msra.mxu0 %v6043_v18 }
0x19bf   : > { %v4137_v10 = vmul.f32 0.35355338, %v4131_v11  ;;  %5521 = vmatprep.subr.bf16.mxu0 %v6390_v2 }
0x19c0   : > { %v5489_v12 = vpop.f32.mrf.mxu1 }
0x19c1   : > { %v4138_v1 = vsel %vm6755_vm3, %v4137_v10, -1e+30  ;;  %v5055_v12 = vld [vmem:[%s7182_s7 + $0x2] sm:$0x3] }
0x19c2   : > { %v4134_v14 = vpop.f32.mrf.mxu1  ;;  %v4139_v17 = vsel %vm1490_vm4, %v4138_v1, -inf }
0x19c3   : > { %4140 = vmax.xlane.f32.xlu0 %v4139_v17 }
0x19c4   : > { %v5490_v19 = vpop.f32.mrf.mxu1 }
0x19c5   : > { %v4338_v19 = vrot.slane %v5055_v12, %v6679_v52 }
0x1a4c   : > { %v4141_v16 = vpop.xlane.xlu0 %4140 }
0x1a4d   : > { %v4142_v6 = vsub.f32 %v4138_v1, %v4141_v16  ;;  %v4333_v1 = vrot.slane %v5055_v12, %v6676_v50 }
0x1a4f   : > { %v4143_v24 = vmul.f32 1.442695, %v4142_v6 }
0x1a51   : > { %6094 = vpow2.f32 %v4143_v24 }
0x1a5e   : > { %v6095_v62 = vpop.eup %6094 }
0x1a5f   : > { %v4145_v9 = vsel %vm1490_vm4, %v6095_v62, 0.0 }
0x1a60   : > { %4146 = vadd.xlane.f32.xlu1 %v4145_v9  ;;  %v6050_v9 = vld [vmem:[#allocation15 + $0x78] sm:$0xff]  }
0x1a79   : > { %v4088_v23 = vpop.f32.mrf.mxu0 }
0x1a7a   : > { %v4094_v25 = vadd.f32 %v4088_v23, %v3880_v20  ;;  %v6051_v20 = vld [vmem:[#allocation15 + $0x70] sm:$0xff]   ;;  %v6052_v23 = vld [vmem:[#allocation15 + $0x68] sm:$0xff]  }
0x1a7b   : > { %v5483_v60 = vpop.f32.mrf.mxu0 }
0x1a7c   : > { %v6054_v60 = vld [vmem:[#allocation15 + $0x58] sm:$0xff]  }
0x1a7d   : > { %v4091_v26 = vpop.f32.mrf.mxu0 }
0x1a7e   : > { %v6055_v26 = vld [vmem:[#allocation15 + $0x50] sm:$0xff]  }
0x1a7f   : > { %v5484_v22 = vpop.f32.mrf.mxu0 }
0x1a80   : > { %v6056_v22 = vld [vmem:[#allocation15 + $0x48] sm:$0xff]  }
0x1ae9   : > { %v4147_v54 = vpop.xlane.xlu1 %4146 }
0x1aea   : > { %6096 = vrcp.f32 %v4147_v54  ;;  %v6057_v54 = vld [vmem:[#allocation15 + $0x40] sm:$0xff]  }
0x1af7   : > { %v6097_v53 = vpop.eup %6096 }
0x1af8   : > { %v4149_v27 = vmul.f32 %v6097_v53, %v6095_v62  ;;  %v5057_v53 = vld [vmem:[%s7184_s9 + $0x1] ss:$0 sm:$0xff] }
0x1afa   : > { %v4150_v28 = vpack.c.bf16 %v4149_v27, %v4149_v27 }
0x1afc   : > { %5494 = vmatmul.mubr.msk.bf16.vlgmr.msra.gmra.mxu1 %vm1490_vm4, %v4150_v28 }
0x1afd   : > { %5498 = vmatpush3.bf16.msra.mxu1 %v6034_v15  ;;  %5513 = vmatprep.mubr.msk.bf16.mxu1 %vm6392_vm1, %v6390_v2 }
0x1afe   : > { %5499 = vmatprep.subr.bf16.mxu1 %v6390_v2 }
0x1b01   : > { %5500 = vmatpush3.bf16.msra.mxu1 %v6035_v21 }
0x1b02   : > { %5501 = vmatprep.subr.bf16.mxu1 %v6390_v2 }
0x1b05   : > { %5502 = vmatpush3.bf16.msra.mxu1 %v6036_v31 }
0x1b06   : > { %5503 = vmatprep.subr.bf16.mxu1 %v6390_v2 }
0x1b09   : > { %5504 = vmatpush3.bf16.msra.mxu1 %v6037_v40 }
0x1b0a   : > { %5505 = vmatprep.subr.bf16.mxu1 %v6390_v2 }
0x1b0d   : > { %5506 = vmatpush3.bf16.msra.mxu1 %v6038_v29 }
0x1b0e   : > { %5507 = vmatprep.subr.bf16.mxu1 %v6390_v2 }
0x1b11   : > { %5508 = vmatpush3.bf16.msra.mxu1 %v6039_v46 }
0x1b12   : > { %5509 = vmatprep.subr.bf16.mxu1 %v6390_v2 }
0x1b15   : > { %5510 = vmatpush3.bf16.msra.mxu1 %v6040_v59 }
0x1b16   : > { %5511 = vmatprep.subr.bf16.mxu1 %v6390_v2 }
0x1b19   : > { %5512 = vmatpush3.bf16.msra.mxu1 %v6041_v45 }
0x1b1a   : > { %5537 = vmatprep.subr.bf16.mxu1 %v6390_v2 }
0x1bbc   : > { %v4192_v34 = vpop.f32.mrf.mxu1 }
0x1bbd   : > { %v4198_v36 = vpack.c.bf16 %v4192_v34, %v4192_v34 }
0x1bbe   : > { %v5495_v37 = vpop.f32.mrf.mxu1 }
0x1bbf   : > { %5514 = vmatmul.mubr.bf16.vlgmr.msra.gmra.mxu1 %v4198_v36 }
0x1bc0   : > { %v4195_v38 = vpop.f32.mrf.mxu1  ;;  %5553 = vmatprep.mubr.msk.bf16.mxu1 %vm6392_vm1, %v6390_v2  ;;  %5538 = vmatpush3.bf16.msra.mxu1 %v6050_v9 }
0x1bc1   : > { %5539 = vmatprep.subr.bf16.mxu1 %v6390_v2 }
0x1bc2   : > { %v5496_v39 = vpop.f32.mrf.mxu1 }
0x1bc4   : > { %5540 = vmatpush3.bf16.msra.mxu1 %v6051_v20 }
0x1bc5   : > { %5541 = vmatprep.subr.bf16.mxu1 %v6390_v2 }
0x1bc8   : > { %5542 = vmatpush3.bf16.msra.mxu1 %v6052_v23 }
0x1bc9   : > { %5543 = vmatprep.subr.bf16.mxu1 %v6390_v2 }
0x1c7f   : > { %v4298_v41 = vpop.f32.mrf.mxu1 }
0x1c80   : > { %v4304_v42 = vadd.f32 %v4298_v41, %v4094_v25  ;;  %v6053_v25 = vld [vmem:[#allocation15 + $0x60] sm:$0xff]   ;;  %v5067_v41 = vld [vmem:[%s7186_s11 + $0x1] ss:$0 sm:$0xff] }
0x1c81   : > { %v5515_v43 = vpop.f32.mrf.mxu1  ;;  %5544 = vmatpush3.bf16.msra.mxu1 %v6053_v25 }
0x1c82   : > { %v4305_v44 = vadd.f32 %v4304_v42, %v6925_v33  ;;  %v6044_v33 = vld [vmem:[#allocation13 + $0x68] sm:$0xff]   ;;  %5545 = vmatprep.subr.bf16.mxu1 %v6390_v2 }
0x1c83   : > { %v4301_v47 = vpop.f32.mrf.mxu1  ;;  %5522 = vmatpush3.bf16.msra.mxu0 %v6044_v33  ;;  %v5076_v33 = vld [vmem:[%s7187_s12 + $0x2] sm:$0x3] }
0x1c84   : > { %v4314_v48 = vadd.f32 %v5054_v8, %v4305_v44  ;;  %5523 = vmatprep.subr.bf16.mxu0 %v6390_v2 }
0x1c85   : > { %v5516_v51 = vpop.f32.mrf.mxu1  ;;  %5546 = vmatpush3.bf16.msra.mxu1 %v6054_v60 }
0x1c86   : > { %v4317_v56 = vmul.f32 %v6662_v3, %v4314_v48  ;;  %5547 = vmatprep.subr.bf16.mxu1 %v6390_v2 }
0x1c87   : > { %5524 = vmatpush3.bf16.msra.mxu0 %v6045_v32  ;;  %v4597_v32 = vrot.slane %v5076_v33, %v6676_v50 }
0x1c88   : > { %4318 = vadd.xlane.f32.xlu0 %v4317_v56  ;;  %5525 = vmatprep.subr.bf16.mxu0 %v6390_v2 }
0x1c89   : > { %5548 = vmatpush3.bf16.msra.mxu1 %v6055_v26 }
0x1c8a   : > { %5549 = vmatprep.subr.bf16.mxu1 %v6390_v2 }
0x1c8b   : > { %5526 = vmatpush3.bf16.msra.mxu0 %v6046_v55 }
0x1c8c   : > { %5527 = vmatprep.subr.bf16.mxu0 %v6390_v2 }
0x1c8d   : > { %5550 = vmatpush3.bf16.msra.mxu1 %v6056_v22 }
0x1c8e   : > { %5551 = vmatprep.subr.bf16.mxu1 %v6390_v2 }
0x1c8f   : > { %5528 = vmatpush3.bf16.msra.mxu0 %v6047_v0 }
0x1c90   : > { %5529 = vmatprep.subr.bf16.mxu0 %v6390_v2 }
0x1c91   : > { %5552 = vmatpush3.bf16.msra.mxu1 %v6057_v54 }
0x1c93   : > { %5530 = vmatpush3.bf16.msra.mxu0 %v6048_v4  ;;  %v4602_v4 = vrot.slane %v5076_v33, %v6679_v52 }
0x1c94   : > { %5531 = vmatprep.subr.bf16.mxu0 %v6390_v2 }
0x1c97   : > { %5532 = vmatpush3.bf16.msra.mxu0 %v6049_v5 }
0x1d11   : > { %v4319_v61 = vpop.xlane.xlu0 %4318 }
0x1d12   : > { %v4320_v63 = vmul.f32 0.03125, %v4319_v61 }
0x1d14   : > { %v4321_v35 = vsub.f32 %v4314_v48, %v4320_v63 }
0x1d16   : > { %v4322_v13 = vmul.f32 %v6662_v3, %v4321_v35 }
0x1d18   : > { %v4323_v7 = vmul.f32 %v4322_v13, %v4322_v13 }
0x1d1a   : > { %4324 = vadd.xlane.f32.xlu1 %v4323_v7 }
0x1da3   : > { %v4325_v30 = vpop.xlane.xlu1 %4324 }
0x1da4   : > { %v4326_v11 = vmul.f32 0.03125, %v4325_v30 }
0x1da6   : > { %v4327_v10 = vadd.f32 1e-12, %v4326_v11  ;;  %v4769_v11 = vsel %vm529_vm5, 1.0, %v6390_v2 }
0x1da8   : > { %6098 = vrsqrt.f32 %v4327_v10 }
0x1db5   : > { %v6099_v14 = vpop.eup %6098 }
0x1db6   : > { %v4329_v17 = vmul.f32 %v6099_v14, %v4322_v13 }
0x1db8   : > { %v4334_v16 = vmul.f32 %v4333_v1, %v4329_v17 }
0x1dba   : > { %v4339_v6 = vadd.f32 %v4338_v19, %v4334_v16 }
0x1dbc   : > { %v4340_v24 = vmul.f32 %v6662_v3, %v4339_v6 }
0x1dbe   : > { %v4360_v62 = vpack.c.bf16 %v4340_v24, %v4340_v24 }
0x1dc0   : > { %5534 = vmatmul.mubr.bf16.vlgmr.msra.gmra.mxu0 %v4360_v62 }
0x1e80   : > { %v4449_v27 = vpop.f32.mrf.mxu0 }
0x1e81   : > { %v4450_v15 = vadd.f32 %v5057_v53, %v4449_v27 }
0x1e82   : > { %v5535_v28 = vpop.f32.mrf.mxu0 }
0x1e83   : > { %v4455_v21 = vmul.f32 %v4450_v15, %v4450_v15 }
0x1e84   : > { %v4452_v31 = vpop.f32.mrf.mxu0 }
0x1e85   : > { %v4456_v40 = vmul.f32 %v4455_v21, %v4450_v15 }
0x1e86   : > { %v5536_v29 = vpop.f32.mrf.mxu0 }
0x1e87   : > { %v4457_v46 = vmul.f32 0.044715, %v4456_v40 }
0x1e89   : > { %v4458_v59 = vadd.f32 %v4457_v46, %v4450_v15 }
0x1e8b   : > { %v4459_v45 = vmul.f32 0.7978846, %v4458_v59 }
0x1e8d   : > { %6100 = vtanh.f32 %v4459_v45 }
0x1e9a   : > { %v6101_v34 = vpop.eup %6100 }
0x1e9b   : > { %v4461_v36 = vadd.f32 1.0, %v6101_v34 }
0x1e9d   : > { %v4462_v37 = vmul.f32 0.5, %v4461_v36 }
0x1e9f   : > { %v4463_v38 = vmul.f32 %v4462_v37, %v4450_v15 }
0x1ea1   : > { %v4483_v39 = vpack.c.bf16 %v4463_v38, %v4463_v38 }
0x1ea3   : > { %5554 = vmatmul.mubr.bf16.vlgmr.msra.gmra.mxu1 %v4483_v39 }
0x1f63   : > { %v4572_v42 = vpop.f32.mrf.mxu1 }
0x1f64   : > { %v4573_v43 = vadd.f32 %v5067_v41, %v4572_v42 }
0x1f65   : > { %v5555_v8 = vpop.f32.mrf.mxu1 }
0x1f66   : > { %v4578_v44 = vadd.f32 %v4573_v43, %v4340_v24 }
0x1f67   : > { %v4575_v47 = vpop.f32.mrf.mxu1 }
0x1f68   : > { %v4581_v48 = vmul.f32 %v6662_v3, %v4578_v44 }
0x1f69   : > { %v5556_v51 = vpop.f32.mrf.mxu1 }
0x1f6a   : > { %4582 = vadd.xlane.f32.xlu0 %v4581_v48 }
0x1ff3   : > { %v4583_v56 = vpop.xlane.xlu0 %4582 }
0x1ff4   : > { %v4584_v58 = vmul.f32 0.03125, %v4583_v56 }
0x1ff6   : > { %v4585_v61 = vsub.f32 %v4578_v44, %v4584_v58 }
0x1ff8   : > { %v4586_v63 = vmul.f32 %v6662_v3, %v4585_v61 }
0x1ffa   : > { %v4587_v35 = vmul.f32 %v4586_v63, %v4586_v63 }
0x1ffc   : > { %4588 = vadd.xlane.f32.xlu1 %v4587_v35 }
0x2085   : > { %v4589_v13 = vpop.xlane.xlu1 %4588 }
0x2086   : > { %v4590_v7 = vmul.f32 0.03125, %v4589_v13 }
0x2088   : > { %v4591_v18 = vadd.f32 1e-12, %v4590_v7 }
0x208a   : > { %6102 = vrsqrt.f32 %v4591_v18 }
0x2097   : > { %v6103_v55 = vpop.eup %6102 }
0x2098   : > { %v4593_v0 = vmul.f32 %v6103_v55, %v4586_v63 }
0x209a   : > { %v4598_v5 = vmul.f32 %v4597_v32, %v4593_v0 }
0x209c   : > { %v4603_v30 = vadd.f32 %v4602_v4, %v4598_v5 }
0x209e   : > { %v4604_v10 = vmul.f32 %v6662_v3, %v4603_v30 }
0x20a0   : > { %v4605_v50 = vmul.f32 %v4769_v11, %v4604_v10 }
0x20a2   : > { %4606 = vst [vmem:[%s518_s20] sm:$0xff] %v4605_v50 }
0x20a3   : > { %6309 = shalt.err (!%p6306_p1)
}
0x20a4   : > { %s6310_s17 = scalar_lea.hbm %s4619_s0, 128  ;;  %s6314_s27 = scalar_lea.hbm %s7188_s13, 256 }
0x20a5   : > { %p6311_p3 = scmp.ne.s32.totalorder %s4619_s0, %s6310_s17  ;;  %p6315_p12 = scmp.lt.s32.totalorder %s4619_s0, %s7188_s13 }
0x20a6   : > { %p6316_p10 = scmp.lt.s32.totalorder %s6314_s27, %s6310_s17 }
0x20a7   : > { %p6312_p6 = pnand %p6311_p3, %p7230_p2 }
0x20a8   : > { %p6317_p7 = por %p6316_p10, %p6315_p12 }
0x20a9   : > { %p6313_p11 = pneg %p6312_p6 }
0x20ab   : > { %p6318_p5 = pnand %p6317_p7, %p6313_p11 }
0x20ad   : > { %6321 = shalt.err (!%p6318_p5)
}
0x20ae   : > { %5583 = dma.vmem_to_hbm [thread:$0]  (%p7230_p2), %s4622_s24, 128, %s4619_s0, %s4608_s3  }
0x20af PF: > { %s4633_s25 = sand.u32 1, %s6362_s28   ;;  %p7231_p9 = scmp.ne.s32.totalorder %s7218_s15, 0 }
0x20b0   : > { %p7232_p8 = scmp.ge.s32.totalorder %s6374_s14, 2  ;;  %s4634_s20 = scalar_lea.sflag [#allocation6], %s4633_s25 }
0x20b2   : > { %p5609_p4 = pnand %p7232_p8, %p7231_p9 }
0x20b4   : > { %p5610_p13 = pneg %p5609_p4 }
0x20b6   : > { %6357 = dma.done.wait (%p5610_p13), %s4634_s20, 128  }
0x20b7   : > { %6359 = vsyncadd (%p5610_p13), %s4634_s20, 4294967168  ;;  %s7233_s21 = sld [smem:[#allocation23_spill]]  ;;  %p33_p0 = scmp.ge.s32.totalorder %s6572_s23, 4  }
0x20b8   : > { %s7234_s28 = smov %s6366_s29  ;;  %s7235_s29 = smov %s6370_s30 }
0x20b9   : > { %s7237_s14 = smov %s6572_s23  ;;  %35 = sbr.rel (!%p33_p0) target bundleno = 19 (0x13), region = 153 }
0x20bd   : > { %s7236_s30 = smov %s7233_s21 }
0x20be   :  { %4639 = vsyncpa [#allocation5], 1 }
0x20bf   :  { %4641 = vsyncpa [#allocation5 + $0x1], 1 }
0x20c0   :  { %4642 = vsyncpa [#allocation8], 1 }
0x20c1   :  { %4643 = vsyncpa [#allocation11], 1 }
0x20c2   :  { %4644 = vsyncpa [#allocation14], 1 }
0x20c3   :  { %4645 = vsyncpa [#allocation6], 1 }
0x20c4   :  { %4647 = vsyncpa [#allocation6 + $0x1], 1 }

</bundles_post_ra>
